<compile_context>
chip_gen: v7x
topology: tpu7x:2x2x1
jax: 0.10.0
libtpu: 0.0.40
codegen_flags: <defaults>
</compile_context>

<pallas_src>
import math
import numpy as np
import jax
import jax.numpy as jnp
from jax.experimental import pallas as pl
from jax.experimental.pallas import tpu as pltpu

HEAD_NUM = 4
MEAN = 256
STD = 1

T = 8                    # sequence length (PyTorch dim 0 == MHA attention axis)
F = 4                    # feature_len    (PyTorch dim 1 == MHA batch axis; shift-mix axis)
E = 32                   # d_model
H = HEAD_NUM
DH = E // H              # per-head dim = 8
G = F * H                # independent (batch, head) attention problems = 16
FE = F * E               # flattened lane width = 128 (one full vreg row)
GT = G * T               # expanded row count = 128
LN_EPS = 1e-5
SCALE = 1.0 / math.sqrt(DH)
PREC = jax.lax.Precision.HIGHEST


# ---------------------------------------------------------------------------
# Single fused kernel (grid-free, everything 2-D lane-dense)
# ---------------------------------------------------------------------------
def ssan_kernel(x_ref, pqkv_ref, po_ref, mask_ref, avg_ref, rexp_ref, rcol_ref,
                vec_ref, o_ref):
    """Whole SSANBlock forward.

    x_ref    : (T, FE)        activations, lane-dense
    pqkv_ref : (FE, 3*FE)     [generateQ-mix ∘ Wq^T * scale | generateK-mix ∘ Wk^T | kron(I_F, Wv^T)]
    po_ref   : (FE, FE)       kron(I_F, Wo^T)      (out-projection)
    mask_ref : (GT, FE)       group mask: 1 iff row-group == lane-group
    avg_ref  : (FE, FE)       block-diag averaging matrix (1/E per d_model block)
    rexp_ref : (GT, T)        expand matrix: row i selects query t = i % T
    rcol_ref : (T, GT)        collapse matrix (= rexp^T)
    vec_ref  : (8, FE)        rows 0..5 = bq*scale, bk, bv, bo, gamma, beta (tiled over F)
    o_ref    : (T, FE)        residual + LayerNorm(MHA(Q, K, x))
    """
    x = x_ref[...]                                                    # (T, FE)
    vec = vec_ref[...]                                                # (8, FE)

    # generateQ / generateK / V + in-projection: ONE lane-dense MXU pass.
    qkv = jnp.dot(x, pqkv_ref[...], precision=PREC,
                  preferred_element_type=jnp.float32)                 # (T, 3*FE)
    qp = qkv[:, 0:FE] + vec[0:1]          # already scaled by 1/sqrt(DH)
    kp = qkv[:, FE:2 * FE] + vec[1:2]
    vp = qkv[:, 2 * FE:3 * FE] + vec[2:3]

    mask = mask_ref[...]                                              # (GT, FE)

    # Expand Q per (batch, head) group and keep only in-group lanes.
    q_exp = jnp.dot(rexp_ref[...], qp, precision=PREC,
                    preferred_element_type=jnp.float32) * mask        # (GT, FE)

    # Scores: s[g*T + t, u] = sum_{d in group g} Q[t, d] * K[u, d].
    s = jax.lax.dot_general(q_exp, kp, (((1,), (1,)), ((), ())),
                            precision=PREC,
                            preferred_element_type=jnp.float32)       # (GT, T)

    # Numerically-stable softmax over the key axis (last dim).
    s = s - jnp.max(s, axis=-1, keepdims=True)
    p = jnp.exp(s)
    denom = jnp.sum(p, axis=-1, keepdims=True)
    r = pl.reciprocal(denom, approx=True)                             # EUP slot
    r = r * (2.0 - denom * r)                                         # Newton -> ~f32 exact
    p = p * r

    # Context per group, re-masked, then collapsed back to (T, FE).
    ctx = jnp.dot(p, vp, precision=PREC,
                  preferred_element_type=jnp.float32) * mask          # (GT, FE)
    attn = jnp.dot(rcol_ref[...], ctx, precision=PREC,
                   preferred_element_type=jnp.float32)                # (T, FE)

    # Out-projection (block-diagonal Wo^T) + bias.
    y = jnp.dot(attn, po_ref[...], precision=PREC,
                preferred_element_type=jnp.float32) + vec[3:4]        # (T, FE)

    # LayerNorm over d_model per (t, f) token via block-averaging matmuls
    # (biased variance, eps = 1e-5); avoids any lane->sublane reshape.
    avg = avg_ref[...]                                                # (FE, FE)
    mu = jnp.dot(y, avg, precision=PREC, preferred_element_type=jnp.float32)
    dcen = y - mu
    var = jnp.dot(dcen * dcen, avg, precision=PREC,
                  preferred_element_type=jnp.float32)
    ln = dcen * jax.lax.rsqrt(var + LN_EPS)
    ln = ln * vec[4:5] + vec[5:6]

    # Residual add; (8, 128) output = full-vreg, unmasked store.
    o_ref[...] = x + ln


_N_IN = 8
_ssan_call = pl.pallas_call(
    ssan_kernel,
    out_shape=jax.ShapeDtypeStruct((T, FE), jnp.float32),
    in_specs=[pl.BlockSpec(memory_space=pltpu.MemorySpace.VMEM)
              for _ in range(_N_IN)],
    out_specs=pl.BlockSpec(memory_space=pltpu.MemorySpace.VMEM),
)


@jax.jit
def ssan_block_forward(x, kparams):
    """x: (T, F, E) float32 -> (T, F, E). Single fused Pallas kernel."""
    x2d = x.reshape(T, FE)                          # contiguous (free) reshape
    out2d = _ssan_call(x2d, kparams["pqkv"], kparams["po"], kparams["mask"],
                       kparams["avg"], kparams["rexp"], kparams["rcol"],
                       kparams["vecs"])
    return out2d.reshape(T, F, E)


# ---------------------------------------------------------------------------
# Raw (module-equivalent) parameters
# ---------------------------------------------------------------------------
def init_params(key):
    ks = jax.random.split(key, 12)
    a = jax.random.normal(ks[0], (F, E), jnp.float32)
    b = jax.random.normal(ks[1], (F, E), jnp.float32)
    c = jax.random.normal(ks[2], (F, E), jnp.float32)
    d = jax.random.normal(ks[3], (F, E), jnp.float32)
    N1 = float(MEAN + STD * jax.random.normal(ks[4], ()))
    N2 = float(MEAN + STD * jax.random.normal(ks[5], ()))
    w_in = 0.1 * jax.random.normal(ks[6], (3, E, E), jnp.float32)    # Wq, Wk, Wv
    b_in = 0.05 * jax.random.normal(ks[7], (3, 1, E), jnp.float32)   # bq, bk, bv
    wo = 0.1 * jax.random.normal(ks[8], (E, E), jnp.float32)
    bo = 0.05 * jax.random.normal(ks[9], (1, E), jnp.float32)
    gamma = 1.0 + 0.1 * jax.random.normal(ks[10], (1, E), jnp.float32)
    beta = 0.05 * jax.random.normal(ks[11], (1, E), jnp.float32)

    # Shift-accumulation masks.  The PyTorch forward guards BOTH loops (N1 and
    # N2) with `if math.floor(self.N1) > 1`, so gate m2 on floor(N1) as well.
    n1 = math.floor(N1)
    n2 = math.floor(N2)
    idx = np.arange(F)
    diff = idx[:, None] - idx[None, :]                 # [f, m] = f - m
    if n1 > 1:
        m1 = ((diff >= 1) & (diff <= n1 - 1)).astype(np.float32)
        m2 = ((-diff >= 1) & (-diff <= n2 - 1)).astype(np.float32)
    else:
        m1 = np.zeros((F, F), np.float32)
        m2 = np.zeros((F, F), np.float32)

    return dict(a=a, b=b, c=c, d=d,
                m1=jnp.asarray(m1), m2=jnp.asarray(m2),
                w_in=w_in, b_in=b_in, wo=wo, bo=bo, gamma=gamma, beta=beta)


# ---------------------------------------------------------------------------
# One-time host-side folding into lane-dense kernel operands (exact, float64)
# ---------------------------------------------------------------------------
def prepare_params(p):
    a = np.asarray(p["a"], np.float64)
    b = np.asarray(p["b"], np.float64)
    c = np.asarray(p["c"], np.float64)
    d = np.asarray(p["d"], np.float64)
    m1 = np.asarray(p["m1"], np.float64)               # [f, m]
    m2 = np.asarray(p["m2"], np.float64)
    w_in = np.asarray(p["w_in"], np.float64)
    wq, wk, wv = w_in[0], w_in[1], w_in[2]
    wo = np.asarray(p["wo"], np.float64)
    bq = np.asarray(p["b_in"], np.float64)[0, 0]
    bk = np.asarray(p["b_in"], np.float64)[1, 0]
    bv = np.asarray(p["b_in"], np.float64)[2, 0]
    bo = np.asarray(p["bo"], np.float64)[0]
    gamma = np.asarray(p["gamma"], np.float64)[0]
    beta = np.asarray(p["beta"], np.float64)[0]

    eye_f = np.eye(F)
    # coef[m, f, e]: Q[t,f,e] = sum_m coef[m,f,e] * x[t,m,e]
    coef_q = (eye_f[:, :, None]
              + m1.T[:, :, None] * a[:, None, :]
              + m2.T[:, :, None] * c[:, None, :])
    coef_k = (eye_f[:, :, None]
              + m1.T[:, :, None] * b[:, None, :]
              + m2.T[:, :, None] * d[:, None, :])

    def fold(coef, w):
        # P[m*E + e, f*E + o] = coef[m, f, e] * W[o, e]   (shift-mix fused with W^T)
        m4 = coef.transpose(0, 2, 1)[:, :, :, None] * w.T[None, :, None, :]
        return m4.reshape(FE, FE)

    pq = fold(coef_q, wq) * SCALE                      # fold attention scale into Q path
    pk = fold(coef_k, wk)
    pv = np.kron(eye_f, wv.T)                          # value path: no shift-mix
    pqkv = np.concatenate([pq, pk, pv], axis=1)        # (FE, 3*FE) -> one MXU pass
    po = np.kron(eye_f, wo.T)                          # out-projection

    vecs = np.zeros((8, FE), np.float64)               # lane vectors, tiled per f
    vecs[0] = np.tile(bq, F) * SCALE
    vecs[1] = np.tile(bk, F)
    vecs[2] = np.tile(bv, F)
    vecs[3] = np.tile(bo, F)
    vecs[4] = np.tile(gamma, F)
    vecs[5] = np.tile(beta, F)

    # Constant structural matrices for the 2-D masked-attention formulation.
    lane = np.arange(FE)
    row = np.arange(GT)
    mask = (row[:, None] // T == lane[None, :] // DH).astype(np.float64)   # (GT, FE)
    avg = (lane[:, None] // E == lane[None, :] // E).astype(np.float64) / E  # (FE, FE)
    rexp = (row[:, None] % T == np.arange(T)[None, :]).astype(np.float64)  # (GT, T)
    rcol = rexp.T.copy()                                                    # (T, GT)

    f32 = lambda z: jnp.asarray(z, jnp.float32)
    return dict(pqkv=f32(pqkv), po=f32(po), mask=f32(mask), avg=f32(avg),
                rexp=f32(rexp), rcol=f32(rcol), vecs=f32(vecs))


# ---------------------------------------------------------------------------
# Pure-JAX reference (direct port of the PyTorch forward semantics)
# ---------------------------------------------------------------------------
def reference(x, p):
    m1, m2 = p["m1"], p["m2"]
    q = (x + jnp.einsum('lm,tme->tle', m1, x * p["a"], precision=PREC)
           + jnp.einsum('lm,tme->tle', m2, x * p["c"], precision=PREC))
    k = (x + jnp.einsum('lm,tme->tle', m1, x * p["b"], precision=PREC)
           + jnp.einsum('lm,tme->tle', m2, x * p["d"], precision=PREC))
    wq, wk, wv = p["w_in"][0], p["w_in"][1], p["w_in"][2]
    bq, bk, bv = p["b_in"][0, 0], p["b_in"][1, 0], p["b_in"][2, 0]
    qp = jnp.dot(q, wq.T, precision=PREC) + bq
    kp = jnp.dot(k, wk.T, precision=PREC) + bk
    vp = jnp.dot(x, wv.T, precision=PREC) + bv

    def split(z):  # (T,F,E) -> (F,H,T,DH)
        return z.reshape(T, F, H, DH).transpose(1, 2, 0, 3)

    qh, kh, vh = split(qp), split(kp), split(vp)
    s = jnp.einsum('fhtd,fhsd->fhts', qh / math.sqrt(DH), kh, precision=PREC)
    pw = jax.nn.softmax(s, axis=-1)
    o = jnp.einsum('fhts,fhsd->fhtd', pw, vh, precision=PREC)
    o = o.transpose(2, 0, 1, 3).reshape(T, F, E)
    o = jnp.dot(o, p["wo"].T, precision=PREC) + p["bo"][0]
    mu = o.mean(-1, keepdims=True)
    var = ((o - mu) ** 2).mean(-1, keepdims=True)
    ln = (o - mu) / jnp.sqrt(var + LN_EPS) * p["gamma"][0] + p["beta"][0]
    return x + ln


if __name__ == "__main__":
    key = jax.random.PRNGKey(0)
    pkey, xkey = jax.random.split(key)
    params = init_params(pkey)
    kparams = prepare_params(params)
    x = jax.random.normal(xkey, (T, F, E), jnp.float32)

    out = jax.block_until_ready(ssan_block_forward(x, kparams))
    ref = jax.block_until_ready(reference(x, params))

    assert out.shape == (T, F, E)
    assert bool(jnp.all(jnp.isfinite(out)))
    np.testing.assert_allclose(np.asarray(out), np.asarray(ref),
                               rtol=5e-3, atol=5e-3)
    print("KERNEL_OK")
</pallas_src>

<mosaic_0001>
module attributes {stable_mosaic.version = 11 : i64} {
  func.func @ssan_kernel(%arg0: memref<8x128xf32, #tpu.memory_space<vmem>>, %arg1: memref<128x384xf32, #tpu.memory_space<vmem>>, %arg2: memref<128x128xf32, #tpu.memory_space<vmem>>, %arg3: memref<128x128xf32, #tpu.memory_space<vmem>>, %arg4: memref<128x128xf32, #tpu.memory_space<vmem>>, %arg5: memref<128x8xf32, #tpu.memory_space<vmem>>, %arg6: memref<8x128xf32, #tpu.memory_space<vmem>>, %arg7: memref<8x128xf32, #tpu.memory_space<vmem>>, %arg8: memref<8x128xf32, #tpu.memory_space<vmem>>) attributes {dimension_semantics = [], scalar_prefetch = 0 : i64, scratch_operands = 0 : i64, tpu.core_type = #tpu.core_type<tc>} {
    %c0 = arith.constant 0 : index
    %c0_0 = arith.constant 0 : index
    %0 = vector.load %arg0[%c0, %c0_0] : memref<8x128xf32, #tpu.memory_space<vmem>>, vector<8x128xf32>
    %c0_1 = arith.constant 0 : index
    %c0_2 = arith.constant 0 : index
    %1 = vector.load %arg7[%c0_1, %c0_2] : memref<8x128xf32, #tpu.memory_space<vmem>>, vector<8x128xf32>
    %c0_3 = arith.constant 0 : index
    %c0_4 = arith.constant 0 : index
    %2 = vector.load %arg1[%c0_3, %c0_4] : memref<128x384xf32, #tpu.memory_space<vmem>>, vector<128x384xf32>
    %cst = arith.constant dense<0.000000e+00> : vector<8x384xf32>
    %3 = tpu.matmul %0, %2, %cst {dimension_numbers = #tpu.dot_dimension_numbers<[1], [0], [0], [1], [0, 0, 1, 1], [], []>, precision = #tpu.contract_precision<fp32>} : vector<8x128xf32>, vector<128x384xf32>, vector<8x384xf32> -> vector<8x384xf32>
    %4 = vector.extract_strided_slice %3 {offsets = [0, 0], sizes = [8, 128], strides = [1, 1]} : vector<8x384xf32> to vector<8x128xf32>
    %5 = vector.extract_strided_slice %1 {offsets = [0, 0], sizes = [1, 128], strides = [1, 1]} : vector<8x128xf32> to vector<1x128xf32>
    %6 = vector.broadcast %5 : vector<1x128xf32> to vector<8x128xf32>
    %7 = arith.addf %4, %6 : vector<8x128xf32>
    %8 = vector.extract_strided_slice %3 {offsets = [0, 128], sizes = [8, 128], strides = [1, 1]} : vector<8x384xf32> to vector<8x128xf32>
    %9 = vector.extract_strided_slice %1 {offsets = [1, 0], sizes = [1, 128], strides = [1, 1]} : vector<8x128xf32> to vector<1x128xf32>
    %10 = vector.broadcast %9 : vector<1x128xf32> to vector<8x128xf32>
    %11 = arith.addf %8, %10 : vector<8x128xf32>
    %12 = vector.extract_strided_slice %3 {offsets = [0, 256], sizes = [8, 128], strides = [1, 1]} : vector<8x384xf32> to vector<8x128xf32>
    %13 = vector.extract_strided_slice %1 {offsets = [2, 0], sizes = [1, 128], strides = [1, 1]} : vector<8x128xf32> to vector<1x128xf32>
    %14 = vector.broadcast %13 : vector<1x128xf32> to vector<8x128xf32>
    %15 = arith.addf %12, %14 : vector<8x128xf32>
    %c0_5 = arith.constant 0 : index
    %c0_6 = arith.constant 0 : index
    %16 = vector.load %arg3[%c0_5, %c0_6] : memref<128x128xf32, #tpu.memory_space<vmem>>, vector<128x128xf32>
    %c0_7 = arith.constant 0 : index
    %c0_8 = arith.constant 0 : index
    %17 = vector.load %arg5[%c0_7, %c0_8] : memref<128x8xf32, #tpu.memory_space<vmem>>, vector<128x8xf32>
    %cst_9 = arith.constant dense<0.000000e+00> : vector<128x128xf32>
    %18 = tpu.matmul %17, %7, %cst_9 {dimension_numbers = #tpu.dot_dimension_numbers<[1], [0], [0], [1], [0, 0, 1, 1], [], []>, precision = #tpu.contract_precision<fp32>} : vector<128x8xf32>, vector<8x128xf32>, vector<128x128xf32> -> vector<128x128xf32>
    %19 = arith.mulf %18, %16 : vector<128x128xf32>
    %cst_10 = arith.constant dense<0.000000e+00> : vector<128x8xf32>
    %20 = tpu.matmul %19, %11, %cst_10 {dimension_numbers = #tpu.dot_dimension_numbers<[1], [1], [0], [0], [0, 0, 1, 0], [], []>, precision = #tpu.contract_precision<fp32>} : vector<128x128xf32>, vector<8x128xf32>, vector<128x8xf32> -> vector<128x8xf32>
    %cst_11 = arith.constant dense<0xFF800000> : vector<128xf32>
    %21 = vector.multi_reduction <maximumf>, %20, %cst_11 [1] : vector<128x8xf32> to vector<128xf32>
    %22 = vector.shape_cast %21 : vector<128xf32> to vector<128x1xf32>
    %23 = vector.broadcast %22 : vector<128x1xf32> to vector<128x8xf32>
    %24 = arith.subf %20, %23 : vector<128x8xf32>
    %25 = math.exp %24 : vector<128x8xf32>
    %cst_12 = arith.constant dense<0.000000e+00> : vector<128xf32>
    %26 = vector.multi_reduction <add>, %25, %cst_12 [1] : vector<128x8xf32> to vector<128xf32>
    %27 = vector.shape_cast %26 : vector<128xf32> to vector<128x1xf32>
    %28 = tpu.reciprocal %27 {approx = true} : vector<128x1xf32> -> vector<128x1xf32>
    %29 = arith.mulf %27, %28 : vector<128x1xf32>
    %cst_13 = arith.constant 2.000000e+00 : f32
    %30 = vector.broadcast %cst_13 : f32 to vector<128x1xf32>
    %31 = arith.subf %30, %29 : vector<128x1xf32>
    %32 = arith.mulf %28, %31 : vector<128x1xf32>
    %33 = vector.broadcast %32 : vector<128x1xf32> to vector<128x8xf32>
    %34 = arith.mulf %25, %33 : vector<128x8xf32>
    %cst_14 = arith.constant dense<0.000000e+00> : vector<128x128xf32>
    %35 = tpu.matmul %34, %15, %cst_14 {dimension_numbers = #tpu.dot_dimension_numbers<[1], [0], [0], [1], [0, 0, 1, 1], [], []>, precision = #tpu.contract_precision<fp32>} : vector<128x8xf32>, vector<8x128xf32>, vector<128x128xf32> -> vector<128x128xf32>
    %36 = arith.mulf %35, %16 : vector<128x128xf32>
    %c0_15 = arith.constant 0 : index
    %c0_16 = arith.constant 0 : index
    %37 = vector.load %arg6[%c0_15, %c0_16] : memref<8x128xf32, #tpu.memory_space<vmem>>, vector<8x128xf32>
    %cst_17 = arith.constant dense<0.000000e+00> : vector<8x128xf32>
    %38 = tpu.matmul %37, %36, %cst_17 {dimension_numbers = #tpu.dot_dimension_numbers<[1], [0], [0], [1], [0, 0, 1, 1], [], []>, precision = #tpu.contract_precision<fp32>} : vector<8x128xf32>, vector<128x128xf32>, vector<8x128xf32> -> vector<8x128xf32>
    %c0_18 = arith.constant 0 : index
    %c0_19 = arith.constant 0 : index
    %39 = vector.load %arg2[%c0_18, %c0_19] : memref<128x128xf32, #tpu.memory_space<vmem>>, vector<128x128xf32>
    %cst_20 = arith.constant dense<0.000000e+00> : vector<8x128xf32>
    %40 = tpu.matmul %38, %39, %cst_20 {dimension_numbers = #tpu.dot_dimension_numbers<[1], [0], [0], [1], [0, 0, 1, 1], [], []>, precision = #tpu.contract_precision<fp32>} : vector<8x128xf32>, vector<128x128xf32>, vector<8x128xf32> -> vector<8x128xf32>
    %41 = vector.extract_strided_slice %1 {offsets = [3, 0], sizes = [1, 128], strides = [1, 1]} : vector<8x128xf32> to vector<1x128xf32>
    %42 = vector.broadcast %41 : vector<1x128xf32> to vector<8x128xf32>
    %43 = arith.addf %40, %42 : vector<8x128xf32>
    %c0_21 = arith.constant 0 : index
    %c0_22 = arith.constant 0 : index
    %44 = vector.load %arg4[%c0_21, %c0_22] : memref<128x128xf32, #tpu.memory_space<vmem>>, vector<128x128xf32>
    %cst_23 = arith.constant dense<0.000000e+00> : vector<8x128xf32>
    %45 = tpu.matmul %43, %44, %cst_23 {dimension_numbers = #tpu.dot_dimension_numbers<[1], [0], [0], [1], [0, 0, 1, 1], [], []>, precision = #tpu.contract_precision<fp32>} : vector<8x128xf32>, vector<128x128xf32>, vector<8x128xf32> -> vector<8x128xf32>
    %46 = arith.subf %43, %45 : vector<8x128xf32>
    %47 = arith.mulf %46, %46 : vector<8x128xf32>
    %cst_24 = arith.constant dense<0.000000e+00> : vector<8x128xf32>
    %48 = tpu.matmul %47, %44, %cst_24 {dimension_numbers = #tpu.dot_dimension_numbers<[1], [0], [0], [1], [0, 0, 1, 1], [], []>, precision = #tpu.contract_precision<fp32>} : vector<8x128xf32>, vector<128x128xf32>, vector<8x128xf32> -> vector<8x128xf32>
    %cst_25 = arith.constant 9.99999974E-6 : f32
    %49 = vector.broadcast %cst_25 : f32 to vector<8x128xf32>
    %50 = arith.addf %48, %49 : vector<8x128xf32>
    %51 = math.rsqrt %50 : vector<8x128xf32>
    %52 = arith.mulf %46, %51 : vector<8x128xf32>
    %53 = vector.extract_strided_slice %1 {offsets = [4, 0], sizes = [1, 128], strides = [1, 1]} : vector<8x128xf32> to vector<1x128xf32>
    %54 = vector.broadcast %53 : vector<1x128xf32> to vector<8x128xf32>
    %55 = arith.mulf %52, %54 : vector<8x128xf32>
    %56 = vector.extract_strided_slice %1 {offsets = [5, 0], sizes = [1, 128], strides = [1, 1]} : vector<8x128xf32> to vector<1x128xf32>
    %57 = vector.broadcast %56 : vector<1x128xf32> to vector<8x128xf32>
    %58 = arith.addf %55, %57 : vector<8x128xf32>
    %59 = arith.addf %0, %58 : vector<8x128xf32>
    %c0_26 = arith.constant 0 : index
    %c0_27 = arith.constant 0 : index
    %60 = vector.load %arg8[%c0_26, %c0_27] : memref<8x128xf32, #tpu.memory_space<vmem>>, vector<8x128xf32>
    tpu.vector_store %arg8[%c0_26, %c0_27], %59 {strides = array<i32>} : memref<8x128xf32, #tpu.memory_space<vmem>>, vector<8x128xf32>,
    return
  }
}

</mosaic_0001>

<bundles_post_ra>
// kernel: ssan_block_forward.1
= control target key start
LH: loop header
LB: loop body
LE: loop exit
PB: predicated region body
PF: predicated region fallthrough
CT: control target
= control target key end

     0   :  { %13 = vsyncpa [#allocation3], 0  ;;  %s14361_s0 = inlined_call_operand.vmem [shape: f32[8,128], index: 0, kind: input, shape index: {}]   ;;  %s14362_s1 = inlined_call_operand.hbm [shape: f32[128,384], index: 1, kind: input, shape index: {}]   ;;  %s14363_s2 = inlined_call_operand.vmem [shape: f32[128,128], index: 2, kind: input, shape index: {}]   ;;  %s14364_s3 = inlined_call_operand.hbm [shape: f32[128,128], index: 3, kind: input, shape index: {}]   ;;  %s14365_s4 = inlined_call_operand.hbm [shape: f32[128,128], index: 4, kind: input, shape index: {}]   ;;  %s14366_s5 = inlined_call_operand.vmem [shape: f32[128,8], index: 5, kind: input, shape index: {}]   ;;  %s14367_s6 = inlined_call_operand.vmem [shape: f32[8,128], index: 6, kind: input, shape index: {}]   ;;  %s14368_s7 = inlined_call_operand.vmem [shape: f32[8,128], index: 7, kind: input, shape index: {}]   ;;  %s14369_s8 = inlined_call_operand.vmem [shape: f32[8,128], index: 8, kind: output, shape index: {}]  }
   0x1   :  { %14 = vsyncpa [#allocation5], 0  ;;  %s11614_s27 = smov [#allocation4]   ;;  %s11544_s9 = scalar_lea.hbm %s14364_s3, 2048 }
   0x2   :  { %s36_s28 = sshll.u32 %s11614_s27, 4  ;;  %p11545_p0 = scmp.ne.s32.totalorder %s14364_s3, %s11544_s9  ;;  %s37_s28 = int_to_ptr.vmem [resolvable:$true] %s36_s28 }
   0x3   :  { %p11548_p1 = scmp.lt.u32.totalorder %s11544_s9, %s14364_s3 }
   0x5   :  { %p11550_p2 = pnand %p11548_p1, %p11545_p0 }
   0x7   :  { %11553 = shalt.err (!%p11550_p2)
}
   0x8   :  { %s11554_s14 = scalar_lea.vmem %s37_s28, 2048  ;;  %p11559_p4 = scmp.lt.s32.totalorder %s37_s28, %s37_s28 }
   0x9   :  { %p11555_p3 = scmp.ne.s32.totalorder %s37_s28, %s11554_s14  ;;  %p11560_p5 = scmp.lt.s32.totalorder %s11554_s14, %s11554_s14 }
   0xb   :  { %p11561_p6 = por %p11560_p5, %p11559_p4 }
   0xd   :  { %p11562_p7 = pnand %p11561_p6, %p11555_p3 }
   0xf   :  { %11565 = shalt.err (!%p11562_p7)
}
  0x10   :  { %s11615_s15 = smov 128   ;;  %s11616_s16 = smov 8  }
  0x11   :  { %42 = dma.hbm_to_vmem [thread:$0]  %s14364_s3, 2048, %s37_s28, [#allocation5], %s11615_s15, %s11615_s15, %s11616_s16  }
  0x12   :  { %s11617_s19 = smov [#allocation2]   ;;  %s11566_s23 = scalar_lea.hbm %s14362_s1, 6144 }
  0x13   :  { %s22_s20 = sshll.u32 %s11617_s19, 4  ;;  %p11567_p8 = scmp.ne.s32.totalorder %s14362_s1, %s11566_s23  ;;  %s23_s20 = int_to_ptr.vmem [resolvable:$true] %s22_s20 }
  0x14   :  { %p11570_p9 = scmp.lt.u32.totalorder %s11566_s23, %s14362_s1 }
  0x16   :  { %p11572_p10 = pnand %p11570_p9, %p11567_p8 }
  0x18   :  { %11575 = shalt.err (!%p11572_p10)
}
  0x19   :  { %s11576_s29 = scalar_lea.vmem %s23_s20, 6144  ;;  %p11581_p12 = scmp.lt.s32.totalorder %s23_s20, %s23_s20 }
  0x1a   :  { %p11577_p11 = scmp.ne.s32.totalorder %s23_s20, %s11576_s29  ;;  %p11582_p13 = scmp.lt.s32.totalorder %s11576_s29, %s11576_s29 }
  0x1c   :  { %p11583_p0 = por %p11582_p13, %p11581_p12 }
  0x1e   :  { %p11584_p1 = pnand %p11583_p0, %p11577_p11 }
  0x20   :  { %11587 = shalt.err (!%p11584_p1)
}
  0x21   :  { %s11618_s3 = smov 384   ;;  %s11619_s28 = smov 24  }
  0x22   :  { %28 = dma.hbm_to_vmem [thread:$0]  %s14362_s1, 6144, %s23_s20, [#allocation3], %s11618_s3, %s11618_s3, %s11619_s28  }
  0x23   :  { %s11620_s10 = smov [#allocation6]   ;;  %s11588_s14 = scalar_lea.hbm %s14365_s4, 2048 }
  0x24   :  { %s48_s11 = sshll.u32 %s11620_s10, 4  ;;  %p11589_p2 = scmp.ne.s32.totalorder %s14365_s4, %s11588_s14  ;;  %s49_s11 = int_to_ptr.vmem [resolvable:$true] %s48_s11 }
  0x25   :  { %p11592_p3 = scmp.lt.u32.totalorder %s11588_s14, %s14365_s4 }
  0x27   :  { %p11594_p4 = pnand %p11592_p3, %p11589_p2 }
  0x29   :  { %11597 = shalt.err (!%p11594_p4)
}
  0x2a   :  { %s11598_s22 = scalar_lea.vmem %s49_s11, 2048  ;;  %p11603_p6 = scmp.lt.s32.totalorder %s49_s11, %s49_s11 }
  0x2b   :  { %p11599_p5 = scmp.ne.s32.totalorder %s49_s11, %s11598_s22  ;;  %p11604_p7 = scmp.lt.s32.totalorder %s11598_s22, %s11598_s22 }
  0x2d   :  { %p11605_p8 = por %p11604_p7, %p11603_p6 }
  0x2f   :  { %p11606_p9 = pnand %p11605_p8, %p11599_p5 }
  0x31   :  { %11609 = shalt.err (!%p11606_p9)
}
  0x32   :  { %54 = dma.hbm_to_vmem [thread:$0]  %s14365_s4, 2048, %s49_s11, [#allocation5], %s11615_s15, %s11615_s15, %s11616_s16  }
  0x33   :  { %11610 = dma.done.wait [#allocation3], 6144  }
  0x34   :  { %11611 = vsyncadd [#allocation3], 4294961152 }
  0x35   :  { %11612 = dma.done.wait [#allocation5], 4096  }
  0x36   :  { %11613 = vsyncadd [#allocation5], 4294963200  ;;  %v14370_v0 = vmov 0.0   ;;  %v73_v1 = vld [vmem:[#allocation2 + $0x8] sm:$0xff]  ;;  %v76_v2 = vld [vmem:[#allocation2 + $0x20] sm:$0xff]  ;;  %vm11623_vm0 = vmmov 0  }
  0x37   :  { %216 = vmatprep.mubr.f32.mxu1 %v14370_v0  ;;  %693 = vmatprep.mubr.f32.mxu0 %v14370_v0  ;;  %v72_v3 = vld [vmem:[#allocation2] sm:$0xff]  ;;  %v120_v4 = vand.u32 4294901760, %v73_v1  ;;  %v124_v5 = vand.u32 4294901760, %v76_v2  ;;  %v75_v6 = vld [vmem:[#allocation2 + $0x18] sm:$0xff]  ;;  %v82_v9 = vld [vmem:[#allocation2 + $0x50] sm:$0xff]  ;;  %vm1663_vm1 = vcmask 64512  }
  0x38   :  { %v122_v7 = vand.u32 4294901760, %v72_v3  ;;  %v79_v8 = vld [vmem:[#allocation2 + $0x38] sm:$0xff]  ;;  %v126_v10 = vand.u32 4294901760, %v75_v6  ;;  %v132_v12 = vand.u32 4294901760, %v82_v9  ;;  %v78_v13 = vld [vmem:[#allocation2 + $0x30] sm:$0xff]  ;;  %v81_v14 = vld [vmem:[#allocation2 + $0x48] sm:$0xff] }
  0x39   :  { %v128_v11 = vand.u32 4294901760, %v79_v8  ;;  %v85_v15 = vld [vmem:[#allocation2 + $0x68] sm:$0xff]  ;;  %v11713_v16 = vpack.c.bf16 %v124_v5, %v120_v4  ;;  %v88_v17 = vld [vmem:[#allocation2 + $0x80] sm:$0xff]  ;;  %v87_v19 = vld [vmem:[#allocation2 + $0x78] sm:$0xff]  ;;  %v11715_v20 = vsub.f32 %v73_v1, %v120_v4  ;;  %v11722_v25 = vsub.f32 %v76_v2, %v124_v5 }
  0x3a   :  { %v84_v18 = vld [vmem:[#allocation2 + $0x60] sm:$0xff]  ;;  %v11717_v21 = vpack.c.bf16 %v126_v10, %v122_v7  ;;  %v91_v23 = vld [vmem:[#allocation2 + $0x98] sm:$0xff]  ;;  %v94_v24 = vld [vmem:[#allocation2 + $0xb0] sm:$0xff]  ;;  %v130_v26 = vand.u32 4294901760, %v78_v13  ;;  %v134_v27 = vand.u32 4294901760, %v81_v14  ;;  %v136_v28 = vand.u32 4294901760, %v85_v15 }
  0x3b   :  { %v11719_v22 = vpack.c.bf16 %v132_v12, %v128_v11  ;;  %10247 = vmatprep.subr.bf16.mxu1 %v11713_v16  ;;  %10343 = vmatprep.subr.bf16.mxu0 %v11713_v16  ;;  %v11726_v29 = vsub.f32 %v72_v3, %v122_v7  ;;  %v140_v30 = vand.u32 4294901760, %v88_v17  ;;  %v138_v31 = vand.u32 4294901760, %v84_v18  ;;  %v90_v37 = vld [vmem:[#allocation2 + $0x90] sm:$0xff]  ;;  %v93_v38 = vld [vmem:[#allocation2 + $0xa8] sm:$0xff]  ;;  %v100_v44 = vld [vmem:[#allocation2 + $0xe0] sm:$0xff] }
  0x3c   :  { %14421 = vst [vmem:[#allocation9_spill] sm:$0xff] %v11717_v21  ;;  %10249 = vmatpush1.bf16.msra.mxu1 %v11717_v21  ;;  %10345 = vmatpush1.bf16.msra.mxu0 %v11717_v21  ;;  %v142_v32 = vand.u32 4294901760, %v87_v19  ;;  %v11729_v33 = vsub.f32 %v75_v6, %v126_v10  ;;  %v11733_v34 = vpack.c.bf16 %v134_v27, %v130_v26  ;;  %v144_v35 = vand.u32 4294901760, %v91_v23  ;;  %v97_v39 = vld [vmem:[#allocation2 + $0xc8] sm:$0xff]  ;;  %v96_v45 = vld [vmem:[#allocation2 + $0xc0] sm:$0xff]  ;;  %v99_v46 = vld [vmem:[#allocation2 + $0xd8] sm:$0xff] }
  0x3d   :  { %14422 = vst [vmem:[#allocation10_spill] sm:$0xff] %v11719_v22  ;;  %10251 = vmatprep.subr.bf16.mxu1 %v11719_v22  ;;  %10347 = vmatprep.subr.bf16.mxu0 %v11719_v22  ;;  %v148_v36 = vand.u32 4294901760, %v94_v24  ;;  %v11735_v40 = vsub.f32 %v79_v8, %v128_v11  ;;  %v11737_v41 = vsub.f32 %v82_v9, %v132_v12  ;;  %v103_v51 = vld [vmem:[#allocation2 + $0xf8] sm:$0xff]  ;;  %v146_v53 = vand.u32 4294901760, %v90_v37  ;;  %v106_v60 = vld [vmem:[#allocation2 + $0x110] sm:$0xff]  ;;  %v105_v3 = vld [vmem:[#allocation2 + $0x108] sm:$0xff] }
  0x3e   :  { %14423 = vst [vmem:[#allocation11_spill] sm:$0xff] %v11733_v34  ;;  %v11739_v42 = vsub.f32 %v78_v13, %v130_v26  ;;  %v11741_v43 = vpack.c.bf16 %v140_v30, %v136_v28  ;;  %v11743_v47 = vsub.f32 %v81_v14, %v134_v27  ;;  %v11745_v48 = vsub.f32 %v85_v15, %v136_v28  ;;  %v102_v61 = vld [vmem:[#allocation2 + $0xf0] sm:$0xff]  ;;  %v109_v4 = vld [vmem:[#allocation2 + $0x128] sm:$0xff]  ;;  %v112_v5 = vld [vmem:[#allocation2 + $0x140] sm:$0xff] }
  0x3f   :  { %v11747_v49 = vsub.f32 %v88_v17, %v140_v30  ;;  %v11749_v50 = vpack.c.bf16 %v142_v32, %v138_v31  ;;  %v11753_v52 = vsub.f32 %v84_v18, %v138_v31  ;;  %v150_v54 = vand.u32 4294901760, %v93_v38  ;;  %v108_v10 = vld [vmem:[#allocation2 + $0x120] sm:$0xff]  ;;  %v111_v15 = vld [vmem:[#allocation2 + $0x138] sm:$0xff]  ;;  %v118_v31 = vld [vmem:[#allocation2 + $0x170] sm:$0xff] }
  0x40   :  { %14424 = vst [vmem:[#allocation12_spill] sm:$0xff] %v11739_v42  ;;  %14425 = vst [vmem:[#allocation13_spill] sm:$0xff] %v11741_v43  ;;  %10253 = vmatpush1.bf16.msra.mxu1 %v11733_v34  ;;  %10349 = vmatpush1.bf16.msra.mxu0 %v11733_v34  ;;  %v152_v55 = vand.u32 4294901760, %v97_v39  ;;  %v11757_v56 = vpack.c.bf16 %v148_v36, %v144_v35  ;;  %v156_v57 = vand.u32 4294901760, %v100_v44  ;;  %v154_v58 = vand.u32 4294901760, %v96_v45  ;;  %v115_v30 = vld [vmem:[#allocation2 + $0x158] sm:$0xff] }
  0x41   :  { %14426 = vst [vmem:[#allocation14_spill] sm:$0xff] %v11743_v47  ;;  %14427 = vst [vmem:[#allocation15_spill] sm:$0xff] %v11749_v50  ;;  %10255 = vmatprep.subr.bf16.mxu1 %v11741_v43  ;;  %10351 = vmatprep.subr.bf16.mxu0 %v11741_v43  ;;  %v158_v59 = vand.u32 4294901760, %v99_v46  ;;  %v11759_v62 = vsub.f32 %v87_v19, %v142_v32  ;;  %v11761_v63 = vsub.f32 %v91_v23, %v144_v35  ;;  %v114_v32 = vld [vmem:[#allocation2 + $0x150] sm:$0xff] }
  0x42   :  { %14428 = vst [vmem:[#allocation16_spill] sm:$0xff] %v11753_v52  ;;  %14429 = vst [vmem:[#allocation17_spill] sm:$0xff] %v11757_v56  ;;  %v11763_v1 = vsub.f32 %v94_v24, %v148_v36  ;;  %v160_v2 = vand.u32 4294901760, %v103_v51  ;;  %v11765_v6 = vpack.c.bf16 %v150_v54, %v146_v53  ;;  %v11767_v7 = vsub.f32 %v90_v37, %v146_v53 }
  0x43   :  { %14430 = vst [vmem:[#allocation18_spill] sm:$0xff] %v11759_v62  ;;  %v11769_v8 = vsub.f32 %v93_v38, %v150_v54  ;;  %v11771_v9 = vsub.f32 %v97_v39, %v152_v55  ;;  %v11775_v11 = vpack.c.bf16 %v156_v57, %v152_v55  ;;  %v11777_v12 = vsub.f32 %v100_v44, %v156_v57  ;;  %v117_v39 = vld [vmem:[#allocation2 + $0x168] sm:$0xff]  ;;  %v70_v44 = vld [vmem:[%s14361_s0] sm:$0xff] }
  0x44   :  { %14431 = vst [vmem:[#allocation19_spill] sm:$0xff] %v11765_v6  ;;  %10257 = vmatpush1.bf16.msra.mxu1 %v11749_v50  ;;  %10353 = vmatpush1.bf16.msra.mxu0 %v11749_v50  ;;  %v164_v13 = vand.u32 4294901760, %v106_v60  ;;  %v162_v14 = vand.u32 4294901760, %v102_v61  ;;  %v11781_v17 = vpack.c.bf16 %v158_v59, %v154_v58  ;;  %v166_v18 = vand.u32 4294901760, %v105_v3 }
  0x45   :  { %14432 = vst [vmem:[#allocation20_spill] sm:$0xff] %v11775_v11  ;;  %10259 = vmatprep.subr.bf16.mxu1 %v11757_v56  ;;  %10355 = vmatprep.subr.bf16.mxu0 %v11757_v56  ;;  %v168_v19 = vand.u32 4294901760, %v109_v4  ;;  %v172_v23 = vand.u32 4294901760, %v112_v5  ;;  %v11783_v24 = vsub.f32 %v96_v45, %v154_v58  ;;  %v11785_v26 = vsub.f32 %v99_v46, %v158_v59 }
  0x46   :  { %14433 = vst [vmem:[#allocation21_spill] sm:$0xff] %v11781_v17  ;;  %v11787_v27 = vsub.f32 %v103_v51, %v160_v2  ;;  %v170_v28 = vand.u32 4294901760, %v108_v10  ;;  %v11789_v35 = vpack.c.bf16 %v164_v13, %v160_v2  ;;  %v11791_v36 = vsub.f32 %v106_v60, %v164_v13 }
  0x47   :  { %v11793_v37 = vsub.f32 %v102_v61, %v162_v14  ;;  %v174_v38 = vand.u32 4294901760, %v111_v15  ;;  %v11800_v45 = vpack.c.bf16 %v166_v18, %v162_v14  ;;  %v11802_v46 = vsub.f32 %v105_v3, %v166_v18 }
  0x48   :  { %14434 = vst [vmem:[#allocation22_spill] sm:$0xff] %v11787_v27  ;;  %14435 = vst [vmem:[#allocation23_spill] sm:$0xff] %v11789_v35  ;;  %10261 = vmatpush1.bf16.msra.mxu1 %v11765_v6  ;;  %10357 = vmatpush1.bf16.msra.mxu0 %v11765_v6  ;;  %v11804_v51 = vpack.c.bf16 %v172_v23, %v168_v19  ;;  %v11808_v53 = vsub.f32 %v109_v4, %v168_v19  ;;  %v176_v54 = vand.u32 4294901760, %v115_v30 }
  0x49   :  { %14436 = vst [vmem:[#allocation24_spill] sm:$0xff] %v11800_v45  ;;  %10263 = vmatprep.subr.bf16.mxu1 %v11775_v11  ;;  %10359 = vmatprep.subr.bf16.mxu0 %v11775_v11  ;;  %v180_v55 = vand.u32 4294901760, %v118_v31  ;;  %v178_v57 = vand.u32 4294901760, %v114_v32  ;;  %v182_v58 = vand.u32 4294901760, %v117_v39  ;;  %v230_v59 = vand.u32 4294901760, %v11715_v20 }
  0x4a   :  { %14437 = vst [vmem:[#allocation25_spill] sm:$0xff] %v11804_v51  ;;  %14438 = vst [vmem:[#allocation26_spill] sm:$0xff] %v11808_v53  ;;  %v242_v60 = vand.u32 4294901760, %v11722_v25  ;;  %v11812_v61 = vand.u32 4294901760, %v70_v44  ;;  %v11814_v2 = vsub.f32 %v112_v5, %v172_v23  ;;  %v11816_v3 = vpack.c.bf16 %v174_v38, %v170_v28 }
  0x4b   :  { %v11818_v13 = vsub.f32 %v108_v10, %v170_v28  ;;  %v11820_v14 = vsub.f32 %v111_v15, %v174_v38  ;;  %v11824_v4 = vsub.f32 %v115_v30, %v176_v54  ;;  %v231_v18 = vsub.f32 %v11715_v20, %v230_v59 }
  0x4c   :  { %14439 = vst [vmem:[#allocation27_spill] sm:$0xff] %v11816_v3  ;;  %10265 = vmatpush1.bf16.msra.mxu1 %v11781_v17  ;;  %10361 = vmatpush1.bf16.msra.mxu0 %v11781_v17  ;;  %v243_v19 = vsub.f32 %v11722_v25, %v242_v60  ;;  %v236_v0 = vand.u32 4294901760, %v11726_v29  ;;  %v11831_v5 = vpack.c.bf16 %v180_v55, %v176_v54  ;;  %v248_v15 = vand.u32 4294901760, %v11729_v33 }
  0x4d   :  { %10267 = vmatprep.subr.bf16.mxu1 %v11789_v35  ;;  %10363 = vmatprep.subr.bf16.mxu0 %v11789_v35  ;;  %v11834_v10 = vsub.f32 %v70_v44, %v11812_v61  ;;  %v254_v23 = vand.u32 4294901760, %v11735_v40  ;;  %v11838_v28 = vsub.f32 %v118_v31, %v180_v55  ;;  %v11840_v30 = vpack.c.bf16 %v182_v58, %v178_v57 }
  0x4e   :  { %14440 = vst [vmem:[#allocation28_spill] sm:$0xff] %v11831_v5  ;;  %v237_v38 = vsub.f32 %v11726_v29, %v236_v0  ;;  %v266_v17 = vand.u32 4294901760, %v11737_v41  ;;  %v11844_v11 = vsub.f32 %v114_v32, %v178_v57  ;;  %v249_v44 = vsub.f32 %v11729_v33, %v248_v15 }
  0x4f   :  { %14441 = vst [vmem:[#allocation29_spill] sm:$0xff] %v11834_v10  ;;  %14442 = vst [vmem:[#allocation30_spill] sm:$0xff] %v11840_v30  ;;  %v11847_v54 = vand.u32 4294901760, %v11834_v10  ;;  %v255_v35 = vsub.f32 %v11735_v40, %v254_v23  ;;  %v11853_v31 = vsub.f32 %v117_v39, %v182_v58  ;;  %v232_v55 = vand.u32 4294901760, %v231_v18 }
  0x50   :  { %10269 = vmatpush1.bf16.msra.mxu1 %v11800_v45  ;;  %10365 = vmatpush1.bf16.msra.mxu0 %v11800_v45  ;;  %v244_v6 = vand.u32 4294901760, %v243_v19  ;;  %v267_v56 = vsub.f32 %v11737_v41, %v266_v17  ;;  %v10374_v32 = vpack.c.bf16 %v242_v60, %v230_v59  ;;  %v238_v50 = vand.u32 4294901760, %v237_v38 }
  0x51   :  { %14443 = vst [vmem:[#allocation31_spill] sm:$0xff] %v11847_v54  ;;  %10271 = vmatprep.subr.bf16.mxu1 %v11804_v51  ;;  %10367 = vmatprep.subr.bf16.mxu0 %v11804_v51  ;;  %v220_v57 = vsub.f32 %v11834_v10, %v11847_v54  ;;  %v260_v43 = vand.u32 4294901760, %v11739_v42  ;;  %v250_v34 = vand.u32 4294901760, %v249_v44  ;;  %v272_v45 = vand.u32 4294901760, %v11743_v47 }
  0x52   :  { %v278_v39 = vand.u32 4294901760, %v11745_v48  ;;  %v290_v58 = vand.u32 4294901760, %v11747_v49  ;;  %v10376_v18 = vpack.c.bf16 %v248_v15, %v236_v0  ;;  %v256_v19 = vand.u32 4294901760, %v255_v35 }
  0x53   :  { %v268_v22 = vand.u32 4294901760, %v267_v56  ;;  %v284_v21 = vand.u32 4294901760, %v11753_v52  ;;  %v10278_v59 = vpack.c.bf16 %v244_v6, %v232_v55  ;;  %v261_v60 = vsub.f32 %v11739_v42, %v260_v43 }
  0x54   :  { %10273 = vmatpush1.bf16.msra.mxu1 %v11816_v3  ;;  %10369 = vmatpush1.bf16.msra.mxu0 %v11816_v3  ;;  %v273_v38 = vsub.f32 %v11743_v47, %v272_v45  ;;  %v296_v44 = vand.u32 4294901760, %v11759_v62  ;;  %v10378_v0 = vpack.c.bf16 %v266_v17, %v254_v23  ;;  %v279_v56 = vsub.f32 %v11745_v48, %v278_v39 }
  0x55   :  { %10275 = vmatprep.subr.bf16.mxu1 %v11831_v5  ;;  %10371 = vmatprep.subr.bf16.mxu0 %v11831_v5  ;;  %v291_v35 = vsub.f32 %v11747_v49, %v290_v58  ;;  %v11874_v15 = vand.u32 4294901760, %v220_v57  ;;  %v10280_v10 = vpack.c.bf16 %v250_v34, %v238_v50  ;;  %v285_v6 = vsub.f32 %v11753_v52, %v284_v21 }
  0x56   :  { %v297_v55 = vsub.f32 %v11759_v62, %v296_v44  ;;  %v10282_v3 = vpack.c.bf16 %v268_v22, %v256_v19  ;;  %v10380_v51 = vpack.c.bf16 %v272_v45, %v260_v43  ;;  %v302_v47 = vand.u32 4294901760, %v11761_v63 }
  0x57   :  { %14444 = vst [vmem:[#allocation32_spill] sm:$0xff] %v11874_v15  ;;  %v314_v42 = vand.u32 4294901760, %v11763_v1  ;;  %v262_v17 = vand.u32 4294901760, %v261_v60  ;;  %v274_v23 = vand.u32 4294901760, %v273_v38  ;;  %v280_v5 = vand.u32 4294901760, %v279_v56 }
  0x58   :  { %10277 = vmatpush1.bf16.msra.mxu1 %v11840_v30  ;;  %10373 = vmatpush1.bf16.msra.mxu0 %v11840_v30  ;;  %v308_v57 = vand.u32 4294901760, %v11767_v7  ;;  %v292_v34 = vand.u32 4294901760, %v291_v35  ;;  %v303_v50 = vsub.f32 %v11761_v63, %v302_v47  ;;  %v320_v43 = vand.u32 4294901760, %v11769_v8 }
  0x59   :  { %10279 = vmatprep.subr.bf16.mxu1 %v10278_v59  ;;  %10375 = vmatprep.subr.bf16.mxu0 %v10374_v32  ;;  %v315_v22 = vsub.f32 %v11763_v1, %v314_v42  ;;  %v10382_v45 = vpack.c.bf16 %v290_v58, %v278_v39  ;;  %v286_v19 = vand.u32 4294901760, %v285_v6  ;;  %v298_v62 = vand.u32 4294901760, %v297_v55 }
  0x5a   :  { %v326_v52 = vand.u32 4294901760, %v11771_v9  ;;  %v10384_v60 = vpack.c.bf16 %v296_v44, %v284_v21  ;;  %v304_v38 = vand.u32 4294901760, %v303_v50  ;;  %v309_v32 = vsub.f32 %v11767_v7, %v308_v57 }
  0x5b   :  { %222 = vmatmul.mubr.f32.vlgmr.msra.gmra.mrb[0].mxu1 %v11874_v15  ;;  %697 = vmatmul.mubr.f32.vlgmr.msra.gmra.mrb[0].mxu0 %v11847_v54  ;;  %v316_v59 = vand.u32 4294901760, %v315_v22  ;;  %v10284_v56 = vpack.c.bf16 %v274_v23, %v262_v17  ;;  %v321_v35 = vsub.f32 %v11769_v8, %v320_v43  ;;  %v338_v39 = vand.u32 4294901760, %v11777_v12 }
  0x5c   :  { %10281 = vmatpush1.bf16.msra.mxu1 %v10280_v10  ;;  %10377 = vmatpush1.bf16.msra.mxu0 %v10376_v18  ;;  %v332_v58 = vand.u32 4294901760, %v11783_v24  ;;  %v10286_v6 = vpack.c.bf16 %v292_v34, %v280_v5  ;;  %v327_v55 = vsub.f32 %v11771_v9, %v326_v52  ;;  %v344_v21 = vand.u32 4294901760, %v11785_v26 }
  0x5d   :  { %10283 = vmatprep.subr.bf16.mxu1 %v10282_v3  ;;  %10379 = vmatprep.subr.bf16.mxu0 %v10378_v0  ;;  %v350_v44 = vand.u32 4294901760, %v11787_v27  ;;  %v10288_v50 = vpack.c.bf16 %v298_v62, %v286_v19  ;;  %v339_v10 = vsub.f32 %v11777_v12, %v338_v39  ;;  %v14445_v17 = vmov 0.0  }
  0x5e   :  { %v333_v18 = vsub.f32 %v11783_v24, %v332_v58  ;;  %452 = vmatprep.mubr.f32.mxu1 %v14445_v17  ;;  %863 = vmatprep.mubr.f32.mxu0 %v14445_v17  ;;  %v10290_v23 = vpack.c.bf16 %v316_v59, %v304_v38  ;;  %v10386_v22 = vpack.c.bf16 %v314_v42, %v302_v47  ;;  %v310_v3 = vand.u32 4294901760, %v309_v32 }
  0x5f   :  { %v345_v5 = vsub.f32 %v11785_v26, %v344_v21  ;;  %v322_v0 = vand.u32 4294901760, %v321_v35  ;;  %v351_v34 = vsub.f32 %v11787_v27, %v350_v44  ;;  %v362_v62 = vand.u32 4294901760, %v11791_v36 }
  0x60   :  { %10285 = vmatpush1.bf16.msra.mxu1 %v10284_v56  ;;  %10381 = vmatpush1.bf16.msra.mxu0 %v10380_v51  ;;  %v356_v19 = vand.u32 4294901760, %v11793_v37  ;;  %v328_v54 = vand.u32 4294901760, %v327_v55  ;;  %v340_v15 = vand.u32 4294901760, %v339_v10  ;;  %v368_v30 = vand.u32 4294901760, %v11802_v46 }
  0x61   :  { %10287 = vmatprep.subr.bf16.mxu1 %v10286_v6  ;;  %10383 = vmatprep.subr.bf16.mxu0 %v10382_v45  ;;  %v374_v42 = vand.u32 4294901760, %v11808_v53  ;;  %v10388_v47 = vpack.c.bf16 %v320_v43, %v308_v57  ;;  %v10390_v38 = vpack.c.bf16 %v338_v39, %v326_v52  ;;  %v334_v59 = vand.u32 4294901760, %v333_v18 }
  0x62   :  { %v363_v51 = vsub.f32 %v11791_v36, %v362_v62  ;;  %v346_v32 = vand.u32 4294901760, %v345_v5  ;;  %v357_v56 = vsub.f32 %v11793_v37, %v356_v19  ;;  %v369_v35 = vsub.f32 %v11802_v46, %v368_v30 }
  0x63   :  { %v375_v27 = vsub.f32 %v11808_v53, %v374_v42  ;;  %v10292_v45 = vpack.c.bf16 %v322_v0, %v310_v3  ;;  %v352_v6 = vand.u32 4294901760, %v351_v34  ;;  %v386_v55 = vand.u32 4294901760, %v11814_v2 }
  0x64   :  { %10289 = vmatpush1.bf16.msra.mxu1 %v10288_v50  ;;  %10385 = vmatpush1.bf16.msra.mxu0 %v10384_v60  ;;  %v380_v10 = vand.u32 4294901760, %v11818_v13  ;;  %v10294_v52 = vpack.c.bf16 %v340_v15, %v328_v54  ;;  %v364_v57 = vand.u32 4294901760, %v363_v51  ;;  %v392_v43 = vand.u32 4294901760, %v11820_v14 }
  0x65   :  { %10291 = vmatprep.subr.bf16.mxu1 %v10290_v23  ;;  %10387 = vmatprep.subr.bf16.mxu0 %v10386_v22  ;;  %v398_v39 = vand.u32 4294901760, %v11824_v4  ;;  %v10392_v18 = vpack.c.bf16 %v344_v21, %v332_v58  ;;  %v10394_v5 = vpack.c.bf16 %v362_v62, %v350_v44  ;;  %v387_v53 = vsub.f32 %v11814_v2, %v386_v55 }
  0x66   :  { %v10296_v50 = vpack.c.bf16 %v346_v32, %v334_v59  ;;  %v358_v60 = vand.u32 4294901760, %v357_v56  ;;  %v370_v3 = vand.u32 4294901760, %v369_v35  ;;  %v376_v0 = vand.u32 4294901760, %v375_v27 }
  0x67   :  { %v381_v34 = vsub.f32 %v11818_v13, %v380_v10  ;;  %v393_v23 = vsub.f32 %v11820_v14, %v392_v43  ;;  %v410_v54 = vand.u32 4294901760, %v11838_v28  ;;  %v404_v15 = vand.u32 4294901760, %v11844_v11 }
  0x68   :  { %10293 = vmatpush1.bf16.msra.mxu1 %v10292_v45  ;;  %10389 = vmatpush1.bf16.msra.mxu0 %v10388_v47  ;;  %v10298_v58 = vpack.c.bf16 %v364_v57, %v352_v6  ;;  %v388_v21 = vand.u32 4294901760, %v387_v53  ;;  %v399_v44 = vsub.f32 %v11824_v4, %v398_v39  ;;  %v416_v22 = vand.u32 4294901760, %v11853_v31 }
  0x69   :  { %10295 = vmatprep.subr.bf16.mxu1 %v10294_v52  ;;  %10391 = vmatprep.subr.bf16.mxu0 %v10390_v38  ;;  %v411_v27 = vsub.f32 %v11838_v28, %v410_v54  ;;  %v10300_v62 = vpack.c.bf16 %v370_v3, %v358_v60  ;;  %v10396_v47 = vpack.c.bf16 %v368_v30, %v356_v19  ;;  %v382_v59 = vand.u32 4294901760, %v381_v34  ;;  %v14453_v3 = vld [vmem:[#allocation13_spill] sm:$0xff]  ;;  %v14454_v34 = vld [vmem:[#allocation15_spill] sm:$0xff] }
  0x6a   :  { %v394_v51 = vand.u32 4294901760, %v393_v23  ;;  %v405_v32 = vsub.f32 %v11844_v11, %v404_v15  ;;  %v417_v56 = vsub.f32 %v11853_v31, %v416_v22  ;;  %v10302_v38 = vpack.c.bf16 %v388_v21, %v376_v0 }
  0x6b   :  { %v10398_v53 = vpack.c.bf16 %v386_v55, %v374_v42  ;;  %v400_v35 = vand.u32 4294901760, %v399_v44  ;;  %v412_v45 = vand.u32 4294901760, %v411_v27  ;;  %v10400_v52 = vpack.c.bf16 %v392_v43, %v380_v10  ;;  %v14446_v43 = vld [vmem:[#allocation9_spill] sm:$0xff]  ;;  %v74_v44 = vld [vmem:[#allocation2 + $0x10] sm:$0xff]  ;;  %v83_v27 = vld [vmem:[#allocation2 + $0x58] sm:$0xff] }
  0x6c   :  { %10297 = vmatpush1.bf16.msra.mxu1 %v10296_v50  ;;  %10393 = vmatpush1.bf16.msra.mxu0 %v10392_v18  ;;  %v10304_v6 = vpack.c.bf16 %v394_v51, %v382_v59  ;;  %v406_v57 = vand.u32 4294901760, %v405_v32  ;;  %v418_v30 = vand.u32 4294901760, %v417_v56  ;;  %v10402_v18 = vpack.c.bf16 %v410_v54, %v398_v39  ;;  %v14447_v39 = vld [vmem:[#allocation12_spill] sm:$0xff]  ;;  %v14456_v54 = vld [vmem:[#allocation19_spill] sm:$0xff] }
  0x6d   :  { %10299 = vmatprep.subr.bf16.mxu1 %v10298_v58  ;;  %10395 = vmatprep.subr.bf16.mxu0 %v10394_v5  ;;  %v10306_v19 = vpack.c.bf16 %v412_v45, %v400_v35  ;;  %v10404_v60 = vpack.c.bf16 %v416_v22, %v404_v15  ;;  %v10310_v42 = vpack.c.bf16 %v11722_v25, %v11715_v20  ;;  %v14448_v20 = vld [vmem:[#allocation14_spill] sm:$0xff]  ;;  %v14463_v22 = vld [vmem:[#allocation25_spill] sm:$0xff]  ;;  %v985_v56 = vand.u32 4294901760, %v83_v27 }
  0x6e   :  { %v10308_v50 = vpack.c.bf16 %v418_v30, %v406_v57  ;;  %v10312_v55 = vpack.c.bf16 %v11729_v33, %v11726_v29  ;;  %v10314_v10 = vpack.c.bf16 %v11737_v41, %v11735_v40  ;;  %v10316_v25 = vpack.c.bf16 %v14448_v20, %v14447_v39  ;;  %v14449_v5 = vld [vmem:[#allocation10_spill] sm:$0xff]  ;;  %v14451_v33 = vld [vmem:[#allocation16_spill] sm:$0xff] }
  0x6f   :  { %v10318_v29 = vpack.c.bf16 %v11747_v49, %v11745_v48  ;;  %v14452_v40 = vld [vmem:[#allocation18_spill] sm:$0xff]  ;;  %v10322_v0 = vpack.c.bf16 %v11763_v1, %v11761_v63  ;;  %v10324_v48 = vpack.c.bf16 %v11769_v8, %v11767_v7  ;;  %v14455_v49 = vld [vmem:[#allocation17_spill] sm:$0xff]  ;;  %v10326_v23 = vpack.c.bf16 %v11777_v12, %v11771_v9  ;;  %v14457_v63 = vld [vmem:[#allocation20_spill] sm:$0xff] }
  0x70   :  { %10301 = vmatpush1.bf16.msra.mxu1 %v10300_v62  ;;  %10397 = vmatpush1.bf16.msra.mxu0 %v10396_v47  ;;  %v10320_v41 = vpack.c.bf16 %v14452_v40, %v14451_v33  ;;  %v10328_v15 = vpack.c.bf16 %v11785_v26, %v11783_v24  ;;  %v14458_v1 = vld [vmem:[#allocation22_spill] sm:$0xff]  ;;  %v14459_v7 = vld [vmem:[#allocation21_spill] sm:$0xff]  ;;  %v10332_v8 = vpack.c.bf16 %v11802_v46, %v11793_v37  ;;  %v14460_v9 = vld [vmem:[#allocation23_spill] sm:$0xff]  ;;  %v976_v62 = vand.u32 4294901760, %v74_v44 }
  0x71   :  { %10303 = vmatprep.subr.bf16.mxu1 %v10302_v38  ;;  %10399 = vmatprep.subr.bf16.mxu0 %v10398_v53  ;;  %v10330_v58 = vpack.c.bf16 %v11791_v36, %v14458_v1  ;;  %v14461_v12 = vld [vmem:[#allocation26_spill] sm:$0xff]  ;;  %v14462_v24 = vld [vmem:[#allocation24_spill] sm:$0xff]  ;;  %v10336_v26 = vpack.c.bf16 %v11820_v14, %v11818_v13  ;;  %v10338_v37 = vpack.c.bf16 %v11838_v28, %v11824_v4  ;;  %v80_v46 = vld [vmem:[#allocation2 + $0x40] sm:$0xff] }
  0x72   :  { %v10334_v21 = vpack.c.bf16 %v11814_v2, %v14461_v12  ;;  %v77_v36 = vld [vmem:[#allocation2 + $0x28] sm:$0xff]  ;;  %v14464_v2 = vld [vmem:[#allocation27_spill] sm:$0xff]  ;;  %v10340_v59 = vpack.c.bf16 %v11853_v31, %v11844_v11  ;;  %v14465_v13 = vld [vmem:[#allocation28_spill] sm:$0xff]  ;;  %v11975_v14 = vsub.f32 %v74_v44, %v976_v62  ;;  %v982_v32 = vand.u32 4294901760, %v80_v46 }
  0x73   :  { %v979_v47 = vand.u32 4294901760, %v77_v36  ;;  %v86_v4 = vld [vmem:[#allocation2 + $0x70] sm:$0xff]  ;;  %v89_v28 = vld [vmem:[#allocation2 + $0x88] sm:$0xff]  ;;  %v11981_v53 = vsub.f32 %v83_v27, %v985_v56  ;;  %v14397_v31 = vmov 0.0|0.0  }
  0x74   :  { %10305 = vmatpush1.bf16.msra.mxu1 %v10304_v6  ;;  %10401 = vmatpush1.bf16.msra.mxu0 %v10400_v52  ;;  %v11979_v38 = vsub.f32 %v80_v46, %v982_v32  ;;  %v14466_v35 = vld [vmem:[#allocation30_spill] sm:$0xff]  ;;  %v988_v11 = vand.u32 4294901760, %v86_v4  ;;  %v991_v6 = vand.u32 4294901760, %v89_v28  ;;  %v1069_v52 = vand.u32 4294901760, %v11975_v14  ;;  %v110_v12 = vld [vmem:[#allocation2 + $0x130] sm:$0xff] }
  0x75   :  { %10307 = vmatprep.subr.bf16.mxu1 %v10306_v19  ;;  %10403 = vmatprep.subr.bf16.mxu0 %v10402_v18  ;;  %v11977_v51 = vsub.f32 %v77_v36, %v979_v47  ;;  %v11984_v45 = vpack.c.bf16 %v979_v47, %v976_v62  ;;  %v92_v19 = vld [vmem:[#allocation2 + $0xa0] sm:$0xff]  ;;  %v95_v18 = vld [vmem:[#allocation2 + $0xb8] sm:$0xff] }
  0x76   :  { %v11989_v30 = vsub.f32 %v86_v4, %v988_v11  ;;  %v994_v39 = vand.u32 4294901760, %v92_v19  ;;  %v997_v20 = vand.u32 4294901760, %v95_v18  ;;  %v116_v62 = vld [vmem:[#allocation2 + $0x160] sm:$0xff]  ;;  %v119_v47 = vld [vmem:[#allocation2 + $0x178] sm:$0xff] }
  0x77   :  { %v1076_v57 = vand.u32 4294901760, %v11977_v51  ;;  %v1018_v4 = vand.u32 4294901760, %v116_v62 }
  0x78   :  { %10309 = vmatpush1.bf16.msra.mxu1 %v10308_v50  ;;  %10405 = vmatpush1.bf16.msra.mxu0 %v10404_v60  ;;  %v14467_v50 = vld [vmem:[#allocation29_spill] sm:$0xff]  ;;  %v11993_v60 = vsub.f32 %v89_v28, %v991_v6  ;;  %v12017_v33 = vsub.f32 %v95_v18, %v997_v20  ;;  %v1097_v40 = vand.u32 4294901760, %v11989_v30  ;;  %v1021_v28 = vand.u32 4294901760, %v119_v47 }
  0x79   :  { %10311 = vmatprep.subr.bf16.mxu1 %v10310_v42  ;;  %10407 = vmatprep.subr.bf16.mxu0 %v11713_v16  ;;  %v14450_v16 = vld [vmem:[#allocation11_spill] sm:$0xff]  ;;  %v1083_v42 = vand.u32 4294901760, %v11979_v38 }
  0x7a   :  { %v1118_v1 = vand.u32 4294901760, %v12017_v33 }
  0x7b   :  { %454 = vmatmul.mubr.f32.vlgmr.msra.gmra.mrb[0].mxu1 %v11812_v61  ;;  %865 = vmatmul.mubr.f32.vlgmr.msra.gmra.mrb[0].mxu0 %v11812_v61 }
  0x7c   :  { %10313 = vmatpush1.bf16.msra.mxu1 %v10312_v55  ;;  %10409 = vmatpush1.bf16.msra.mxu0 %v14446_v43  ;;  %v1090_v55 = vand.u32 4294901760, %v11981_v53  ;;  %v12004_v43 = vpack.c.bf16 %v985_v56, %v982_v32 }
  0x7d   :  { %10315 = vmatprep.subr.bf16.mxu1 %v10314_v10  ;;  %10411 = vmatprep.subr.bf16.mxu0 %v14449_v5  ;;  %v12001_v10 = vpack.c.bf16 %v1076_v57, %v1069_v52  ;;  %v98_v5 = vld [vmem:[#allocation2 + $0xd0] sm:$0xff] }
  0x7e   :  { %588 = vmatprep.mubr.f32.mxu1 %v14445_v17  ;;  %967 = vmatprep.mubr.f32.mxu0 %v14445_v17 }
  0x80   :  { %10317 = vmatpush1.bf16.msra.mxu1 %v10316_v25  ;;  %10413 = vmatpush1.bf16.msra.mxu0 %v14450_v16  ;;  %v12013_v25 = vpack.c.bf16 %v1090_v55, %v1083_v42  ;;  %v12015_v16 = vsub.f32 %v92_v19, %v994_v39 }
  0x81   :  { %10319 = vmatprep.subr.bf16.mxu1 %v10318_v29  ;;  %10415 = vmatprep.subr.bf16.mxu0 %v14453_v3  ;;  %v101_v29 = vld [vmem:[#allocation2 + $0xe8] sm:$0xff]  ;;  %v12022_v3 = vpack.c.bf16 %v991_v6, %v988_v11  ;;  %v12067_v11 = vsub.f32 %v116_v62, %v1018_v4  ;;  %v12069_v6 = vsub.f32 %v119_v47, %v1021_v28 }
  0x82   :  { %v1119_v47 = vsub.f32 %v12017_v33, %v1118_v1 }
  0x84   :  { %10321 = vmatpush1.bf16.msra.mxu1 %v10320_v41  ;;  %10417 = vmatpush1.bf16.msra.mxu0 %v14454_v34  ;;  %v1104_v41 = vand.u32 4294901760, %v11993_v60  ;;  %v1003_v34 = vand.u32 4294901760, %v101_v29 }
  0x85   :  { %10323 = vmatprep.subr.bf16.mxu1 %v10322_v0  ;;  %10419 = vmatprep.subr.bf16.mxu0 %v14455_v49  ;;  %v1000_v0 = vand.u32 4294901760, %v98_v5  ;;  %v104_v49 = vld [vmem:[#allocation2 + $0x100] sm:$0xff] }
  0x88   :  { %10325 = vmatpush1.bf16.msra.mxu1 %v10324_v48  ;;  %10421 = vmatpush1.bf16.msra.mxu0 %v14456_v54  ;;  %v12029_v48 = vpack.c.bf16 %v1104_v41, %v1097_v40  ;;  %v12031_v54 = vsub.f32 %v98_v5, %v1000_v0  ;;  %v1077_v5 = vsub.f32 %v11977_v51, %v1076_v57 }
  0x89   :  { %10327 = vmatprep.subr.bf16.mxu1 %v10326_v23  ;;  %10423 = vmatprep.subr.bf16.mxu0 %v14457_v63  ;;  %v107_v23 = vld [vmem:[#allocation2 + $0x118] sm:$0xff]  ;;  %v1111_v63 = vand.u32 4294901760, %v12015_v16  ;;  %v1091_v57 = vsub.f32 %v11981_v53, %v1090_v55 }
  0x8a   :  { %v1125_v44 = vand.u32 4294901760, %v12031_v54  ;;  %v14468_v55 = vld [vmem:[#allocation32_spill] sm:$0xff] }
  0x8b   :  { %v1112_v62 = vsub.f32 %v12015_v16, %v1111_v63 }
  0x8c   :  { %10329 = vmatpush1.bf16.msra.mxu1 %v10328_v15  ;;  %10425 = vmatpush1.bf16.msra.mxu0 %v14459_v7  ;;  %v12033_v15 = vsub.f32 %v101_v29, %v1003_v34  ;;  %v1006_v7 = vand.u32 4294901760, %v104_v49 }
  0x8d   :  { %10331 = vmatprep.subr.bf16.mxu1 %v10330_v58  ;;  %10427 = vmatprep.subr.bf16.mxu0 %v14460_v9  ;;  %v12038_v58 = vpack.c.bf16 %v997_v20, %v994_v39  ;;  %v12041_v9 = vpack.c.bf16 %v1118_v1, %v1111_v63  ;;  %v1070_v20 = vsub.f32 %v11975_v14, %v1069_v52 }
  0x8e   :  { %v1132_v36 = vand.u32 4294901760, %v12033_v15  ;;  %v1084_v52 = vsub.f32 %v11979_v38, %v1083_v42  ;;  %v1105_v42 = vsub.f32 %v11993_v60, %v1104_v41 }
  0x90   :  { %10333 = vmatpush1.bf16.msra.mxu1 %v10332_v8  ;;  %10429 = vmatpush1.bf16.msra.mxu0 %v14462_v24  ;;  %v1009_v8 = vand.u32 4294901760, %v107_v23  ;;  %v12043_v24 = vsub.f32 %v104_v49, %v1006_v7  ;;  %v12053_v27 = vpack.c.bf16 %v1132_v36, %v1125_v44  ;;  %v1174_v49 = vand.u32 4294901760, %v12069_v6 }
  0x91   :  { %10335 = vmatprep.subr.bf16.mxu1 %v10334_v21  ;;  %10431 = vmatprep.subr.bf16.mxu0 %v14463_v22  ;;  %v113_v21 = vld [vmem:[#allocation2 + $0x148] sm:$0xff]  ;;  %v12050_v22 = vpack.c.bf16 %v1003_v34, %v1000_v0  ;;  %v12085_v0 = vpack.c.bf16 %v1021_v28, %v1018_v4  ;;  %v1167_v34 = vand.u32 4294901760, %v12067_v11  ;;  %v1106_v28 = vand.u32 4294901760, %v1105_v42 }
  0x92   :  { %v1015_v46 = vand.u32 4294901760, %v113_v21  ;;  %v12062_v56 = vpack.c.bf16 %v1009_v8, %v1006_v7  ;;  %v1078_v7 = vand.u32 4294901760, %v1077_v5  ;;  %v1120_v5 = vand.u32 4294901760, %v1119_v47 }
  0x93   :  { %v1168_v42 = vsub.f32 %v12067_v11, %v1167_v34 }
  0x94   :  { %10337 = vmatpush1.bf16.msra.mxu1 %v10336_v26  ;;  %10433 = vmatpush1.bf16.msra.mxu0 %v14464_v2  ;;  %v12045_v26 = vsub.f32 %v107_v23, %v1009_v8  ;;  %v1071_v23 = vand.u32 4294901760, %v1070_v20  ;;  %v12097_v8 = vpack.c.bf16 %v1174_v49, %v1167_v34  ;;  %v1113_v20 = vand.u32 4294901760, %v1112_v62 }
  0x95   :  { %10339 = vmatprep.subr.bf16.mxu1 %v10338_v37  ;;  %10435 = vmatprep.subr.bf16.mxu0 %v14465_v13  ;;  %v1012_v37 = vand.u32 4294901760, %v110_v12  ;;  %v1139_v13 = vand.u32 4294901760, %v12043_v24  ;;  %v1169_v47 = vand.u32 4294901760, %v1168_v42  ;;  %v10487_v34 = vpack.c.bf16 %v11977_v51, %v11975_v14  ;;  %v1657_v42 = vld [vmem:[%s14366_s5 + $0x50] sm:$0xff] }
  0x96   :  { %v1146_v32 = vand.u32 4294901760, %v12045_v26  ;;  %v10472_v63 = vpack.c.bf16 %v1120_v5, %v1113_v20  ;;  %v10496_v14 = vpack.c.bf16 %v12017_v33, %v12015_v16  ;;  %v10499_v51 = vpack.c.bf16 %v12033_v15, %v12031_v54 }
  0x97   :  { %v12055_v2 = vsub.f32 %v110_v12, %v1012_v37  ;;  %v12074_v39 = vpack.c.bf16 %v1015_v46, %v1012_v37  ;;  %v1098_v12 = vsub.f32 %v11989_v30, %v1097_v40  ;;  %v1085_v37 = vand.u32 4294901760, %v1084_v52 }
  0x98   :  { %10341 = vmatpush1.bf16.msra.mxu1 %v10340_v59  ;;  %10437 = vmatpush1.bf16.msra.mxu0 %v14466_v35  ;;  %v12057_v59 = vsub.f32 %v113_v21, %v1015_v46  ;;  %v12065_v35 = vpack.c.bf16 %v1146_v32, %v1139_v13  ;;  %v10463_v21 = vpack.c.bf16 %v1078_v7, %v1071_v23  ;;  %v1092_v46 = vand.u32 4294901760, %v1091_v57 }
  0x99   :  { %10438 = vmatprep.subr.bf16.mxu1 %v14397_v31  ;;  %v1153_v19 = vand.u32 4294901760, %v12055_v2  ;;  %v1099_v40 = vand.u32 4294901760, %v1098_v12  ;;  %v1126_v23 = vsub.f32 %v12031_v54, %v1125_v44  ;;  %v1133_v7 = vsub.f32 %v12033_v15, %v1132_v36 }
  0x9a   :  { %v1160_v18 = vand.u32 4294901760, %v12057_v59  ;;  %v10466_v4 = vpack.c.bf16 %v1092_v46, %v1085_v37  ;;  %v1140_v57 = vsub.f32 %v12043_v24, %v1139_v13  ;;  %v1147_v12 = vsub.f32 %v12045_v26, %v1146_v32 }
  0x9b   :  { %591 = vmatmul.mubr.f32.vlgmr.msra.gmra.mrb[0].mxu1 %v14467_v50  ;;  %969 = vmatmul.mubr.f32.vlgmr.msra.gmra.mrb[0].mxu0 %v11812_v61  ;;  %v10469_v41 = vpack.c.bf16 %v1106_v28, %v1099_v40  ;;  %v1127_v1 = vand.u32 4294901760, %v1126_v23  ;;  %v1134_v52 = vand.u32 4294901760, %v1133_v7  ;;  %v1175_v32 = vsub.f32 %v12069_v6, %v1174_v49  ;;  %v1655_v28 = vld [vmem:[%s14366_s5 + $0x40] sm:$0xff] }
  0x9c   :  { %10440 = vmatpush3.bf16.msra.mxu1 %v11984_v45  ;;  %8760 = vmatprep.mubr.msk.f32.mxu1 %vm11623_vm0, %v14445_v17  ;;  %v12083_v29 = vpack.c.bf16 %v1160_v18, %v1153_v19  ;;  %v1141_v46 = vand.u32 4294901760, %v1140_v57  ;;  %v1148_v44 = vand.u32 4294901760, %v1147_v12  ;;  %v1161_v36 = vsub.f32 %v12057_v59, %v1160_v18 }
  0x9d   :  { %10441 = vmatprep.subr.bf16.mxu1 %v14397_v31  ;;  %v10475_v37 = vpack.c.bf16 %v1134_v52, %v1127_v1  ;;  %v10490_v49 = vpack.c.bf16 %v11981_v53, %v11979_v38  ;;  %v10493_v40 = vpack.c.bf16 %v11993_v60, %v11989_v30  ;;  %v1647_v38 = vld [vmem:[%s14366_s5] sm:$0xff]  ;;  %v10502_v30 = vpack.c.bf16 %v12045_v26, %v12043_v24 }
  0x9e   :  { %v1162_v13 = vand.u32 4294901760, %v1161_v36  ;;  %v1665_v53 = vsel %vm1663_vm1, %v1647_v38, 0  ;;  %v10505_v33 = vpack.c.bf16 %v12057_v59, %v12055_v2  ;;  %v10508_v24 = vpack.c.bf16 %v12069_v6, %v12067_v11 }
  0x9f   :  { %v12151_v60 = vand.u32 4294901760, %v1665_v53  ;;  %v1689_v57 = vsel %vm1663_vm1, %v1655_v28, 0 }
  0xa0   :  { %10443 = vmatpush3.bf16.msra.mxu1 %v12004_v43 }
  0xa1   :  { %10444 = vmatprep.subr.bf16.mxu1 %v14397_v31  ;;  %v12155_v16 = vsub.f32 %v1665_v53, %v12151_v60  ;;  %v1695_v53 = vsel %vm1663_vm1, %v1657_v42, 0 }
  0xa3   :  { %v1780_v54 = vand.u32 4294901760, %v12155_v16 }
  0xa4   :  { %10446 = vmatpush3.bf16.msra.mxu1 %v12022_v3 }
  0xa5   :  { %10447 = vmatprep.subr.bf16.mxu1 %v14397_v31  ;;  %v1781_v15 = vsub.f32 %v12155_v16, %v1780_v54 }
  0xa7   :  { %v1782_v26 = vand.u32 4294901760, %v1781_v15 }
  0xa8   :  { %10449 = vmatpush3.bf16.msra.mxu1 %v12038_v58 }
  0xa9   :  { %10450 = vmatprep.subr.bf16.mxu1 %v14397_v31  ;;  %8940 = vmatprep.mubr.f32.mxu0 %v1782_v26 }
  0xac   :  { %10452 = vmatpush3.bf16.msra.mxu1 %v12050_v22 }
  0xad   :  { %10453 = vmatprep.subr.bf16.mxu1 %v14397_v31 }
  0xb0   :  { %10455 = vmatpush3.bf16.msra.mxu1 %v12062_v56 }
  0xb1   :  { %10456 = vmatprep.subr.bf16.mxu1 %v14397_v31 }
  0xb4   :  { %10458 = vmatpush3.bf16.msra.mxu1 %v12074_v39 }
  0xb5   :  { %10459 = vmatprep.subr.bf16.mxu1 %v14397_v31 }
  0xb8   :  { %10461 = vmatpush3.bf16.msra.mxu1 %v12085_v0 }
  0xb9   :  { %10462 = vmatprep.subr.bf16.mxu1 %v14397_v31 }
  0xbb   :  { %8761 = vmatmul.mubr.f32.vlgmr.msra.gmra.mrb[2].mxu1 %v14468_v55  ;;  %v10478_v55 = vpack.c.bf16 %v1148_v44, %v1141_v46 }
  0xbc   :  { %10464 = vmatpush3.bf16.msra.mxu1 %v10463_v21  ;;  %8795 = vmatprep.mubr.msk.f32.mxu1 %vm11623_vm0, %v14445_v17  ;;  %v1154_v21 = vsub.f32 %v12055_v2, %v1153_v19  ;;  %v1653_v2 = vld [vmem:[%s14366_s5 + $0x30] sm:$0xff] }
  0xbd   :  { %10465 = vmatprep.subr.bf16.mxu1 %v14397_v31 }
  0xbe   :  { %v1155_v62 = vand.u32 4294901760, %v1154_v21 }
  0xc0   :  { %10467 = vmatpush3.bf16.msra.mxu1 %v10466_v4  ;;  %v10481_v19 = vpack.c.bf16 %v1162_v13, %v1155_v62  ;;  %v1176_v4 = vand.u32 4294901760, %v1175_v32 }
  0xc1   :  { %10468 = vmatprep.subr.bf16.mxu1 %v14397_v31 }
  0xc2   :  { %v10484_v18 = vpack.c.bf16 %v1176_v4, %v1169_v47 }
  0xc4   :  { %10470 = vmatpush3.bf16.msra.mxu1 %v10469_v41  ;;  %v12277_v41 = vld [vmem:[%s14368_s7] sm:$0xff] }
  0xc5   :  { %10471 = vmatprep.subr.bf16.mxu1 %v14397_v31 }
  0xc8   :  { %10473 = vmatpush3.bf16.msra.mxu1 %v10472_v63 }
  0xc9   :  { %10474 = vmatprep.subr.bf16.mxu1 %v14397_v31 }
  0xcc   :  { %10476 = vmatpush3.bf16.msra.mxu1 %v10475_v37  ;;  %v1656_v37 = vld [vmem:[%s14366_s5 + $0x48] sm:$0xff] }
  0xcd   :  { %10477 = vmatprep.subr.bf16.mxu1 %v14397_v31 }
  0xd0   :  { %10479 = vmatpush3.bf16.msra.mxu1 %v10478_v55 }
  0xd1   :  { %10480 = vmatprep.subr.bf16.mxu1 %v14397_v31 }
  0xd4   :  { %10482 = vmatpush3.bf16.msra.mxu1 %v10481_v19  ;;  %v12308_v19 = vand.u32 4294901760, %v1689_v57 }
  0xd5   :  { %10483 = vmatprep.subr.bf16.mxu1 %v14397_v31 }
  0xd8   :  { %10485 = vmatpush3.bf16.msra.mxu1 %v10484_v18 }
  0xd9   :  { %10486 = vmatprep.subr.bf16.mxu1 %v14397_v31 }
  0xdb   :  { %8796 = vmatmul.mubr.f32.vlgmr.msra.gmra.mrb[4].mxu1 %v11812_v61 }
  0xdc   :  { %10488 = vmatpush3.bf16.msra.mxu1 %v10487_v34  ;;  %8830 = vmatprep.mubr.msk.f32.mxu1 %vm11623_vm0, %v14445_v17 }
  0xdd   :  { %10489 = vmatprep.subr.bf16.mxu1 %v14397_v31 }
  0xe0   :  { %10491 = vmatpush3.bf16.msra.mxu1 %v10490_v49 }
  0xe1   :  { %10492 = vmatprep.subr.bf16.mxu1 %v14397_v31 }
  0xe4   :  { %10494 = vmatpush3.bf16.msra.mxu1 %v10493_v40  ;;  %v1692_v40 = vsel %vm1663_vm1, %v1656_v37, 0 }
  0xe5   :  { %10495 = vmatprep.subr.bf16.mxu1 %v14397_v31 }
  0xe8   :  { %10497 = vmatpush3.bf16.msra.mxu1 %v10496_v14 }
  0xe9   :  { %10498 = vmatprep.subr.bf16.mxu1 %v14397_v31 }
  0xec   :  { %10500 = vmatpush3.bf16.msra.mxu1 %v10499_v51 }
  0xed   :  { %10501 = vmatprep.subr.bf16.mxu1 %v14397_v31 }
  0xf0   :  { %10503 = vmatpush3.bf16.msra.mxu1 %v10502_v30 }
  0xf1   :  { %10504 = vmatprep.subr.bf16.mxu1 %v14397_v31 }
  0xf4   :  { %10506 = vmatpush3.bf16.msra.mxu1 %v10505_v33 }
  0xf5   :  { %10507 = vmatprep.subr.bf16.mxu1 %v14397_v31 }
  0xf8   :  { %10509 = vmatpush3.bf16.msra.mxu1 %v10508_v24  ;;  %v1658_v24 = vld [vmem:[%s14366_s5 + $0x58] sm:$0xff] }
  0xf9   :  { %10510 = vmatprep.subr.bf16.mxu1 %v14397_v31 }
  0xfb   :  { %8831 = vmatmul.mubr.f32.vlgmr.msra.gmra.mrb[6].mxu1 %v14467_v50  ;;  %v14469_v50 = vld [vmem:[#allocation31_spill] sm:$0xff] }
  0xfc   :  { %10512 = vmatpush3.bf16.msra.mxu1 %v11984_v45  ;;  %8865 = vmatprep.mubr.msk.f32.mxu1 %vm11623_vm0, %v14445_v17 }
  0xfd   :  { %10513 = vmatprep.subr.bf16.mxu1 %v14397_v31 }
 0x100   :  { %10515 = vmatpush3.bf16.msra.mxu1 %v12004_v43 }
 0x101   :  { %10516 = vmatprep.subr.bf16.mxu1 %v14397_v31 }
 0x104   :  { %10518 = vmatpush3.bf16.msra.mxu1 %v12022_v3 }
 0x105   :  { %10519 = vmatprep.subr.bf16.mxu1 %v14397_v31 }
 0x108   :  { %10521 = vmatpush3.bf16.msra.mxu1 %v12038_v58 }
 0x109   :  { %10522 = vmatprep.subr.bf16.mxu1 %v14397_v31 }
 0x10c   :  { %10524 = vmatpush3.bf16.msra.mxu1 %v12050_v22 }
 0x10d   :  { %10525 = vmatprep.subr.bf16.mxu1 %v14397_v31 }
 0x110   :  { %10527 = vmatpush3.bf16.msra.mxu1 %v12062_v56 }
 0x111   :  { %10528 = vmatprep.subr.bf16.mxu1 %v14397_v31 }
 0x114   :  { %10530 = vmatpush3.bf16.msra.mxu1 %v12074_v39 }
 0x115   :  { %10531 = vmatprep.subr.bf16.mxu1 %v14397_v31 }
 0x118   :  { %10533 = vmatpush3.bf16.msra.mxu1 %v12085_v0 }
 0x119   :  { %10534 = vmatprep.subr.bf16.mxu1 %v14397_v31 }
 0x11b   :  { %8866 = vmatmul.mubr.f32.vlgmr.msra.gmra.mrb[8].mxu1 %v14469_v50 }
 0x11c   :  { %10536 = vmatpush3.bf16.msra.mxu1 %v12001_v10  ;;  %8900 = vmatprep.mubr.msk.f32.mxu1 %vm11623_vm0, %v14445_v17  ;;  %v1649_v10 = vld [vmem:[%s14366_s5 + $0x10] sm:$0xff] }
 0x11d   :  { %10537 = vmatprep.subr.bf16.mxu1 %v14397_v31 }
 0x120   :  { %10539 = vmatpush3.bf16.msra.mxu1 %v12013_v25  ;;  %v1616_v25 = vlaneseq }
 0x121   :  { %10540 = vmatprep.subr.bf16.mxu1 %v14397_v31 }
 0x122   :  { %v12250_v59 = vshrl.u32 %v1616_v25, 7 }
 0x124   :  { %10542 = vmatpush3.bf16.msra.mxu1 %v12029_v48  ;;  %v1650_v48 = vld [vmem:[%s14366_s5 + $0x18] sm:$0xff]  ;;  %v1618_v20 = vsub.s32 0, %v12250_v59  ;;  %v1623_v23 = vsub.s32 1, %v12250_v59 }
 0x125   :  { %10543 = vmatprep.subr.bf16.mxu1 %v14397_v31 }
 0x126   :  { %v1619_v46 = vrot.slane %v12277_v41, %v1618_v20  ;;  %v1624_v13 = vrot.slane %v12277_v41, %v1623_v23  ;;  %v1660_v20 = vld [vmem:[%s14366_s5 + $0x68] sm:$0xff] }
 0x128   :  { %10545 = vmatpush3.bf16.msra.mxu1 %v12041_v9  ;;  %v1652_v9 = vld [vmem:[%s14366_s5 + $0x28] sm:$0xff] }
 0x129   :  { %10546 = vmatprep.subr.bf16.mxu1 %v14397_v31 }
 0x12c   :  { %10548 = vmatpush3.bf16.msra.mxu1 %v12053_v27  ;;  %v1674_v27 = vsel %vm1663_vm1, %v1650_v48, 0 }
 0x12d   :  { %10549 = vmatprep.subr.bf16.mxu1 %v14397_v31  ;;  %v12257_v6 = vand.u32 4294901760, %v1674_v27 }
 0x12f   :  { %v12285_v52 = vsub.f32 %v1674_v27, %v12257_v6 }
 0x130   :  { %10551 = vmatpush3.bf16.msra.mxu1 %v12065_v35  ;;  %v1680_v35 = vsel %vm1663_vm1, %v1652_v9, 0 }
 0x131   :  { %10552 = vmatprep.subr.bf16.mxu1 %v14397_v31  ;;  %v12272_v5 = vand.u32 4294901760, %v1680_v35  ;;  %v1810_v49 = vand.u32 4294901760, %v12285_v52 }
 0x133   :  { %v12297_v44 = vsub.f32 %v1680_v35, %v12272_v5  ;;  %v1811_v48 = vsub.f32 %v12285_v52, %v1810_v49 }
 0x134   :  { %10554 = vmatpush3.bf16.msra.mxu1 %v12083_v29  ;;  %v1654_v29 = vld [vmem:[%s14366_s5 + $0x38] sm:$0xff] }
 0x135   :  { %10555 = vmatprep.subr.bf16.mxu1 %v14397_v31  ;;  %v1686_v63 = vsel %vm1663_vm1, %v1654_v29, 0  ;;  %v1830_v33 = vand.u32 4294901760, %v12297_v44  ;;  %v1812_v42 = vand.u32 4294901760, %v1811_v48 }
 0x136   :  { %v12299_v36 = vand.u32 4294901760, %v1686_v63 }
 0x138   :  { %10557 = vmatpush3.bf16.msra.mxu1 %v12097_v8  ;;  %v12322_v15 = vsub.f32 %v1686_v63, %v12299_v36 }
 0x139   :  { %10558 = vmatprep.subr.bf16.mxu1 %v14397_v31 }
 0x13a   :  { %v1850_v29 = vand.u32 4294901760, %v12322_v15 }
 0x13b   :  { %8901 = vmatmul.mubr.f32.vlgmr.msra.gmra.mrb[10].mxu1 %v11812_v61 }
 0x13c   :  { %10560 = vmatpush3.bf16.msra.mxu1 %v11984_v45  ;;  %8935 = vmatprep.mubr.msk.f32.mxu1 %vm11623_vm0, %v14445_v17  ;;  %v1648_v45 = vld [vmem:[%s14366_s5 + $0x8] sm:$0xff] }
 0x13d   :  { %10561 = vmatprep.subr.bf16.mxu1 %v14397_v31 }
 0x140   :  { %10563 = vmatpush3.bf16.msra.mxu1 %v12004_v43  ;;  %v1668_v43 = vsel %vm1663_vm1, %v1648_v45, 0  ;;  %v12329_v45 = vsub.f32 %v1689_v57, %v12308_v19 }
 0x141   :  { %10564 = vmatprep.subr.bf16.mxu1 %v14397_v31 }
 0x142   :  { %v14402_v57 = vand.u32 4294901760, %v12329_v45 }
 0x144   :  { %10566 = vmatpush3.bf16.msra.mxu1 %v12022_v3  ;;  %v1671_v3 = vsel %vm1663_vm1, %v1649_v10, 0  ;;  %v12331_v10 = vand.u32 4294901760, %v1692_v40 }
 0x145   :  { %10567 = vmatprep.subr.bf16.mxu1 %v14397_v31 }
 0x146   :  { %v12371_v37 = vsub.f32 %v1692_v40, %v12331_v10 }
 0x148   :  { %10569 = vmatpush3.bf16.msra.mxu1 %v12038_v58  ;;  %v12239_v58 = vand.u32 4294901760, %v1668_v43 }
 0x149   :  { %10570 = vmatprep.subr.bf16.mxu1 %v14397_v31 }
 0x14a   :  { %v12255_v11 = vsub.f32 %v1668_v43, %v12239_v58  ;;  %v1659_v43 = vld [vmem:[%s14366_s5 + $0x60] sm:$0xff] }
 0x14b   :  { %v1701_v28 = vsel %vm1663_vm1, %v1659_v43, 0  ;;  %v1861_v43 = vsub.f32 %v12329_v45, %v14402_v57 }
 0x14c   :  { %10572 = vmatpush3.bf16.msra.mxu1 %v12050_v22  ;;  %v12244_v22 = vand.u32 4294901760, %v1671_v3  ;;  %v1790_v1 = vand.u32 4294901760, %v12255_v11 }
 0x14d   :  { %10573 = vmatprep.subr.bf16.mxu1 %v14397_v31 }
 0x14e   :  { %v1791_v34 = vsub.f32 %v12255_v11, %v1790_v1 }
 0x150   :  { %10575 = vmatpush3.bf16.msra.mxu1 %v12062_v56 }
 0x151   :  { %10576 = vmatprep.subr.bf16.mxu1 %v14397_v31 }
 0x154   :  { %10578 = vmatpush3.bf16.msra.mxu1 %v12074_v39  ;;  %v1683_v39 = vsel %vm1663_vm1, %v1653_v2, 0 }
 0x155   :  { %10579 = vmatprep.subr.bf16.mxu1 %v14397_v31  ;;  %v12280_v7 = vand.u32 4294901760, %v1683_v39 }
 0x157   :  { %v12306_v32 = vsub.f32 %v1683_v39, %v12280_v7  ;;  %v1831_v39 = vsub.f32 %v12297_v44, %v1830_v33 }
 0x158   :  { %10581 = vmatpush3.bf16.msra.mxu1 %v12085_v0  ;;  %v12264_v0 = vsub.f32 %v1671_v3, %v12244_v22  ;;  %v1792_v3 = vand.u32 4294901760, %v1791_v34  ;;  %v1704_v34 = vsel %vm1663_vm1, %v1660_v20, 0 }
 0x159   :  { %v1840_v50 = vand.u32 4294901760, %v12306_v32 }
 0x15a   :  { %v1800_v12 = vand.u32 4294901760, %v12264_v0 }
 0x15b   :  { %8936 = vmatmul.mubr.f32.vlgmr.msra.gmra.mrb[12].mxu1 %v11812_v61  ;;  %v1651_v61 = vld [vmem:[%s14366_s5 + $0x20] sm:$0xff]  ;;  %v1841_v63 = vsub.f32 %v12306_v32, %v1840_v50 }
 0x15c   :  { %v1677_v56 = vsel %vm1663_vm1, %v1651_v61, 0  ;;  %v1801_v51 = vsub.f32 %v12264_v0, %v1800_v12  ;;  %v12341_v61 = vand.u32 4294901760, %v1695_v53 }
 0x15d   :  { %v12266_v8 = vand.u32 4294901760, %v1677_v56 }
 0x15e   :  { %v1802_v27 = vand.u32 4294901760, %v1801_v51  ;;  %v1851_v51 = vsub.f32 %v12322_v15, %v1850_v29 }
 0x15f   :  { %v12290_v21 = vsub.f32 %v1677_v56, %v12266_v8  ;;  %v1698_v56 = vsel %vm1663_vm1, %v1658_v24, 0 }
 0x161   :  { %v1820_v38 = vand.u32 4294901760, %v12290_v21 }
 0x163   :  { %v1821_v2 = vsub.f32 %v12290_v21, %v1820_v38 }
 0x16e   :  { %v592_v55 = vpop.f32.mrb[0].mxu1  ;;  %v970_v62 = vpop.f32.mrb[0].mxu0 }
 0x16f   :  { %v11158_v47 = vadd.f32 %v970_v62, %v592_v55  ;;  %v594_v4 = vpop.f32.mrb[1].mxu1  ;;  %v972_v18 = vpop.f32.mrb[1].mxu0  ;;  %v12381_v62 = vsub.f32 %v1695_v53, %v12341_v61 }
 0x170   :  { %v11159_v14 = vadd.f32 %v972_v18, %v594_v4  ;;  %v12388_v18 = vand.u32 4294901760, %v1701_v28 }
 0x171   :  { %v1620_v30 = vadd.f32 %v11158_v47, %v1619_v46  ;;  %v1661_v46 = vld [vmem:[%s14366_s5 + $0x70] sm:$0xff]  ;;  %v1822_v47 = vand.u32 4294901760, %v1821_v2 }
 0x172   :  { %v1625_v26 = vadd.f32 %v11159_v14, %v1624_v13  ;;  %v12383_v13 = vand.u32 4294901760, %v1698_v56  ;;  %v1832_v14 = vand.u32 4294901760, %v1831_v39  ;;  %v1707_v53 = vsel %vm1663_vm1, %v1661_v46, 0 }
 0x173   :  { %v12336_v25 = vand.u32 4294901760, %v1620_v30  ;;  %v12410_v39 = vand.u32 4294901760, %v1704_v34  ;;  %v12417_v46 = vand.u32 4294901760, %v1707_v53 }
 0x174   :  { %v12343_v9 = vand.u32 4294901760, %v1625_v26  ;;  %v12408_v2 = vsub.f32 %v1698_v56, %v12383_v13 }
 0x175   :  { %v12350_v35 = vsub.f32 %v1620_v30, %v12336_v25  ;;  %8938 = vmatprep.subr.mxu0 %v12336_v25  ;;  %v1662_v30 = vld [vmem:[%s14366_s5 + $0x78] sm:$0xff] }
 0x176   :  { %v12362_v23 = vsub.f32 %v1625_v26, %v12343_v9  ;;  %8939 = vmatpush3.msra.mxu0 %v12336_v25  ;;  %9094 = vmatprep.subr.mxu1 %v12343_v9  ;;  %v1842_v26 = vand.u32 4294901760, %v1841_v63  ;;  %v12415_v63 = vsub.f32 %v1701_v28, %v12388_v18  ;;  %v1710_v31 = vsel %vm1663_vm1, %v1662_v30, 0 }
 0x177   :  { %8941 = vmatmul.mubr.f32.vlgmr.msra.gmra.mrb[2].mxu0 %v1792_v3  ;;  %9095 = vmatpush3.xpose.msra.mxu1 %v12343_v9  ;;  %v12378_v55 = vand.u32 4294901760, %v12350_v35  ;;  %v14399_v3 = vand.u32 4294901760, %v12371_v37  ;;  %v12427_v28 = vsub.f32 %v1704_v34, %v12410_v39  ;;  %v1862_v30 = vand.u32 4294901760, %v1861_v43 }
 0x178   :  { %8943 = vmatprep.mubr.f32.mxu0 %v1802_v27  ;;  %v12386_v4 = vand.u32 4294901760, %v12362_v23  ;;  %v14400_v27 = vand.u32 4294901760, %v12381_v62 }
 0x179   :  { %v1942_v40 = vsub.f32 %v12350_v35, %v12378_v55  ;;  %v1871_v56 = vsub.f32 %v12371_v37, %v14399_v3  ;;  %v1910_v3 = vand.u32 4294901760, %v12427_v28 }
 0x17a   :  { %v3049_v24 = vsub.f32 %v12362_v23, %v12386_v4 }
 0x17b   :  { %8944 = vmatmul.mubr.f32.gmra.mrb[4].mxu0 %v1812_v42  ;;  %v1943_v48 = vand.u32 4294901760, %v1942_v40  ;;  %v1852_v42 = vand.u32 4294901760, %v1851_v51  ;;  %v12429_v40 = vand.u32 4294901760, %v1710_v31  ;;  %v1881_v51 = vsub.f32 %v12381_v62, %v14400_v27 }
 0x17c   :  { %8946 = vmatprep.mubr.f32.mxu0 %v1822_v47  ;;  %v12412_v20 = vand.u32 4294901760, %v3049_v24  ;;  %v14401_v47 = vand.u32 4294901760, %v12408_v2  ;;  %v12436_v24 = vsub.f32 %v1707_v53, %v12417_v46 }
 0x17d   :  { %8964 = vmatprep.subr.mxu0 %v1943_v48  ;;  %v1882_v43 = vand.u32 4294901760, %v1881_v51 }
 0x17e   :  { %8965 = vmatpush3.msra.mxu0 %v1943_v48  ;;  %9120 = vmatprep.subr.mxu1 %v12412_v20  ;;  %v1872_v48 = vand.u32 4294901760, %v1871_v56  ;;  %v1891_v34 = vsub.f32 %v12408_v2, %v14401_v47  ;;  %v1920_v53 = vand.u32 4294901760, %v12436_v24  ;;  %v1911_v56 = vsub.f32 %v12427_v28, %v1910_v3 }
 0x17f   :  { %8947 = vmatmul.mubr.f32.gmra.mrb[6].mxu0 %v1832_v14  ;;  %8990 = vmatprep.subr.mxu0 %v12350_v35  ;;  %v1900_v14 = vand.u32 4294901760, %v12415_v63 }
 0x180   :  { %8949 = vmatprep.mubr.f32.mxu0 %v1842_v26  ;;  %v12443_v26 = vsub.f32 %v1710_v31, %v12429_v40  ;;  %v1921_v31 = vsub.f32 %v12436_v24, %v1920_v53 }
 0x181   :  { %v1901_v27 = vsub.f32 %v12415_v63, %v1900_v14 }
 0x182   :  { %v1930_v47 = vand.u32 4294901760, %v12443_v26 }
 0x183   :  { %8950 = vmatmul.mubr.f32.gmra.mrb[8].mxu0 %v1852_v42  ;;  %v1892_v42 = vand.u32 4294901760, %v1891_v34  ;;  %v1902_v57 = vand.u32 4294901760, %v1901_v27 }
 0x184   :  { %8952 = vmatprep.mubr.f32.mxu0 %v1862_v30  ;;  %v1912_v30 = vand.u32 4294901760, %v1911_v56  ;;  %v1931_v51 = vsub.f32 %v12443_v26, %v1930_v47 }
 0x186   :  { %v1932_v34 = vand.u32 4294901760, %v1931_v51 }
 0x187   :  { %8953 = vmatmul.mubr.f32.gmra.mrb[10].mxu0 %v1872_v48  ;;  %v1922_v48 = vand.u32 4294901760, %v1921_v31 }
 0x188   :  { %8955 = vmatprep.mubr.f32.mxu0 %v1882_v43 }
 0x18b   :  { %8956 = vmatmul.mubr.f32.gmra.mrb[12].mxu0 %v1892_v42 }
 0x18c   :  { %8958 = vmatprep.mubr.f32.mxu0 %v1902_v57 }
 0x18f   :  { %8959 = vmatmul.mubr.f32.gmra.mrb[14].mxu0 %v1912_v30 }
 0x190   :  { %8961 = vmatprep.mubr.f32.mxu0 %v1922_v48 }
 0x193   :  { %8962 = vmatmul.mubr.f32.gmra.mrb[16].mxu0 %v1932_v34 }
 0x194   :  { %8966 = vmatprep.mubr.f32.mxu0 %v12151_v60 }
 0x197   :  { %8967 = vmatmul.mubr.f32.vlgmr.msra.gmra.mrb[2].mxu0 %v12239_v58 }
 0x198   :  { %8991 = vmatpush3.msra.mxu0 %v12350_v35  ;;  %8969 = vmatprep.mubr.f32.mxu0 %v12244_v22 }
 0x199   :  { %9016 = vmatprep.subr.mxu0 %v12336_v25 }
 0x19b   :  { %8970 = vmatmul.mubr.f32.gmra.mrb[4].mxu0 %v12257_v6 }
 0x19c   :  { %8972 = vmatprep.mubr.f32.mxu0 %v12266_v8 }
 0x19f   :  { %8973 = vmatmul.mubr.f32.gmra.mrb[6].mxu0 %v12272_v5 }
 0x1a0   :  { %8975 = vmatprep.mubr.f32.mxu0 %v12280_v7 }
 0x1a3   :  { %8976 = vmatmul.mubr.f32.gmra.mrb[8].mxu0 %v12299_v36 }
 0x1a4   :  { %8978 = vmatprep.mubr.f32.mxu0 %v12308_v19 }
 0x1a7   :  { %8979 = vmatmul.mubr.f32.gmra.mrb[10].mxu0 %v12331_v10 }
 0x1a8   :  { %8981 = vmatprep.mubr.f32.mxu0 %v12341_v61 }
 0x1ab   :  { %8982 = vmatmul.mubr.f32.gmra.mrb[12].mxu0 %v12383_v13 }
 0x1ac   :  { %8984 = vmatprep.mubr.f32.mxu0 %v12388_v18 }
 0x1af   :  { %8985 = vmatmul.mubr.f32.gmra.mrb[14].mxu0 %v12410_v39 }
 0x1b0   :  { %8987 = vmatprep.mubr.f32.mxu0 %v12417_v46 }
 0x1b3   :  { %8988 = vmatmul.mubr.f32.gmra.mrb[16].mxu0 %v12429_v40 }
 0x1b4   :  { %8992 = vmatprep.mubr.f32.mxu0 %v12155_v16  ;;  %v14470_v16 = vand.u32 4294901760, %v12329_v45 }
 0x1b7   :  { %8993 = vmatmul.mubr.f32.vlgmr.msra.gmra.mrb[2].mxu0 %v12255_v11  ;;  %v14472_v11 = vand.u32 4294901760, %v12381_v62 }
 0x1b8   :  { %9017 = vmatpush3.msra.mxu0 %v12336_v25  ;;  %8995 = vmatprep.mubr.f32.mxu0 %v12264_v0  ;;  %v14473_v0 = vand.u32 4294901760, %v12408_v2 }
 0x1b9   :  { %9042 = vmatprep.subr.mxu0 %v12378_v55 }
 0x1bb   :  { %8996 = vmatmul.mubr.f32.gmra.mrb[4].mxu0 %v12285_v52 }
 0x1bc   :  { %8998 = vmatprep.mubr.f32.mxu0 %v12290_v21 }
 0x1bf   :  { %8999 = vmatmul.mubr.f32.gmra.mrb[6].mxu0 %v12297_v44 }
 0x1c0   :  { %9001 = vmatprep.mubr.f32.mxu0 %v12306_v32 }
 0x1c3   :  { %9002 = vmatmul.mubr.f32.gmra.mrb[8].mxu0 %v12322_v15 }
 0x1c4   :  { %9004 = vmatprep.mubr.f32.mxu0 %v12329_v45 }
 0x1c7   :  { %9005 = vmatmul.mubr.f32.gmra.mrb[10].mxu0 %v12371_v37 }
 0x1c8   :  { %9007 = vmatprep.mubr.f32.mxu0 %v12381_v62 }
 0x1cb   :  { %9008 = vmatmul.mubr.f32.gmra.mrb[12].mxu0 %v12408_v2 }
 0x1cc   :  { %9010 = vmatprep.mubr.f32.mxu0 %v12415_v63 }
 0x1cf   :  { %9011 = vmatmul.mubr.f32.gmra.mrb[14].mxu0 %v12427_v28 }
 0x1d0   :  { %9013 = vmatprep.mubr.f32.mxu0 %v12436_v24 }
 0x1d3   :  { %9014 = vmatmul.mubr.f32.gmra.mrb[16].mxu0 %v12443_v26  ;;  %v1635_v26 = vld [vmem:[#allocation4 + $0x20] sm:$0xff] }
 0x1d4   :  { %9018 = vmatprep.mubr.f32.mxu0 %v1780_v54  ;;  %v14471_v54 = vand.u32 4294901760, %v12371_v37 }
 0x1d7   :  { %9019 = vmatmul.mubr.f32.vlgmr.msra.gmra.mrb[2].mxu0 %v1790_v1 }
 0x1d8   :  { %9043 = vmatpush3.msra.mxu0 %v12378_v55  ;;  %9021 = vmatprep.mubr.f32.mxu0 %v1800_v12 }
 0x1d9   :  { %9068 = vmatprep.subr.mxu0 %v12336_v25 }
 0x1db   :  { %9022 = vmatmul.mubr.f32.gmra.mrb[4].mxu0 %v1810_v49 }
 0x1dc   :  { %9024 = vmatprep.mubr.f32.mxu0 %v1820_v38 }
 0x1df   :  { %9025 = vmatmul.mubr.f32.gmra.mrb[6].mxu0 %v1830_v33 }
 0x1e0   :  { %9027 = vmatprep.mubr.f32.mxu0 %v1840_v50 }
 0x1e3   :  { %9028 = vmatmul.mubr.f32.gmra.mrb[8].mxu0 %v1850_v29  ;;  %v1631_v29 = vld [vmem:[#allocation4] sm:$0xff] }
 0x1e4   :  { %9030 = vmatprep.mubr.f32.mxu0 %v14470_v16  ;;  %v1638_v16 = vld [vmem:[#allocation4 + $0x38] sm:$0xff] }
 0x1e7   :  { %9031 = vmatmul.mubr.f32.gmra.mrb[10].mxu0 %v14471_v54 }
 0x1e8   :  { %9033 = vmatprep.mubr.f32.mxu0 %v14472_v11 }
 0x1eb   :  { %9034 = vmatmul.mubr.f32.gmra.mrb[12].mxu0 %v14473_v0  ;;  %v1637_v0 = vld [vmem:[#allocation4 + $0x30] sm:$0xff] }
 0x1ec   :  { %9036 = vmatprep.mubr.f32.mxu0 %v1900_v14 }
 0x1ef   :  { %9037 = vmatmul.mubr.f32.gmra.mrb[14].mxu0 %v1910_v3  ;;  %v1633_v3 = vld [vmem:[#allocation4 + $0x10] sm:$0xff] }
 0x1f0   :  { %9039 = vmatprep.mubr.f32.mxu0 %v1920_v53 }
 0x1f3   :  { %9040 = vmatmul.mubr.f32.gmra.mrb[16].mxu0 %v1930_v47 }
 0x1f4   :  { %9044 = vmatprep.mubr.f32.mxu0 %v12151_v60 }
 0x1f7   :  { %9045 = vmatmul.mubr.f32.vlgmr.msra.gmra.mrb[2].mxu0 %v12239_v58 }
 0x1f8   :  { %9069 = vmatpush3.msra.mxu0 %v12336_v25  ;;  %9047 = vmatprep.mubr.f32.mxu0 %v12244_v22 }
 0x1fb   :  { %9048 = vmatmul.mubr.f32.gmra.mrb[4].mxu0 %v12257_v6 }
 0x1fc   :  { %9050 = vmatprep.mubr.f32.mxu0 %v12266_v8 }
 0x1ff   :  { %9051 = vmatmul.mubr.f32.gmra.mrb[6].mxu0 %v12272_v5 }
 0x200   :  { %9053 = vmatprep.mubr.f32.mxu0 %v12280_v7 }
 0x203   :  { %9054 = vmatmul.mubr.f32.gmra.mrb[8].mxu0 %v12299_v36 }
 0x204   :  { %9056 = vmatprep.mubr.f32.mxu0 %v12308_v19 }
 0x207   :  { %9057 = vmatmul.mubr.f32.gmra.mrb[10].mxu0 %v12331_v10 }
 0x208   :  { %9059 = vmatprep.mubr.f32.mxu0 %v12341_v61 }
 0x20b   :  { %9060 = vmatmul.mubr.f32.gmra.mrb[12].mxu0 %v12383_v13 }
 0x20c   :  { %9062 = vmatprep.mubr.f32.mxu0 %v12388_v18 }
 0x20f   :  { %9063 = vmatmul.mubr.f32.gmra.mrb[14].mxu0 %v12410_v39 }
 0x210   :  { %9065 = vmatprep.mubr.f32.mxu0 %v12417_v46 }
 0x213   :  { %9066 = vmatmul.mubr.f32.gmra.mrb[16].mxu0 %v12429_v40 }
 0x214   :  { %9070 = vmatprep.mubr.f32.mxu0 %v12151_v60  ;;  %v1062_v60 = vpop.f32.mrb[2].mxu1 }
 0x217   :  { %9071 = vmatmul.mubr.f32.vlgmr.msra.gmra.mrb[2].mxu0 %v12239_v58  ;;  %v8762_v58 = vpop.f32.mrb[3].mxu1 }
 0x218   :  { %9073 = vmatprep.mubr.f32.mxu0 %v12244_v22  ;;  %v1213_v22 = vpop.f32.mrb[4].mxu1 }
 0x21b   :  { %9074 = vmatmul.mubr.f32.gmra.mrb[4].mxu0 %v12257_v6  ;;  %v1214_v6 = vadd.f32 %v1213_v22, %v1062_v60 }
 0x21c   :  { %9076 = vmatprep.mubr.f32.mxu0 %v12266_v8  ;;  %v8797_v8 = vpop.f32.mrb[5].mxu1 }
 0x21f   :  { %9077 = vmatmul.mubr.f32.gmra.mrb[6].mxu0 %v12272_v5  ;;  %v1317_v5 = vpop.f32.mrb[6].mxu1 }
 0x220   :  { %9079 = vmatprep.mubr.f32.mxu0 %v12280_v7  ;;  %v1318_v7 = vadd.f32 %v1317_v5, %v1214_v6  ;;  %v8832_v1 = vpop.f32.mrb[7].mxu1 }
 0x221   :  { %v1406_v52 = vpop.f32.mrb[8].mxu1 }
 0x222   :  { %v1407_v12 = vadd.f32 %v1406_v52, %v1318_v7  ;;  %v8867_v21 = vpop.f32.mrb[9].mxu1 }
 0x223   :  { %9080 = vmatmul.mubr.f32.gmra.mrb[8].mxu0 %v12299_v36  ;;  %v1525_v44 = vpop.f32.mrb[10].mxu1 }
 0x224   :  { %9082 = vmatprep.mubr.f32.mxu0 %v12308_v19  ;;  %v1526_v36 = vadd.f32 %v1525_v44, %v1407_v12  ;;  %v8902_v32 = vpop.f32.mrb[11].mxu1  ;;  %v1628_v19 = vsub.s32 2, %v12250_v59 }
 0x226   :  { %v1629_v33 = vrot.slane %v12277_v41, %v1628_v19  ;;  %v1632_v41 = vld [vmem:[#allocation4 + $0x8] sm:$0xff] }
 0x227   :  { %9083 = vmatmul.mubr.f32.gmra.mrb[10].mxu0 %v12331_v10 }
 0x228   :  { %9085 = vmatprep.mubr.f32.mxu0 %v12341_v61 }
 0x22b   :  { %9086 = vmatmul.mubr.f32.gmra.mrb[12].mxu0 %v12383_v13  ;;  %v1634_v13 = vld [vmem:[#allocation4 + $0x18] sm:$0xff] }
 0x22c   :  { %9088 = vmatprep.mubr.f32.mxu0 %v12388_v18 }
 0x22e   :  { %v1612_v49 = vpop.f32.mrb[12].mxu1 }
 0x22f   :  { %9089 = vmatmul.mubr.f32.gmra.mrb[14].mxu0 %v12410_v39  ;;  %v1613_v38 = vadd.f32 %v1612_v49, %v1526_v36  ;;  %v8937_v15 = vpop.f32.mrb[13].mxu1  ;;  %v1640_v36 = vld [vmem:[#allocation4 + $0x48] sm:$0xff]  ;;  %v1639_v49 = vld [vmem:[#allocation4 + $0x40] sm:$0xff] }
 0x230   :  { %9091 = vmatprep.mubr.f32.mxu0 %v12417_v46 }
 0x231   :  { %v1630_v50 = vadd.f32 %v1629_v33, %v1613_v38 }
 0x233   :  { %9092 = vmatmul.mubr.f32.gmra.mrb[16].mxu0 %v12429_v40  ;;  %v12564_v45 = vand.u32 4294901760, %v1630_v50  ;;  %v1636_v40 = vld [vmem:[#allocation4 + $0x28] sm:$0xff] }
 0x235   :  { %v12567_v10 = vsub.f32 %v1630_v50, %v12564_v45  ;;  %9250 = vmatprep.subr.mxu0 %v12564_v45 }
 0x236   :  { %9251 = vmatpush3.msra.mxu0 %v12564_v45 }
 0x237   :  { %v12572_v25 = vand.u32 4294901760, %v12567_v10 }
 0x239   :  { %v4412_v61 = vsub.f32 %v12567_v10, %v12572_v25 }
 0x23b   :  { %v12576_v35 = vand.u32 4294901760, %v4412_v61 }
 0x23d   :  { %9276 = vmatprep.subr.mxu0 %v12576_v35 }
 0x2ea   :  { %v9072_v57 = vpop.f32.mrb[2].mxu0 }
 0x2eb   :  { %v2804_v37 = vmul.f32 %v9072_v57, %v1632_v41  ;;  %v2709_v55 = vpop.f32.mrb[3].mxu0 }
 0x2ec   :  { %v2803_v62 = vmul.f32 %v2709_v55, %v1631_v29 }
 0x2ed   :  { %v12579_v18 = vand.u32 4294901760, %v2804_v37 }
 0x2ee   :  { %v12581_v27 = vand.u32 4294901760, %v2803_v62  ;;  %v9075_v2 = vpop.f32.mrb[4].mxu0 }
 0x2ef   :  { %v12584_v39 = vsub.f32 %v2804_v37, %v12579_v18  ;;  %v2806_v63 = vmul.f32 %v9075_v2, %v1634_v13  ;;  %v2721_v46 = vpop.f32.mrb[5].mxu0  ;;  %v1642_v13 = vld [vmem:[#allocation4 + $0x58] sm:$0xff] }
 0x2f0   :  { %v12587_v47 = vsub.f32 %v2803_v62, %v12581_v27  ;;  %v2805_v28 = vmul.f32 %v2721_v46, %v1633_v3 }
 0x2f1   :  { %v2897_v14 = vand.u32 4294901760, %v12584_v39  ;;  %v12590_v24 = vand.u32 4294901760, %v2806_v63 }
 0x2f2   :  { %v12592_v43 = vand.u32 4294901760, %v2805_v28  ;;  %v9078_v53 = vpop.f32.mrb[6].mxu0  ;;  %v2887_v42 = vand.u32 4294901760, %v12587_v47 }
 0x2f3   :  { %v2898_v56 = vsub.f32 %v12584_v39, %v2897_v14  ;;  %v12599_v31 = vsub.f32 %v2806_v63, %v12590_v24  ;;  %v2808_v30 = vmul.f32 %v9078_v53, %v1636_v40  ;;  %v2733_v51 = vpop.f32.mrb[7].mxu0  ;;  %v1641_v63 = vld [vmem:[#allocation4 + $0x50] sm:$0xff] }
 0x2f4   :  { %v12602_v48 = vsub.f32 %v2805_v28, %v12592_v43  ;;  %v2807_v34 = vmul.f32 %v2733_v51, %v1635_v26  ;;  %v2888_v54 = vsub.f32 %v12587_v47, %v2887_v42 }
 0x2f5   :  { %v12607_v11 = vand.u32 4294901760, %v2808_v30  ;;  %v2917_v60 = vand.u32 4294901760, %v12599_v31  ;;  %v2899_v52 = vand.u32 4294901760, %v2898_v56 }
 0x2f6   :  { %v12610_v58 = vand.u32 4294901760, %v2807_v34  ;;  %v9081_v22 = vpop.f32.mrb[8].mxu0  ;;  %v2889_v6 = vand.u32 4294901760, %v2888_v54  ;;  %v2907_v8 = vand.u32 4294901760, %v12602_v48 }
 0x2f7   :  { %v12614_v5 = vsub.f32 %v2808_v30, %v12607_v11  ;;  %v2810_v7 = vmul.f32 %v9081_v22, %v1638_v16  ;;  %v2745_v1 = vpop.f32.mrb[9].mxu0  ;;  %v2918_v12 = vsub.f32 %v12599_v31, %v2917_v60  ;;  %v1644_v22 = vld [vmem:[#allocation4 + $0x68] sm:$0xff] }
 0x2f8   :  { %v12620_v21 = vsub.f32 %v2807_v34, %v12610_v58  ;;  %v2809_v44 = vmul.f32 %v2745_v1, %v1637_v0  ;;  %9096 = vmatprep.mubr.f32.mxu1 %v2889_v6  ;;  %v2908_v32 = vsub.f32 %v12602_v48, %v2907_v8  ;;  %v1643_v1 = vld [vmem:[#allocation4 + $0x60] sm:$0xff] }
 0x2f9   :  { %v12625_v19 = vand.u32 4294901760, %v2810_v7  ;;  %9097 = vmatmul.mubr.f32.vlgmr.msra.gmra.mrb[14].mxu1 %v2899_v52  ;;  %v2937_v38 = vand.u32 4294901760, %v12614_v5  ;;  %v2919_v37 = vand.u32 4294901760, %v2918_v12 }
 0x2fa   :  { %v12628_v33 = vand.u32 4294901760, %v2809_v44  ;;  %9121 = vmatpush3.xpose.msra.mxu1 %v12412_v20  ;;  %v9084_v15 = vpop.f32.mrb[10].mxu0  ;;  %v2909_v50 = vand.u32 4294901760, %v2908_v32  ;;  %v2927_v61 = vand.u32 4294901760, %v12620_v21 }
 0x2fb   :  { %v12633_v41 = vsub.f32 %v2810_v7, %v12625_v19  ;;  %v2812_v29 = vmul.f32 %v9084_v15, %v1640_v36  ;;  %9146 = vmatprep.subr.mxu1 %v12362_v23  ;;  %v2757_v57 = vpop.f32.mrb[11].mxu0  ;;  %v2938_v55 = vsub.f32 %v12614_v5, %v2937_v38 }
 0x2fc   :  { %v12640_v62 = vsub.f32 %v2809_v44, %v12628_v33  ;;  %v2811_v20 = vmul.f32 %v2757_v57, %v1639_v49  ;;  %9099 = vmatprep.mubr.f32.mxu1 %v2909_v50  ;;  %v2928_v3 = vsub.f32 %v12620_v21, %v2927_v61 }
 0x2fd   :  { %v12645_v2 = vand.u32 4294901760, %v2812_v29  ;;  %9100 = vmatmul.mubr.f32.gmra.mrb[16].mxu1 %v2919_v37  ;;  %v2957_v46 = vand.u32 4294901760, %v12633_v41  ;;  %v2939_v34 = vand.u32 4294901760, %v2938_v55 }
 0x2fe   :  { %v12648_v28 = vand.u32 4294901760, %v2811_v20  ;;  %v9087_v40 = vpop.f32.mrb[12].mxu0  ;;  %v2929_v26 = vand.u32 4294901760, %v2928_v3  ;;  %v2947_v53 = vand.u32 4294901760, %v12640_v62 }
 0x2ff   :  { %v12652_v56 = vsub.f32 %v2812_v29, %v12645_v2  ;;  %v2814_v30 = vmul.f32 %v9087_v40, %v1642_v13  ;;  %v2769_v51 = vpop.f32.mrb[13].mxu0  ;;  %v2958_v16 = vsub.f32 %v12633_v41, %v2957_v46 }
 0x300   :  { %v12658_v54 = vsub.f32 %v2811_v20, %v12648_v28  ;;  %v2813_v0 = vmul.f32 %v2769_v51, %v1641_v63  ;;  %9102 = vmatprep.mubr.f32.mxu1 %v2929_v26  ;;  %v2948_v6 = vsub.f32 %v12640_v62, %v2947_v53  ;;  %v1646_v20 = vld [vmem:[#allocation4 + $0x78] sm:$0xff]  ;;  %v1645_v63 = vld [vmem:[#allocation4 + $0x70] sm:$0xff] }
 0x301   :  { %v12663_v7 = vand.u32 4294901760, %v2814_v30  ;;  %9103 = vmatmul.mubr.f32.gmra.mrb[18].mxu1 %v2939_v34  ;;  %v2977_v52 = vand.u32 4294901760, %v12652_v56  ;;  %v2959_v29 = vand.u32 4294901760, %v2958_v16 }
 0x302   :  { %v12666_v12 = vand.u32 4294901760, %v2813_v0  ;;  %v9090_v44 = vpop.f32.mrb[14].mxu0  ;;  %v2949_v36 = vand.u32 4294901760, %v2948_v6  ;;  %v2967_v32 = vand.u32 4294901760, %v12658_v54 }
 0x303   :  { %v12670_v49 = vsub.f32 %v2814_v30, %v12663_v7  ;;  %v2816_v15 = vmul.f32 %v9090_v44, %v1644_v22  ;;  %v2781_v50 = vpop.f32.mrb[15].mxu0  ;;  %v2978_v57 = vsub.f32 %v12652_v56, %v2977_v52 }
 0x304   :  { %v12676_v37 = vsub.f32 %v2813_v0, %v12666_v12  ;;  %v2815_v55 = vmul.f32 %v2781_v50, %v1643_v1  ;;  %9105 = vmatprep.mubr.f32.mxu1 %v2949_v36  ;;  %v2968_v13 = vsub.f32 %v12658_v54, %v2967_v32 }
 0x305   :  { %v12681_v3 = vand.u32 4294901760, %v2816_v15  ;;  %9106 = vmatmul.mubr.f32.gmra.mrb[20].mxu1 %v2959_v29  ;;  %v14403_v40 = vand.u32 4294901760, %v12670_v49  ;;  %v2979_v6 = vand.u32 4294901760, %v2978_v57 }
 0x306   :  { %v12684_v26 = vand.u32 4294901760, %v2815_v55  ;;  %v9093_v30 = vpop.f32.mrb[16].mxu0  ;;  %v2969_v51 = vand.u32 4294901760, %v2968_v13  ;;  %v2987_v34 = vand.u32 4294901760, %v12676_v37 }
 0x307   :  { %v12688_v16 = vsub.f32 %v2816_v15, %v12681_v3  ;;  %v2818_v0 = vmul.f32 %v9093_v30, %v1646_v20  ;;  %v2793_v22 = vpop.f32.mrb[17].mxu0  ;;  %v2998_v1 = vsub.f32 %v12670_v49, %v14403_v40 }
 0x308   :  { %v12694_v44 = vsub.f32 %v2815_v55, %v12684_v26  ;;  %v2817_v36 = vmul.f32 %v2793_v22, %v1645_v63  ;;  %9108 = vmatprep.mubr.f32.mxu1 %v2969_v51  ;;  %v2988_v50 = vsub.f32 %v12676_v37, %v2987_v34 }
 0x309   :  { %v12699_v29 = vand.u32 4294901760, %v2818_v0  ;;  %9109 = vmatmul.mubr.f32.gmra.mrb[22].mxu1 %v2979_v6  ;;  %v14404_v15 = vand.u32 4294901760, %v12688_v16  ;;  %v2999_v55 = vand.u32 4294901760, %v2998_v1 }
 0x30a   :  { %v12702_v20 = vand.u32 4294901760, %v2817_v36  ;;  %v2989_v57 = vand.u32 4294901760, %v2988_v50  ;;  %v3007_v13 = vand.u32 4294901760, %v12694_v44 }
 0x30b   :  { %v12706_v30 = vsub.f32 %v2818_v0, %v12699_v29  ;;  %v3018_v63 = vsub.f32 %v12688_v16, %v14404_v15 }
 0x30c   :  { %v12712_v51 = vsub.f32 %v2817_v36, %v12702_v20  ;;  %9111 = vmatprep.mubr.f32.mxu1 %v2989_v57  ;;  %v3008_v22 = vsub.f32 %v12694_v44, %v3007_v13 }
 0x30d   :  { %9112 = vmatmul.mubr.f32.gmra.mrb[24].mxu1 %v2999_v55  ;;  %v3037_v6 = vand.u32 4294901760, %v12706_v30  ;;  %v3019_v40 = vand.u32 4294901760, %v3018_v63 }
 0x30e   :  { %v3009_v50 = vand.u32 4294901760, %v3008_v22  ;;  %v3027_v0 = vand.u32 4294901760, %v12712_v51 }
 0x30f   :  { %v3038_v1 = vsub.f32 %v12706_v30, %v3037_v6 }
 0x310   :  { %9114 = vmatprep.mubr.f32.mxu1 %v3009_v50  ;;  %v3028_v36 = vsub.f32 %v12712_v51, %v3027_v0 }
 0x311   :  { %9115 = vmatmul.mubr.f32.gmra.mrb[26].mxu1 %v3019_v40  ;;  %v3039_v15 = vand.u32 4294901760, %v3038_v1 }
 0x312   :  { %v3029_v57 = vand.u32 4294901760, %v3028_v36 }
 0x314   :  { %9117 = vmatprep.mubr.f32.mxu1 %v3029_v57 }
 0x315   :  { %9118 = vmatmul.mubr.f32.gmra.mrb[28].mxu1 %v3039_v15 }
 0x316   :  { %9122 = vmatprep.mubr.f32.mxu1 %v12581_v27 }
 0x319   :  { %9123 = vmatmul.mubr.f32.vlgmr.msra.gmra.mrb[14].mxu1 %v12579_v18 }
 0x31a   :  { %9147 = vmatpush3.xpose.msra.mxu1 %v12362_v23  ;;  %9125 = vmatprep.mubr.f32.mxu1 %v12592_v43  ;;  %v14474_v23 = vand.u32 4294901760, %v12670_v49 }
 0x31b   :  { %9172 = vmatprep.subr.mxu1 %v12343_v9 }
 0x31d   :  { %9126 = vmatmul.mubr.f32.gmra.mrb[16].mxu1 %v12590_v24 }
 0x31e   :  { %9128 = vmatprep.mubr.f32.mxu1 %v12610_v58 }
 0x321   :  { %9129 = vmatmul.mubr.f32.gmra.mrb[18].mxu1 %v12607_v11 }
 0x322   :  { %9131 = vmatprep.mubr.f32.mxu1 %v12628_v33 }
 0x325   :  { %9132 = vmatmul.mubr.f32.gmra.mrb[20].mxu1 %v12625_v19 }
 0x326   :  { %9134 = vmatprep.mubr.f32.mxu1 %v12648_v28 }
 0x329   :  { %9135 = vmatmul.mubr.f32.gmra.mrb[22].mxu1 %v12645_v2 }
 0x32a   :  { %9137 = vmatprep.mubr.f32.mxu1 %v12666_v12 }
 0x32d   :  { %9138 = vmatmul.mubr.f32.gmra.mrb[24].mxu1 %v12663_v7 }
 0x32e   :  { %9140 = vmatprep.mubr.f32.mxu1 %v12684_v26 }
 0x331   :  { %9141 = vmatmul.mubr.f32.gmra.mrb[26].mxu1 %v12681_v3 }
 0x332   :  { %9143 = vmatprep.mubr.f32.mxu1 %v12702_v20 }
 0x335   :  { %9144 = vmatmul.mubr.f32.gmra.mrb[28].mxu1 %v12699_v29 }
 0x336   :  { %9148 = vmatprep.mubr.f32.mxu1 %v12587_v47 }
 0x339   :  { %9149 = vmatmul.mubr.f32.vlgmr.msra.gmra.mrb[14].mxu1 %v12584_v39  ;;  %v14476_v39 = vmov 0.0|0.0  }
 0x33a   :  { %9173 = vmatpush3.xpose.msra.mxu1 %v12343_v9  ;;  %9151 = vmatprep.mubr.f32.mxu1 %v12602_v48 }
 0x33b   :  { %9198 = vmatprep.subr.mxu1 %v12386_v4 }
 0x33d   :  { %9152 = vmatmul.mubr.f32.gmra.mrb[16].mxu1 %v12599_v31 }
 0x33e   :  { %9154 = vmatprep.mubr.f32.mxu1 %v12620_v21 }
 0x341   :  { %9155 = vmatmul.mubr.f32.gmra.mrb[18].mxu1 %v12614_v5 }
 0x342   :  { %9157 = vmatprep.mubr.f32.mxu1 %v12640_v62 }
 0x345   :  { %9158 = vmatmul.mubr.f32.gmra.mrb[20].mxu1 %v12633_v41 }
 0x346   :  { %9160 = vmatprep.mubr.f32.mxu1 %v12658_v54 }
 0x349   :  { %9161 = vmatmul.mubr.f32.gmra.mrb[22].mxu1 %v12652_v56 }
 0x34a   :  { %9163 = vmatprep.mubr.f32.mxu1 %v12676_v37 }
 0x34d   :  { %9164 = vmatmul.mubr.f32.gmra.mrb[24].mxu1 %v12670_v49 }
 0x34e   :  { %9166 = vmatprep.mubr.f32.mxu1 %v12694_v44 }
 0x351   :  { %9167 = vmatmul.mubr.f32.gmra.mrb[26].mxu1 %v12688_v16 }
 0x352   :  { %9169 = vmatprep.mubr.f32.mxu1 %v12712_v51 }
 0x355   :  { %9170 = vmatmul.mubr.f32.gmra.mrb[28].mxu1 %v12706_v30 }
 0x356   :  { %9174 = vmatprep.mubr.f32.mxu1 %v2887_v42 }
 0x359   :  { %9175 = vmatmul.mubr.f32.vlgmr.msra.gmra.mrb[14].mxu1 %v2897_v14 }
 0x35a   :  { %9199 = vmatpush3.xpose.msra.mxu1 %v12386_v4  ;;  %9177 = vmatprep.mubr.f32.mxu1 %v2907_v8  ;;  %v14475_v4 = vand.u32 4294901760, %v12688_v16 }
 0x35b   :  { %9224 = vmatprep.subr.mxu1 %v12343_v9 }
 0x35d   :  { %9178 = vmatmul.mubr.f32.gmra.mrb[16].mxu1 %v2917_v60 }
 0x35e   :  { %9180 = vmatprep.mubr.f32.mxu1 %v2927_v61 }
 0x361   :  { %9181 = vmatmul.mubr.f32.gmra.mrb[18].mxu1 %v2937_v38 }
 0x362   :  { %9183 = vmatprep.mubr.f32.mxu1 %v2947_v53 }
 0x365   :  { %9184 = vmatmul.mubr.f32.gmra.mrb[20].mxu1 %v2957_v46 }
 0x366   :  { %9186 = vmatprep.mubr.f32.mxu1 %v2967_v32 }
 0x369   :  { %9187 = vmatmul.mubr.f32.gmra.mrb[22].mxu1 %v2977_v52 }
 0x36a   :  { %9189 = vmatprep.mubr.f32.mxu1 %v2987_v34 }
 0x36d   :  { %9190 = vmatmul.mubr.f32.gmra.mrb[24].mxu1 %v14474_v23 }
 0x36e   :  { %9192 = vmatprep.mubr.f32.mxu1 %v3007_v13 }
 0x371   :  { %9193 = vmatmul.mubr.f32.gmra.mrb[26].mxu1 %v14475_v4 }
 0x372   :  { %9195 = vmatprep.mubr.f32.mxu1 %v3027_v0 }
 0x375   :  { %9196 = vmatmul.mubr.f32.gmra.mrb[28].mxu1 %v3037_v6 }
 0x376   :  { %9200 = vmatprep.mubr.f32.mxu1 %v12581_v27 }
 0x379   :  { %9201 = vmatmul.mubr.f32.vlgmr.msra.gmra.mrb[14].mxu1 %v12579_v18 }
 0x37a   :  { %9225 = vmatpush3.xpose.msra.mxu1 %v12343_v9  ;;  %9203 = vmatprep.mubr.f32.mxu1 %v12592_v43 }
 0x37b   :  { %10582 = vmatprep.subr.bf16.mxu1 %v14476_v39 }
 0x37d   :  { %9204 = vmatmul.mubr.f32.gmra.mrb[16].mxu1 %v12590_v24 }
 0x37e   :  { %9206 = vmatprep.mubr.f32.mxu1 %v12610_v58 }
 0x381   :  { %9207 = vmatmul.mubr.f32.gmra.mrb[18].mxu1 %v12607_v11 }
 0x382   :  { %9209 = vmatprep.mubr.f32.mxu1 %v12628_v33 }
 0x385   :  { %9210 = vmatmul.mubr.f32.gmra.mrb[20].mxu1 %v12625_v19 }
 0x386   :  { %9212 = vmatprep.mubr.f32.mxu1 %v12648_v28 }
 0x389   :  { %9213 = vmatmul.mubr.f32.gmra.mrb[22].mxu1 %v12645_v2 }
 0x38a   :  { %9215 = vmatprep.mubr.f32.mxu1 %v12666_v12 }
 0x38d   :  { %9216 = vmatmul.mubr.f32.gmra.mrb[24].mxu1 %v12663_v7 }
 0x38e   :  { %9218 = vmatprep.mubr.f32.mxu1 %v12684_v26 }
 0x391   :  { %9219 = vmatmul.mubr.f32.gmra.mrb[26].mxu1 %v12681_v3 }
 0x392   :  { %9221 = vmatprep.mubr.f32.mxu1 %v12702_v20 }
 0x395   :  { %9222 = vmatmul.mubr.f32.gmra.mrb[28].mxu1 %v12699_v29 }
 0x396   :  { %9226 = vmatprep.mubr.f32.mxu1 %v12581_v27 }
 0x399   :  { %9227 = vmatmul.mubr.f32.vlgmr.msra.gmra.mrb[14].mxu1 %v12579_v18 }
 0x39a   :  { %9229 = vmatprep.mubr.f32.mxu1 %v12592_v43 }
 0x39d   :  { %9230 = vmatmul.mubr.f32.gmra.mrb[16].mxu1 %v12590_v24 }
 0x39e   :  { %9232 = vmatprep.mubr.f32.mxu1 %v12610_v58 }
 0x3a1   :  { %9233 = vmatmul.mubr.f32.gmra.mrb[18].mxu1 %v12607_v11 }
 0x3a2   :  { %9235 = vmatprep.mubr.f32.mxu1 %v12628_v33 }
 0x3a5   :  { %9236 = vmatmul.mubr.f32.gmra.mrb[20].mxu1 %v12625_v19 }
 0x3a6   :  { %9238 = vmatprep.mubr.f32.mxu1 %v12648_v28 }
 0x3a9   :  { %9239 = vmatmul.mubr.f32.gmra.mrb[22].mxu1 %v12645_v2 }
 0x3aa   :  { %9241 = vmatprep.mubr.f32.mxu1 %v12666_v12 }
 0x3ad   :  { %9242 = vmatmul.mubr.f32.gmra.mrb[24].mxu1 %v12663_v7 }
 0x3ae   :  { %9244 = vmatprep.mubr.f32.mxu1 %v12684_v26 }
 0x3b1   :  { %9245 = vmatmul.mubr.f32.gmra.mrb[26].mxu1 %v12681_v3 }
 0x3b2   :  { %9247 = vmatprep.mubr.f32.mxu1 %v12702_v20 }
 0x3b5   :  { %9248 = vmatmul.mubr.f32.gmra.mrb[28].mxu1 %v12699_v29 }
 0x3b6   :  { %9438 = vmatprep.mubr.msk.f32.mxu1 %vm11623_vm0, %v14445_v17 }
 0x46c   :  { %v9228_v9 = vpop.f32.mrb[14].mxu1 }
 0x46d   :  { %v3816_v18 = vpop.f32.mrb[15].mxu1  ;;  %v3913_v24 = vsel %vm1663_vm1, %v9228_v9, -inf }
 0x46e   :  { %v3910_v27 = vsel %vm1663_vm1, %v3816_v18, -inf }
 0x46f   :  { %3911 = vmax.xlane.f32.xlu0 %v3910_v27 }
 0x470   :  { %v9231_v47 = vpop.f32.mrb[16].mxu1 }
 0x471   :  { %v3828_v14 = vpop.f32.mrb[17].mxu1  ;;  %v3919_v48 = vsel %vm1663_vm1, %v9231_v47, -inf }
 0x472   :  { %v3916_v43 = vsel %vm1663_vm1, %v3828_v14, -inf }
 0x473   :  { %3914 = vmax.xlane.f32.xlu0 %v3913_v24  ;;  %3917 = vmax.xlane.f32.xlu1 %v3916_v43 }
 0x474   :  { %v12830_v42 = vpop.f32.mrb[18].mxu1 }
 0x475   :  { %v3840_v31 = vpop.f32.mrb[19].mxu1  ;;  %v3925_v8 = vsel %vm1663_vm1, %v12830_v42, -inf }
 0x476   :  { %v3922_v11 = vsel %vm1663_vm1, %v3840_v31, -inf }
 0x477   :  { %3920 = vmax.xlane.f32.xlu1 %v3919_v48  ;;  %3923 = vmax.xlane.f32.xlu0 %v3922_v11 }
 0x478   :  { %v12834_v60 = vpop.f32.mrb[20].mxu1 }
 0x479   :  { %v3852_v58 = vpop.f32.mrb[21].mxu1  ;;  %v3931_v38 = vsel %vm1663_vm1, %v12834_v60, -inf }
 0x47a   :  { %v3928_v5 = vsel %vm1663_vm1, %v3852_v58, -inf }
 0x47b   :  { %3926 = vmax.xlane.f32.xlu1 %v3925_v8  ;;  %3929 = vmax.xlane.f32.xlu0 %v3928_v5 }
 0x47c   :  { %v12839_v21 = vpop.f32.mrb[22].mxu1 }
 0x47d   :  { %v3864_v19 = vpop.f32.mrb[23].mxu1  ;;  %v3937_v62 = vsel %vm1663_vm1, %v12839_v21, -inf }
 0x47e   :  { %v3934_v33 = vsel %vm1663_vm1, %v3864_v19, -inf }
 0x47f   :  { %3932 = vmax.xlane.f32.xlu1 %v3931_v38  ;;  %3935 = vmax.xlane.f32.xlu0 %v3934_v33 }
 0x480   :  { %v12844_v61 = vpop.f32.mrb[24].mxu1 }
 0x481   :  { %v12846_v41 = vpop.f32.mrb[25].mxu1  ;;  %v3943_v53 = vsel %vm1663_vm1, %v12844_v61, -inf }
 0x482   :  { %v3940_v2 = vsel %vm1663_vm1, %v12846_v41, -inf }
 0x483   :  { %3938 = vmax.xlane.f32.xlu1 %v3937_v62  ;;  %3941 = vmax.xlane.f32.xlu0 %v3940_v2 }
 0x484   :  { %v12852_v46 = vpop.f32.mrb[26].mxu1 }
 0x485   :  { %v12854_v28 = vpop.f32.mrb[27].mxu1  ;;  %v3949_v52 = vsel %vm1663_vm1, %v12852_v46, -inf }
 0x486   :  { %v3946_v56 = vsel %vm1663_vm1, %v12854_v28, -inf }
 0x487   :  { %3944 = vmax.xlane.f32.xlu1 %v3943_v53  ;;  %3947 = vmax.xlane.f32.xlu0 %v3946_v56 }
 0x488   :  { %v12860_v54 = vpop.f32.mrb[28].mxu1 }
 0x489   :  { %v12862_v7 = vpop.f32.mrb[29].mxu1  ;;  %v3955_v32 = vsel %vm1663_vm1, %v12860_v54, -inf }
 0x48a   :  { %v3952_v12 = vsel %vm1663_vm1, %v12862_v7, -inf }
 0x48b   :  { %3950 = vmax.xlane.f32.xlu1 %v3949_v52  ;;  %3953 = vmax.xlane.f32.xlu0 %v3952_v12 }
 0x48f   :  { %3956 = vmax.xlane.f32.xlu1 %v3955_v32 }
 0x4fc   :  { %v3912_v49 = vpop.xlane.xlu0 %3911 }
 0x4fd   :  { %v3958_v37 = vsub.f32 %v3816_v18, %v3912_v49 }
 0x4ff   :  { %v3974_v3 = vmul.f32 1.442695, %v3958_v37 }
 0x500   :  { %v3915_v40 = vpop.xlane.xlu0 %3914  ;;  %v3918_v26 = vpop.xlane.xlu1 %3917 }
 0x501   :  { %11460 = vpow2.f32 %v3974_v3  ;;  %v3959_v34 = vsub.f32 %v9228_v9, %v3915_v40  ;;  %v3960_v16 = vsub.f32 %v3828_v14, %v3918_v26 }
 0x503   :  { %v3976_v44 = vmul.f32 1.442695, %v3959_v34  ;;  %v3978_v29 = vmul.f32 1.442695, %v3960_v16 }
 0x504   :  { %v3921_v15 = vpop.xlane.xlu1 %3920  ;;  %v3924_v20 = vpop.xlane.xlu0 %3923 }
 0x505   :  { %11462 = vpow2.f32 %v3976_v44  ;;  %v3961_v13 = vsub.f32 %v9231_v47, %v3921_v15  ;;  %v3962_v30 = vsub.f32 %v3840_v31, %v3924_v20 }
 0x506   :  { %11464 = vpow2.f32 %v3978_v29 }
 0x507   :  { %v3980_v55 = vmul.f32 1.442695, %v3961_v13  ;;  %v3982_v63 = vmul.f32 1.442695, %v3962_v30 }
 0x508   :  { %v3927_v51 = vpop.xlane.xlu1 %3926  ;;  %v3930_v22 = vpop.xlane.xlu0 %3929 }
 0x509   :  { %11466 = vpow2.f32 %v3980_v55  ;;  %v3963_v6 = vsub.f32 %v12830_v42, %v3927_v51  ;;  %v3964_v50 = vsub.f32 %v3852_v58, %v3930_v22 }
 0x50a   :  { %11468 = vpow2.f32 %v3982_v63 }
 0x50b   :  { %v12871_v0 = vpop.eup %11460  ;;  %v3984_v1 = vmul.f32 1.442695, %v3963_v6  ;;  %v3986_v36 = vmul.f32 1.442695, %v3964_v50 }
 0x50c   :  { %v3933_v57 = vpop.xlane.xlu1 %3932  ;;  %v3936_v23 = vpop.xlane.xlu0 %3935  ;;  %v4006_v4 = vsel %vm1663_vm1, %v12871_v0, 0.0 }
 0x50d   :  { %11470 = vpow2.f32 %v3984_v1  ;;  %v3965_v9 = vsub.f32 %v12834_v60, %v3933_v57  ;;  %v3966_v18 = vsub.f32 %v3864_v19, %v3936_v23  ;;  %4007 = vadd.xlane.f32.xlu0 %v4006_v4 }
 0x50e   :  { %11472 = vpow2.f32 %v3986_v36 }
 0x50f   :  { %v12876_v27 = vpop.eup %11462  ;;  %v3988_v47 = vmul.f32 1.442695, %v3965_v9  ;;  %v3990_v14 = vmul.f32 1.442695, %v3966_v18 }
 0x510   :  { %v12878_v24 = vpop.eup %11464  ;;  %v3939_v43 = vpop.xlane.xlu1 %3938  ;;  %v4009_v31 = vsel %vm1663_vm1, %v12876_v27, 0.0 }
 0x511   :  { %v3942_v42 = vpop.xlane.xlu0 %3941  ;;  %11474 = vpow2.f32 %v3988_v47  ;;  %v3967_v48 = vsub.f32 %v12839_v21, %v3939_v43  ;;  %4010 = vadd.xlane.f32.xlu1 %v4009_v31  ;;  %v4012_v60 = vsel %vm1663_vm1, %v12878_v24, 0.0 }
 0x512   :  { %v3968_v11 = vsub.f32 %v12846_v41, %v3942_v42  ;;  %11476 = vpow2.f32 %v3990_v14  ;;  %4013 = vadd.xlane.f32.xlu0 %v4012_v60 }
 0x513   :  { %v12886_v58 = vpop.eup %11466  ;;  %v3992_v8 = vmul.f32 1.442695, %v3967_v48 }
 0x514   :  { %v3994_v5 = vmul.f32 1.442695, %v3968_v11  ;;  %v12888_v19 = vpop.eup %11468  ;;  %v3945_v38 = vpop.xlane.xlu1 %3944  ;;  %v4015_v62 = vsel %vm1663_vm1, %v12886_v58, 0.0 }
 0x515   :  { %v3948_v33 = vpop.xlane.xlu0 %3947  ;;  %11478 = vpow2.f32 %v3992_v8  ;;  %v3969_v21 = vsub.f32 %v12844_v61, %v3945_v38  ;;  %4016 = vadd.xlane.f32.xlu1 %v4015_v62  ;;  %v4018_v2 = vsel %vm1663_vm1, %v12888_v19, 0.0 }
 0x516   :  { %v3970_v41 = vsub.f32 %v12854_v28, %v3948_v33  ;;  %11480 = vpow2.f32 %v3994_v5  ;;  %4019 = vadd.xlane.f32.xlu0 %v4018_v2 }
 0x517   :  { %v12896_v53 = vpop.eup %11470  ;;  %v3996_v56 = vmul.f32 1.442695, %v3969_v21 }
 0x518   :  { %v3998_v52 = vmul.f32 1.442695, %v3970_v41  ;;  %v12898_v12 = vpop.eup %11472  ;;  %v3951_v32 = vpop.xlane.xlu1 %3950  ;;  %v4021_v37 = vsel %vm1663_vm1, %v12896_v53, 0.0 }
 0x519   :  { %v3954_v49 = vpop.xlane.xlu0 %3953  ;;  %11482 = vpow2.f32 %v3996_v56  ;;  %v3971_v61 = vsub.f32 %v12852_v46, %v3951_v32  ;;  %4022 = vadd.xlane.f32.xlu1 %v4021_v37  ;;  %v4024_v3 = vsel %vm1663_vm1, %v12898_v12, 0.0 }
 0x51a   :  { %v3972_v28 = vsub.f32 %v12862_v7, %v3954_v49  ;;  %11484 = vpow2.f32 %v3998_v52  ;;  %4025 = vadd.xlane.f32.xlu0 %v4024_v3 }
 0x51b   :  { %v12906_v40 = vpop.eup %11474  ;;  %v4000_v26 = vmul.f32 1.442695, %v3971_v61 }
 0x51c   :  { %v4002_v34 = vmul.f32 1.442695, %v3972_v28  ;;  %v12908_v16 = vpop.eup %11476  ;;  %v3957_v44 = vpop.xlane.xlu1 %3956  ;;  %v4027_v29 = vsel %vm1663_vm1, %v12906_v40, 0.0 }
 0x51d   :  { %11486 = vpow2.f32 %v4000_v26  ;;  %v3973_v46 = vsub.f32 %v12860_v54, %v3957_v44  ;;  %4028 = vadd.xlane.f32.xlu1 %v4027_v29  ;;  %v4030_v7 = vsel %vm1663_vm1, %v12908_v16, 0.0 }
 0x51e   :  { %11488 = vpow2.f32 %v4002_v34  ;;  %4031 = vadd.xlane.f32.xlu0 %v4030_v7 }
 0x51f   :  { %v12915_v15 = vpop.eup %11478  ;;  %v4004_v20 = vmul.f32 1.442695, %v3973_v46 }
 0x520   :  { %v12917_v13 = vpop.eup %11480  ;;  %v4033_v30 = vsel %vm1663_vm1, %v12915_v15, 0.0 }
 0x521   :  { %11490 = vpow2.f32 %v4004_v20  ;;  %4034 = vadd.xlane.f32.xlu1 %v4033_v30  ;;  %v4036_v55 = vsel %vm1663_vm1, %v12917_v13, 0.0 }
 0x522   :  { %4037 = vadd.xlane.f32.xlu0 %v4036_v55 }
 0x523   :  { %v12923_v54 = vpop.eup %11482 }
 0x524   :  { %v12925_v63 = vpop.eup %11484  ;;  %v4039_v51 = vsel %vm1663_vm1, %v12923_v54, 0.0 }
 0x525   :  { %4040 = vadd.xlane.f32.xlu1 %v4039_v51  ;;  %v4042_v22 = vsel %vm1663_vm1, %v12925_v63, 0.0 }
 0x526   :  { %4043 = vadd.xlane.f32.xlu0 %v4042_v22 }
 0x527   :  { %v12931_v6 = vpop.eup %11486 }
 0x528   :  { %v12933_v50 = vpop.eup %11488  ;;  %v4045_v1 = vsel %vm1663_vm1, %v12931_v6, 0.0 }
 0x529   :  { %4046 = vadd.xlane.f32.xlu1 %v4045_v1  ;;  %v4048_v36 = vsel %vm1663_vm1, %v12933_v50, 0.0 }
 0x52a   :  { %4049 = vadd.xlane.f32.xlu0 %v4048_v36 }
 0x52b   :  { %v12939_v57 = vpop.eup %11490 }
 0x52c   :  { %v4051_v23 = vsel %vm1663_vm1, %v12939_v57, 0.0 }
 0x52d   :  { %4052 = vadd.xlane.f32.xlu1 %v4051_v23 }
 0x59a   :  { %v4008_v4 = vpop.xlane.xlu0 %4007 }
 0x59b   :  { %11492 = vrcp.f32 %v4008_v4 }
 0x59e   :  { %v4011_v9 = vpop.xlane.xlu1 %4010 }
 0x59f   :  { %11494 = vrcp.f32 %v4011_v9  ;;  %v4014_v18 = vpop.xlane.xlu0 %4013 }
 0x5a0   :  { %11496 = vrcp.f32 %v4014_v18 }
 0x5a2   :  { %v4017_v47 = vpop.xlane.xlu1 %4016 }
 0x5a3   :  { %11498 = vrcp.f32 %v4017_v47  ;;  %v4020_v14 = vpop.xlane.xlu0 %4019 }
 0x5a4   :  { %11500 = vrcp.f32 %v4020_v14 }
 0x5a5   :  { %v11493_v43 = vpop.eup %11492 }
 0x5a6   :  { %v4070_v42 = vmul.f32 %v11493_v43, %v4008_v4  ;;  %v4023_v31 = vpop.xlane.xlu1 %4022 }
 0x5a7   :  { %11502 = vrcp.f32 %v4023_v31  ;;  %v4026_v48 = vpop.xlane.xlu0 %4025 }
 0x5a8   :  { %v4086_v11 = vsub.f32 2.0, %v4070_v42  ;;  %11504 = vrcp.f32 %v4026_v48 }
 0x5a9   :  { %v11495_v60 = vpop.eup %11494 }
 0x5aa   :  { %v11497_v8 = vpop.eup %11496  ;;  %v4102_v5 = vmul.f32 %v11493_v43, %v4086_v11  ;;  %v4071_v38 = vmul.f32 %v11495_v60, %v4011_v9  ;;  %v4029_v33 = vpop.xlane.xlu1 %4028 }
 0x5ab   :  { %v4072_v62 = vmul.f32 %v11497_v8, %v4014_v18  ;;  %11506 = vrcp.f32 %v4029_v33  ;;  %v4032_v21 = vpop.xlane.xlu0 %4031 }
 0x5ac   :  { %v4118_v41 = vmul.f32 %v12871_v0, %v4102_v5  ;;  %v4087_v2 = vsub.f32 2.0, %v4071_v38  ;;  %11508 = vrcp.f32 %v4032_v21 }
 0x5ad   :  { %v11499_v56 = vpop.eup %11498  ;;  %v4088_v52 = vsub.f32 2.0, %v4072_v62 }
 0x5ae   :  { %v11501_v32 = vpop.eup %11500  ;;  %v4135_v49 = vsel %vm1663_vm1, %v4118_v41, 0  ;;  %v4103_v37 = vmul.f32 %v11495_v60, %v4087_v2  ;;  %v4073_v61 = vmul.f32 %v11499_v56, %v4017_v47  ;;  %v4035_v28 = vpop.xlane.xlu1 %4034 }
 0x5af   :  { %v12945_v3 = vand.u32 4294901760, %v4135_v49  ;;  %v4104_v26 = vmul.f32 %v11497_v8, %v4088_v52  ;;  %v4074_v34 = vmul.f32 %v11501_v32, %v4020_v14  ;;  %11510 = vrcp.f32 %v4035_v28  ;;  %v4038_v44 = vpop.xlane.xlu0 %4037 }
 0x5b0   :  { %v4119_v29 = vmul.f32 %v12876_v27, %v4103_v37  ;;  %v4089_v46 = vsub.f32 2.0, %v4073_v61  ;;  %11512 = vrcp.f32 %v4038_v44 }
 0x5b1   :  { %v11503_v0 = vpop.eup %11502  ;;  %v4120_v7 = vmul.f32 %v12878_v24, %v4104_v26  ;;  %v4090_v20 = vsub.f32 2.0, %v4074_v34  ;;  %v12951_v36 = vsub.f32 %v4135_v49, %v12945_v3 }
 0x5b2   :  { %v11505_v30 = vpop.eup %11504  ;;  %v4138_v55 = vsel %vm1663_vm1, %v4119_v29, 0  ;;  %v4105_v51 = vmul.f32 %v11499_v56, %v4089_v46  ;;  %v4075_v22 = vmul.f32 %v11503_v0, %v4023_v31  ;;  %v4041_v1 = vpop.xlane.xlu1 %4040 }
 0x5b3   :  { %v12953_v23 = vand.u32 4294901760, %v4138_v55  ;;  %v4141_v4 = vsel %vm1663_vm1, %v4120_v7, 0  ;;  %v4106_v27 = vmul.f32 %v11501_v32, %v4090_v20  ;;  %v4076_v9 = vmul.f32 %v11505_v30, %v4026_v48  ;;  %v4044_v18 = vpop.xlane.xlu0 %4043 }
 0x5b4   :  { %v12956_v47 = vand.u32 4294901760, %v4141_v4  ;;  %v4121_v24 = vmul.f32 %v12886_v58, %v4105_v51  ;;  %v4091_v14 = vsub.f32 2.0, %v4075_v22  ;;  %11514 = vrcp.f32 %v4041_v1 }
 0x5b5   :  { %v11507_v43 = vpop.eup %11506  ;;  %v12960_v42 = vsub.f32 %v4138_v55, %v12953_v23  ;;  %v4122_v31 = vmul.f32 %v12888_v19, %v4106_v27  ;;  %v4092_v11 = vsub.f32 2.0, %v4076_v9  ;;  %11516 = vrcp.f32 %v4044_v18 }
 0x5b6   :  { %v11509_v60 = vpop.eup %11508  ;;  %v4144_v8 = vsel %vm1663_vm1, %v4121_v24, 0  ;;  %v4107_v5 = vmul.f32 %v11503_v0, %v4091_v14  ;;  %v4077_v48 = vmul.f32 %v11507_v43, %v4029_v33  ;;  %v12964_v38 = vpop.xlane.xlu1 %4046  ;;  %v4250_v62 = vand.u32 4294901760, %v12951_v36 }
 0x5b7   :  { %v4260_v58 = vand.u32 4294901760, %v12960_v42  ;;  %v12968_v41 = vand.u32 4294901760, %v4144_v8  ;;  %v4147_v2 = vsel %vm1663_vm1, %v4122_v31, 0  ;;  %v4108_v56 = vmul.f32 %v11505_v30, %v4092_v11  ;;  %v12974_v37 = vpop.xlane.xlu0 %4049 }
 0x5b8   :  { %v12971_v52 = vand.u32 4294901760, %v4147_v2  ;;  %v4123_v19 = vmul.f32 %v12896_v53, %v4107_v5  ;;  %v4093_v32 = vsub.f32 2.0, %v4077_v48  ;;  %v4078_v49 = vmul.f32 %v11509_v60, %v4032_v21 }
 0x5b9   :  { %v11511_v33 = vpop.eup %11510  ;;  %v4124_v61 = vmul.f32 %v12898_v12, %v4108_v56  ;;  %11518 = vrcp.f32 %v12964_v38  ;;  %v4251_v26 = vsub.f32 %v12951_v36, %v4250_v62  ;;  %v4261_v34 = vsub.f32 %v12960_v42, %v4260_v58 }
 0x5ba   :  { %v11513_v29 = vpop.eup %11512  ;;  %v4150_v53 = vsel %vm1663_vm1, %v4123_v19, 0  ;;  %v4109_v46 = vmul.f32 %v11507_v43, %v4093_v32  ;;  %v4094_v21 = vsub.f32 2.0, %v4078_v49  ;;  %v4079_v0 = vmul.f32 %v11511_v33, %v4035_v28  ;;  %v12985_v7 = vpop.xlane.xlu1 %4052 }
 0x5bb   :  { %v12987_v20 = vand.u32 4294901760, %v4150_v53  ;;  %v4153_v12 = vsel %vm1663_vm1, %v4124_v61, 0  ;;  %v4080_v30 = vmul.f32 %v11513_v29, %v4038_v44  ;;  %11520 = vrcp.f32 %v12974_v37 }
 0x5bc   :  { %v12991_v55 = vand.u32 4294901760, %v4153_v12  ;;  %v4125_v51 = vmul.f32 %v12906_v40, %v4109_v46  ;;  %v4110_v22 = vmul.f32 %v11509_v60, %v4094_v21  ;;  %v4095_v27 = vsub.f32 2.0, %v4079_v0 }
 0x5bd   :  { %v4096_v9 = vsub.f32 2.0, %v4080_v30  ;;  %v4252_v24 = vand.u32 4294901760, %v4251_v26  ;;  %11522 = vrcp.f32 %v12985_v7  ;;  %v4262_v28 = vand.u32 4294901760, %v4261_v34 }
 0x5be   :  { %v11515_v14 = vpop.eup %11514  ;;  %v4156_v43 = vsel %vm1663_vm1, %v4125_v51, 0  ;;  %v4126_v31 = vmul.f32 %v12908_v16, %v4110_v22  ;;  %v4111_v11 = vmul.f32 %v11511_v33, %v4095_v27  ;;  %v12998_v44 = vsub.f32 %v4141_v4, %v12956_v47 }
 0x5bf   :  { %v11517_v5 = vpop.eup %11516  ;;  %v13000_v48 = vand.u32 4294901760, %v4156_v43  ;;  %v4112_v40 = vmul.f32 %v11513_v29, %v4096_v9  ;;  %v4081_v60 = vmul.f32 %v11515_v14, %v4041_v1  ;;  %9252 = vmatprep.mubr.f32.mxu0 %v4252_v24  ;;  %v13003_v56 = vsub.f32 %v4144_v8, %v12968_v41 }
 0x5c0   :  { %v4159_v19 = vsel %vm1663_vm1, %v4126_v31, 0  ;;  %v4127_v32 = vmul.f32 %v12915_v15, %v4111_v11  ;;  %v4082_v49 = vmul.f32 %v11517_v5, %v4044_v18  ;;  %9253 = vmatmul.mubr.f32.vlgmr.msra.gmra.mrb[18].mxu0 %v4262_v28  ;;  %v4270_v16 = vand.u32 4294901760, %v12998_v44 }
 0x5c1   :  { %v13008_v33 = vand.u32 4294901760, %v4159_v19  ;;  %v4128_v4 = vmul.f32 %v12917_v13, %v4112_v40  ;;  %v4097_v61 = vsub.f32 2.0, %v4081_v60  ;;  %9277 = vmatpush3.msra.mxu0 %v12576_v35  ;;  %v4280_v1 = vand.u32 4294901760, %v13003_v56 }
 0x5c2   :  { %v4162_v8 = vsel %vm1663_vm1, %v4127_v32, 0  ;;  %v4098_v26 = vsub.f32 2.0, %v4082_v49  ;;  %v4271_v15 = vsub.f32 %v12998_v44, %v4270_v16  ;;  %9302 = vmatprep.subr.mxu0 %v12567_v10  ;;  %v13019_v18 = vsub.f32 %v4147_v2, %v12971_v52 }
 0x5c3   :  { %v11519_v34 = vpop.eup %11518  ;;  %v13021_v29 = vand.u32 4294901760, %v4162_v8  ;;  %v4165_v13 = vsel %vm1663_vm1, %v4128_v4, 0  ;;  %v4113_v35 = vmul.f32 %v11515_v14, %v4097_v61  ;;  %v4281_v46 = vsub.f32 %v13003_v56, %v4280_v1 }
 0x5c4   :  { %v13027_v21 = vand.u32 4294901760, %v4165_v13  ;;  %v4114_v0 = vmul.f32 %v11517_v5, %v4098_v26  ;;  %v4083_v30 = vmul.f32 %v11519_v34, %v12964_v38  ;;  %v4272_v51 = vand.u32 4294901760, %v4271_v15 }
 0x5c5   :  { %v11521_v22 = vpop.eup %11520  ;;  %v4129_v2 = vmul.f32 %v12923_v54, %v4113_v35  ;;  %v4282_v27 = vand.u32 4294901760, %v4281_v46  ;;  %v4290_v9 = vand.u32 4294901760, %v13019_v18  ;;  %v13033_v24 = vsub.f32 %v4150_v53, %v12987_v20 }
 0x5c6   :  { %v4130_v28 = vmul.f32 %v12925_v63, %v4114_v0  ;;  %v4099_v14 = vsub.f32 2.0, %v4083_v30  ;;  %v4084_v31 = vmul.f32 %v11521_v22, %v12974_v37  ;;  %9255 = vmatprep.mubr.f32.mxu0 %v4272_v51  ;;  %v13038_v11 = vsub.f32 %v4153_v12, %v12991_v55 }
 0x5c7   :  { %v11523_v38 = vpop.eup %11522  ;;  %v4168_v5 = vsel %vm1663_vm1, %v4129_v2, 0  ;;  %9256 = vmatmul.mubr.f32.gmra.mrb[20].mxu0 %v4282_v27  ;;  %v4291_v54 = vsub.f32 %v13019_v18, %v4290_v9  ;;  %v4300_v53 = vand.u32 4294901760, %v13033_v24  ;;  %v13046_v40 = vsub.f32 %v4156_v43, %v13000_v48 }
 0x5c8   :  { %v13048_v63 = vand.u32 4294901760, %v4168_v5  ;;  %v4171_v37 = vsel %vm1663_vm1, %v4130_v28, 0  ;;  %v4115_v60 = vmul.f32 %v11519_v34, %v4099_v14  ;;  %v4100_v12 = vsub.f32 2.0, %v4084_v31 }
 0x5c9   :  { %v13051_v32 = vand.u32 4294901760, %v4171_v37  ;;  %v4085_v49 = vmul.f32 %v11523_v38, %v12985_v7  ;;  %v4292_v4 = vand.u32 4294901760, %v4291_v54  ;;  %v4301_v61 = vsub.f32 %v13033_v24, %v4300_v53 }
 0x5ca   :  { %v4131_v26 = vmul.f32 %v12931_v6, %v4115_v60  ;;  %v4116_v15 = vmul.f32 %v11521_v22, %v4100_v12  ;;  %v4310_v43 = vand.u32 4294901760, %v13038_v11  ;;  %v4320_v35 = vand.u32 4294901760, %v13046_v40 }
 0x5cb   :  { %v4101_v46 = vsub.f32 2.0, %v4085_v49  ;;  %9258 = vmatprep.mubr.f32.mxu0 %v4292_v4  ;;  %v4302_v34 = vand.u32 4294901760, %v4301_v61  ;;  %v13061_v0 = vsub.f32 %v4159_v19, %v13008_v33  ;;  %v13064_v7 = vsub.f32 %v4162_v8, %v13021_v29 }
 0x5cc   :  { %v4174_v30 = vsel %vm1663_vm1, %v4131_v26, 0  ;;  %v4132_v51 = vmul.f32 %v12933_v50, %v4116_v15  ;;  %v4311_v6 = vsub.f32 %v13038_v11, %v4310_v43  ;;  %v4321_v22 = vsub.f32 %v13046_v40, %v4320_v35 }
 0x5cd   :  { %v13074_v2 = vand.u32 4294901760, %v4174_v30  ;;  %v4117_v27 = vmul.f32 %v11523_v38, %v4101_v46  ;;  %9259 = vmatmul.mubr.f32.gmra.mrb[22].mxu0 %v4302_v34  ;;  %v4330_v19 = vand.u32 4294901760, %v13061_v0  ;;  %v4340_v8 = vand.u32 4294901760, %v13064_v7 }
 0x5ce   :  { %v4177_v28 = vsel %vm1663_vm1, %v4132_v51, 0  ;;  %v4312_v14 = vand.u32 4294901760, %v4311_v6  ;;  %v4322_v50 = vand.u32 4294901760, %v4321_v22  ;;  %v13080_v31 = vsub.f32 %v4165_v13, %v13027_v21 }
 0x5cf   :  { %v13082_v54 = vand.u32 4294901760, %v4177_v28  ;;  %v4133_v60 = vmul.f32 %v12939_v57, %v4117_v27  ;;  %v4331_v38 = vsub.f32 %v13061_v0, %v4330_v19  ;;  %v4341_v12 = vsub.f32 %v13064_v7, %v4340_v8 }
 0x5d0   :  { %9261 = vmatprep.mubr.f32.mxu0 %v4312_v14  ;;  %v4350_v49 = vand.u32 4294901760, %v13080_v31  ;;  %v13093_v4 = vsub.f32 %v4168_v5, %v13048_v63  ;;  %v13096_v13 = vsub.f32 %v4171_v37, %v13051_v32  ;;  %v13099_v61 = vsub.f32 %v4174_v30, %v13074_v2 }
 0x5d1   :  { %v13102_v57 = vsub.f32 %v4177_v28, %v13082_v54  ;;  %v4180_v26 = vsel %vm1663_vm1, %v4133_v60, 0  ;;  %9262 = vmatmul.mubr.f32.gmra.mrb[24].mxu0 %v4322_v50  ;;  %v4332_v15 = vand.u32 4294901760, %v4331_v38  ;;  %v4342_v46 = vand.u32 4294901760, %v4341_v12 }
 0x5d2   :  { %v13105_v34 = vand.u32 4294901760, %v4180_v26  ;;  %v4351_v5 = vsub.f32 %v13080_v31, %v4350_v49  ;;  %v4360_v37 = vand.u32 4294901760, %v13093_v4  ;;  %v14405_v51 = vand.u32 4294901760, %v13096_v13 }
 0x5d3   :  { %9264 = vmatprep.mubr.f32.mxu0 %v4332_v15  ;;  %v4380_v30 = vand.u32 4294901760, %v13099_v61  ;;  %v4390_v6 = vand.u32 4294901760, %v13102_v57 }
 0x5d4   :  { %v13115_v22 = vsub.f32 %v4180_v26, %v13105_v34  ;;  %v4352_v27 = vand.u32 4294901760, %v4351_v5  ;;  %v4361_v28 = vsub.f32 %v13093_v4, %v4360_v37  ;;  %v4371_v14 = vsub.f32 %v13096_v13, %v14405_v51 }
 0x5d5   :  { %9265 = vmatmul.mubr.f32.gmra.mrb[26].mxu0 %v4342_v46  ;;  %v4381_v50 = vsub.f32 %v13099_v61, %v4380_v30  ;;  %v4391_v12 = vsub.f32 %v13102_v57, %v4390_v6 }
 0x5d6   :  { %9267 = vmatprep.mubr.f32.mxu0 %v4352_v27  ;;  %v4362_v60 = vand.u32 4294901760, %v4361_v28  ;;  %v4372_v38 = vand.u32 4294901760, %v4371_v14  ;;  %v4400_v26 = vand.u32 4294901760, %v13115_v22 }
 0x5d7   :  { %v4382_v15 = vand.u32 4294901760, %v4381_v50  ;;  %v4392_v51 = vand.u32 4294901760, %v4391_v12  ;;  %v11533_v12 = vld [vmem:[#allocation4 + $0x30] sm:$0xff] }
 0x5d8   :  { %v4401_v5 = vsub.f32 %v13115_v22, %v4400_v26 }
 0x5d9   :  { %9268 = vmatmul.mubr.f32.gmra.mrb[28].mxu0 %v4362_v60 }
 0x5da   :  { %9270 = vmatprep.mubr.f32.mxu0 %v4372_v38  ;;  %v4402_v46 = vand.u32 4294901760, %v4401_v5 }
 0x5dd   :  { %9271 = vmatmul.mubr.f32.gmra.mrb[30].mxu0 %v4382_v15 }
 0x5de   :  { %9273 = vmatprep.mubr.f32.mxu0 %v4392_v51 }
 0x5e1   :  { %9274 = vmatmul.mubr.f32.gmra.mrb[32].mxu0 %v4402_v46 }
 0x5e2   :  { %9278 = vmatprep.mubr.f32.mxu0 %v12945_v3 }
 0x5e5   :  { %9279 = vmatmul.mubr.f32.vlgmr.msra.gmra.mrb[18].mxu0 %v12953_v23 }
 0x5e6   :  { %9303 = vmatpush3.msra.mxu0 %v12567_v10  ;;  %9281 = vmatprep.mubr.f32.mxu0 %v12956_v47  ;;  %v14477_v10 = vand.u32 4294901760, %v13096_v13 }
 0x5e7   :  { %9328 = vmatprep.subr.mxu0 %v12564_v45 }
 0x5e9   :  { %9282 = vmatmul.mubr.f32.gmra.mrb[20].mxu0 %v12968_v41 }
 0x5ea   :  { %9284 = vmatprep.mubr.f32.mxu0 %v12971_v52 }
 0x5ed   :  { %9285 = vmatmul.mubr.f32.gmra.mrb[22].mxu0 %v12987_v20 }
 0x5ee   :  { %9287 = vmatprep.mubr.f32.mxu0 %v12991_v55 }
 0x5f1   :  { %9288 = vmatmul.mubr.f32.gmra.mrb[24].mxu0 %v13000_v48 }
 0x5f2   :  { %9290 = vmatprep.mubr.f32.mxu0 %v13008_v33 }
 0x5f5   :  { %9291 = vmatmul.mubr.f32.gmra.mrb[26].mxu0 %v13021_v29 }
 0x5f6   :  { %9293 = vmatprep.mubr.f32.mxu0 %v13027_v21 }
 0x5f9   :  { %9294 = vmatmul.mubr.f32.gmra.mrb[28].mxu0 %v13048_v63 }
 0x5fa   :  { %9296 = vmatprep.mubr.f32.mxu0 %v13051_v32 }
 0x5fd   :  { %9297 = vmatmul.mubr.f32.gmra.mrb[30].mxu0 %v13074_v2 }
 0x5fe   :  { %9299 = vmatprep.mubr.f32.mxu0 %v13082_v54 }
 0x601   :  { %9300 = vmatmul.mubr.f32.gmra.mrb[32].mxu0 %v13105_v34 }
 0x602   :  { %9304 = vmatprep.mubr.f32.mxu0 %v12951_v36 }
 0x605   :  { %9305 = vmatmul.mubr.f32.vlgmr.msra.gmra.mrb[18].mxu0 %v12960_v42  ;;  %v11527_v42 = vld [vmem:[#allocation4] sm:$0xff] }
 0x606   :  { %9329 = vmatpush3.msra.mxu0 %v12564_v45  ;;  %9307 = vmatprep.mubr.f32.mxu0 %v12998_v44 }
 0x607   :  { %9354 = vmatprep.subr.mxu0 %v12572_v25 }
 0x609   :  { %9308 = vmatmul.mubr.f32.gmra.mrb[20].mxu0 %v13003_v56 }
 0x60a   :  { %9310 = vmatprep.mubr.f32.mxu0 %v13019_v18 }
 0x60d   :  { %9311 = vmatmul.mubr.f32.gmra.mrb[22].mxu0 %v13033_v24 }
 0x60e   :  { %9313 = vmatprep.mubr.f32.mxu0 %v13038_v11 }
 0x611   :  { %9314 = vmatmul.mubr.f32.gmra.mrb[24].mxu0 %v13046_v40 }
 0x612   :  { %9316 = vmatprep.mubr.f32.mxu0 %v13061_v0 }
 0x615   :  { %9317 = vmatmul.mubr.f32.gmra.mrb[26].mxu0 %v13064_v7 }
 0x616   :  { %9319 = vmatprep.mubr.f32.mxu0 %v13080_v31 }
 0x619   :  { %9320 = vmatmul.mubr.f32.gmra.mrb[28].mxu0 %v13093_v4 }
 0x61a   :  { %9322 = vmatprep.mubr.f32.mxu0 %v13096_v13 }
 0x61d   :  { %9323 = vmatmul.mubr.f32.gmra.mrb[30].mxu0 %v13099_v61 }
 0x61e   :  { %9325 = vmatprep.mubr.f32.mxu0 %v13102_v57 }
 0x621   :  { %9326 = vmatmul.mubr.f32.gmra.mrb[32].mxu0 %v13115_v22  ;;  %v11532_v22 = vld [vmem:[#allocation4 + $0x38] sm:$0xff] }
 0x622   :  { %9330 = vmatprep.mubr.f32.mxu0 %v4250_v62 }
 0x625   :  { %9331 = vmatmul.mubr.f32.vlgmr.msra.gmra.mrb[18].mxu0 %v4260_v58 }
 0x626   :  { %9355 = vmatpush3.msra.mxu0 %v12572_v25  ;;  %9333 = vmatprep.mubr.f32.mxu0 %v4270_v16 }
 0x627   :  { %9380 = vmatprep.subr.mxu0 %v12564_v45 }
 0x629   :  { %9334 = vmatmul.mubr.f32.gmra.mrb[20].mxu0 %v4280_v1  ;;  %v11529_v1 = vld [vmem:[#allocation4 + $0x10] sm:$0xff] }
 0x62a   :  { %9336 = vmatprep.mubr.f32.mxu0 %v4290_v9 }
 0x62d   :  { %9337 = vmatmul.mubr.f32.gmra.mrb[22].mxu0 %v4300_v53 }
 0x62e   :  { %9339 = vmatprep.mubr.f32.mxu0 %v4310_v43 }
 0x631   :  { %9340 = vmatmul.mubr.f32.gmra.mrb[24].mxu0 %v4320_v35 }
 0x632   :  { %9342 = vmatprep.mubr.f32.mxu0 %v4330_v19 }
 0x635   :  { %9343 = vmatmul.mubr.f32.gmra.mrb[26].mxu0 %v4340_v8  ;;  %v11531_v8 = vld [vmem:[#allocation4 + $0x20] sm:$0xff] }
 0x636   :  { %9345 = vmatprep.mubr.f32.mxu0 %v4350_v49 }
 0x639   :  { %9346 = vmatmul.mubr.f32.gmra.mrb[28].mxu0 %v4360_v37 }
 0x63a   :  { %9348 = vmatprep.mubr.f32.mxu0 %v14477_v10 }
 0x63d   :  { %9349 = vmatmul.mubr.f32.gmra.mrb[30].mxu0 %v4380_v30 }
 0x63e   :  { %9351 = vmatprep.mubr.f32.mxu0 %v4390_v6 }
 0x641   :  { %9352 = vmatmul.mubr.f32.gmra.mrb[32].mxu0 %v4400_v26 }
 0x642   :  { %9356 = vmatprep.mubr.f32.mxu0 %v12945_v3 }
 0x645   :  { %9357 = vmatmul.mubr.f32.vlgmr.msra.gmra.mrb[18].mxu0 %v12953_v23 }
 0x646   :  { %9381 = vmatpush3.msra.mxu0 %v12564_v45  ;;  %9359 = vmatprep.mubr.f32.mxu0 %v12956_v47  ;;  %v5289_v45 = vld [vmem:[%s14367_s6] sm:$0xff] }
 0x647   :  { %10726 = vmatprep.subr.bf16.mxu0 %v14476_v39 }
 0x649   :  { %9360 = vmatmul.mubr.f32.gmra.mrb[20].mxu0 %v12968_v41 }
 0x64a   :  { %9362 = vmatprep.mubr.f32.mxu0 %v12971_v52 }
 0x64d   :  { %9363 = vmatmul.mubr.f32.gmra.mrb[22].mxu0 %v12987_v20 }
 0x64e   :  { %9365 = vmatprep.mubr.f32.mxu0 %v12991_v55 }
 0x651   :  { %9366 = vmatmul.mubr.f32.gmra.mrb[24].mxu0 %v13000_v48 }
 0x652   :  { %9368 = vmatprep.mubr.f32.mxu0 %v13008_v33 }
 0x655   :  { %9369 = vmatmul.mubr.f32.gmra.mrb[26].mxu0 %v13021_v29 }
 0x656   :  { %9371 = vmatprep.mubr.f32.mxu0 %v13027_v21 }
 0x659   :  { %9372 = vmatmul.mubr.f32.gmra.mrb[28].mxu0 %v13048_v63 }
 0x65a   :  { %9374 = vmatprep.mubr.f32.mxu0 %v13051_v32 }
 0x65d   :  { %9375 = vmatmul.mubr.f32.gmra.mrb[30].mxu0 %v13074_v2 }
 0x65e   :  { %9377 = vmatprep.mubr.f32.mxu0 %v13082_v54 }
 0x661   :  { %9378 = vmatmul.mubr.f32.gmra.mrb[32].mxu0 %v13105_v34 }
 0x662   :  { %9382 = vmatprep.mubr.f32.mxu0 %v12945_v3  ;;  %v11526_v3 = vld [vmem:[#allocation4 + $0x8] sm:$0xff] }
 0x665   :  { %9383 = vmatmul.mubr.f32.vlgmr.msra.gmra.mrb[18].mxu0 %v12953_v23 }
 0x666   :  { %9385 = vmatprep.mubr.f32.mxu0 %v12956_v47  ;;  %v13238_v47 = vand.u32 4294901760, %v5289_v45 }
 0x668   :  { %v13243_v56 = vsub.f32 %v5289_v45, %v13238_v47 }
 0x669   :  { %9386 = vmatmul.mubr.f32.gmra.mrb[20].mxu0 %v12968_v41 }
 0x66a   :  { %9388 = vmatprep.mubr.f32.mxu0 %v12971_v52  ;;  %v14406_v0 = vand.u32 4294901760, %v13243_v56 }
 0x66c   :  { %v13278_v14 = vsub.f32 %v13243_v56, %v14406_v0 }
 0x66d   :  { %9389 = vmatmul.mubr.f32.gmra.mrb[22].mxu0 %v12987_v20 }
 0x66e   :  { %9391 = vmatprep.mubr.f32.mxu0 %v12991_v55  ;;  %v11528_v55 = vld [vmem:[#allocation4 + $0x18] sm:$0xff] }
 0x671   :  { %9392 = vmatmul.mubr.f32.gmra.mrb[24].mxu0 %v13000_v48 }
 0x672   :  { %9394 = vmatprep.mubr.f32.mxu0 %v13008_v33 }
 0x675   :  { %9395 = vmatmul.mubr.f32.gmra.mrb[26].mxu0 %v13021_v29 }
 0x676   :  { %9397 = vmatprep.mubr.f32.mxu0 %v13027_v21 }
 0x679   :  { %9398 = vmatmul.mubr.f32.gmra.mrb[28].mxu0 %v13048_v63 }
 0x67a   :  { %9400 = vmatprep.mubr.f32.mxu0 %v13051_v32  ;;  %v11530_v32 = vld [vmem:[#allocation4 + $0x28] sm:$0xff] }
 0x67d   :  { %9401 = vmatmul.mubr.f32.gmra.mrb[30].mxu0 %v13074_v2 }
 0x67e   :  { %9403 = vmatprep.mubr.f32.mxu0 %v13082_v54 }
 0x681   :  { %9404 = vmatmul.mubr.f32.gmra.mrb[32].mxu0 %v13105_v34 }
 0x682   :  { %9648 = vmatprep.mubr.msk.f32.mxu0 %vm11623_vm0, %v14445_v17 }
 0x738   :  { %v9384_v25 = vpop.f32.mrb[18].mxu0 }
 0x739   :  { %v5274_v36 = vmul.f32 %v11526_v3, %v9384_v25  ;;  %v5179_v23 = vpop.f32.mrb[19].mxu0 }
 0x73a   :  { %v5273_v62 = vmul.f32 %v11527_v42, %v5179_v23 }
 0x73b   :  { %v5294_v58 = vand.u32 4294901760, %v5274_v36 }
 0x73c   :  { %v5291_v41 = vand.u32 4294901760, %v5273_v62  ;;  %v9387_v52 = vpop.f32.mrb[20].mxu0 }
 0x73d   :  { %v13240_v20 = vsub.f32 %v5274_v36, %v5294_v58  ;;  %v5276_v44 = vmul.f32 %v11528_v55, %v9387_v52  ;;  %v5191_v48 = vpop.f32.mrb[21].mxu0 }
 0x73e   :  { %v13245_v16 = vpack.c.bf16 %v5294_v58, %v5291_v41  ;;  %v13247_v33 = vsub.f32 %v5273_v62, %v5291_v41  ;;  %v5275_v18 = vmul.f32 %v11529_v1, %v5191_v48  ;;  %v11534_v58 = vld [vmem:[#allocation4 + $0x48] sm:$0xff] }
 0x73f   :  { %v5391_v29 = vand.u32 4294901760, %v13240_v20  ;;  %v5300_v21 = vand.u32 4294901760, %v5276_v44 }
 0x740   :  { %v5384_v9 = vand.u32 4294901760, %v13247_v33  ;;  %v10631_v24 = vpack.c.bf16 %v13240_v20, %v13247_v33  ;;  %v5297_v11 = vand.u32 4294901760, %v5275_v18  ;;  %v9390_v53 = vpop.f32.mrb[22].mxu0  ;;  %10584 = vmatpush3.bf16.msra.mxu1 %v13245_v16 }
 0x741   :  { %v5392_v40 = vsub.f32 %v13240_v20, %v5391_v29  ;;  %v13255_v63 = vsub.f32 %v5276_v44, %v5300_v21  ;;  %v5278_v43 = vmul.f32 %v11530_v32, %v9390_v53  ;;  %v5203_v35 = vpop.f32.mrb[23].mxu0  ;;  %10585 = vmatprep.subr.bf16.mxu1 %v14476_v39 }
 0x742   :  { %v5385_v7 = vsub.f32 %v13247_v33, %v5384_v9  ;;  %v13260_v2 = vpack.c.bf16 %v5300_v21, %v5297_v11  ;;  %v13262_v19 = vsub.f32 %v5275_v18, %v5297_v11  ;;  %v5277_v31 = vmul.f32 %v11531_v8, %v5203_v35  ;;  %v11535_v18 = vld [vmem:[#allocation4 + $0x40] sm:$0xff] }
 0x743   :  { %v5393_v54 = vand.u32 4294901760, %v5392_v40  ;;  %v5405_v49 = vand.u32 4294901760, %v13255_v63  ;;  %v5306_v4 = vand.u32 4294901760, %v5278_v43  ;;  %v13265_v13 = vpack.c.bf16 %v5391_v29, %v5384_v9 }
 0x744   :  { %v5386_v61 = vand.u32 4294901760, %v5385_v7  ;;  %v5398_v57 = vand.u32 4294901760, %v13262_v19  ;;  %v10634_v34 = vpack.c.bf16 %v13255_v63, %v13262_v19  ;;  %v5303_v37 = vand.u32 4294901760, %v5277_v31  ;;  %v9393_v51 = vpop.f32.mrb[24].mxu0  ;;  %10587 = vmatpush3.bf16.msra.mxu1 %v13260_v2 }
 0x745   :  { %v5406_v30 = vsub.f32 %v13255_v63, %v5405_v49  ;;  %v13272_v6 = vsub.f32 %v5278_v43, %v5306_v4  ;;  %v5280_v27 = vmul.f32 %v11532_v22, %v9393_v51  ;;  %v5215_v28 = vpop.f32.mrb[25].mxu0  ;;  %10588 = vmatprep.subr.bf16.mxu1 %v14476_v39 }
 0x746   :  { %v5399_v50 = vsub.f32 %v13262_v19, %v5398_v57  ;;  %v13281_v60 = vpack.c.bf16 %v5306_v4, %v5303_v37  ;;  %v13283_v38 = vsub.f32 %v5277_v31, %v5303_v37  ;;  %v5279_v26 = vmul.f32 %v11533_v12, %v5215_v28 }
 0x747   :  { %v5407_v15 = vand.u32 4294901760, %v5406_v30  ;;  %v5419_v5 = vand.u32 4294901760, %v13272_v6  ;;  %v5312_v46 = vand.u32 4294901760, %v5280_v27  ;;  %v13286_v10 = vpack.c.bf16 %v5393_v54, %v5386_v61  ;;  %v11536_v54 = vld [vmem:[#allocation4 + $0x58] sm:$0xff]  ;;  %v11537_v30 = vld [vmem:[#allocation4 + $0x50] sm:$0xff] }
 0x748   :  { %v5400_v45 = vand.u32 4294901760, %v5399_v50  ;;  %v5412_v25 = vand.u32 4294901760, %v13283_v38  ;;  %v10637_v3 = vpack.c.bf16 %v13272_v6, %v13283_v38  ;;  %v5309_v36 = vand.u32 4294901760, %v5279_v26  ;;  %v9396_v23 = vpop.f32.mrb[26].mxu0  ;;  %10590 = vmatpush3.bf16.msra.mxu1 %v13281_v60 }
 0x749   :  { %v5420_v42 = vsub.f32 %v13272_v6, %v5419_v5  ;;  %v13293_v62 = vsub.f32 %v5280_v27, %v5312_v46  ;;  %v5282_v41 = vmul.f32 %v11534_v58, %v9396_v23  ;;  %v5227_v52 = vpop.f32.mrb[27].mxu0  ;;  %10591 = vmatprep.subr.bf16.mxu1 %v14476_v39  ;;  %v13296_v55 = vpack.c.bf16 %v5405_v49, %v5398_v57  ;;  %v11538_v23 = vld [vmem:[#allocation4 + $0x68] sm:$0xff] }
 0x74a   :  { %v5413_v44 = vsub.f32 %v13283_v38, %v5412_v25  ;;  %v13299_v48 = vpack.c.bf16 %v5312_v46, %v5309_v36  ;;  %v13301_v1 = vsub.f32 %v5279_v26, %v5309_v36  ;;  %v5281_v29 = vmul.f32 %v11535_v18, %v5227_v52 }
 0x74b   :  { %v5421_v21 = vand.u32 4294901760, %v5420_v42  ;;  %v5433_v9 = vand.u32 4294901760, %v13293_v62  ;;  %v5318_v11 = vand.u32 4294901760, %v5282_v41  ;;  %v13304_v53 = vpack.c.bf16 %v5407_v15, %v5400_v45 }
 0x74c   :  { %v5414_v40 = vand.u32 4294901760, %v5413_v44  ;;  %v5426_v32 = vand.u32 4294901760, %v13301_v1  ;;  %v10640_v43 = vpack.c.bf16 %v13293_v62, %v13301_v1  ;;  %v5315_v35 = vand.u32 4294901760, %v5281_v29  ;;  %v9399_v7 = vpop.f32.mrb[28].mxu0  ;;  %10593 = vmatpush3.bf16.msra.mxu1 %v13299_v48 }
 0x74d   :  { %v5434_v8 = vsub.f32 %v13293_v62, %v5433_v9  ;;  %v13311_v31 = vsub.f32 %v5282_v41, %v5318_v11  ;;  %v5284_v49 = vmul.f32 %v11536_v54, %v9399_v7  ;;  %v5239_v4 = vpop.f32.mrb[29].mxu0  ;;  %10594 = vmatprep.subr.bf16.mxu1 %v14476_v39  ;;  %v13314_v61 = vpack.c.bf16 %v5419_v5, %v5412_v25 }
 0x74e   :  { %v5427_v57 = vsub.f32 %v13301_v1, %v5426_v32  ;;  %v13317_v37 = vpack.c.bf16 %v5318_v11, %v5315_v35  ;;  %v13319_v51 = vsub.f32 %v5281_v29, %v5315_v35  ;;  %v5283_v22 = vmul.f32 %v11537_v30, %v5239_v4  ;;  %v11539_v29 = vld [vmem:[#allocation4 + $0x60] sm:$0xff]  ;;  %v11540_v30 = vld [vmem:[#allocation4 + $0x78] sm:$0xff] }
 0x74f   :  { %v5435_v27 = vand.u32 4294901760, %v5434_v8  ;;  %v5447_v28 = vand.u32 4294901760, %v13311_v31  ;;  %v5324_v50 = vand.u32 4294901760, %v5284_v49  ;;  %v13322_v12 = vpack.c.bf16 %v5421_v21, %v5414_v40 }
 0x750   :  { %v5428_v26 = vand.u32 4294901760, %v5427_v57  ;;  %v5440_v15 = vand.u32 4294901760, %v13319_v51  ;;  %v5321_v46 = vand.u32 4294901760, %v5283_v22  ;;  %v9402_v45 = vpop.f32.mrb[30].mxu0  ;;  %10596 = vmatpush3.bf16.msra.mxu1 %v13317_v37  ;;  %v13332_v41 = vpack.c.bf16 %v5433_v9, %v5426_v32 }
 0x751   :  { %v5448_v25 = vsub.f32 %v13311_v31, %v5447_v28  ;;  %v13329_v36 = vsub.f32 %v5284_v49, %v5324_v50  ;;  %v5286_v42 = vmul.f32 %v11538_v23, %v9402_v45  ;;  %v5251_v58 = vpop.f32.mrb[31].mxu0  ;;  %10597 = vmatprep.subr.bf16.mxu1 %v14476_v39  ;;  %v14478_v6 = vpack.c.bf16 %v13311_v31, %v13319_v51 }
 0x752   :  { %v5441_v52 = vsub.f32 %v13319_v51, %v5440_v15  ;;  %v13335_v44 = vpack.c.bf16 %v5324_v50, %v5321_v46  ;;  %v13337_v18 = vsub.f32 %v5283_v22, %v5321_v46  ;;  %v5285_v21 = vmul.f32 %v11539_v29, %v5251_v58 }
 0x753   :  { %v5449_v11 = vand.u32 4294901760, %v5448_v25  ;;  %v5461_v40 = vand.u32 4294901760, %v13329_v36  ;;  %v5330_v35 = vand.u32 4294901760, %v5286_v42  ;;  %v10616_v7 = vpack.c.bf16 %v5435_v27, %v5428_v26  ;;  %v11541_v25 = vld [vmem:[#allocation4 + $0x70] sm:$0xff] }
 0x754   :  { %v5442_v8 = vand.u32 4294901760, %v5441_v52  ;;  %v5454_v54 = vand.u32 4294901760, %v13337_v18  ;;  %v5327_v32 = vand.u32 4294901760, %v5285_v21  ;;  %v9405_v49 = vpop.f32.mrb[32].mxu0  ;;  %10599 = vmatpush3.bf16.msra.mxu1 %v13335_v44  ;;  %v13348_v27 = vpack.c.bf16 %v5447_v28, %v5440_v15 }
 0x755   :  { %v5462_v4 = vsub.f32 %v13329_v36, %v5461_v40  ;;  %v13345_v57 = vsub.f32 %v5286_v42, %v5330_v35  ;;  %v5288_v22 = vmul.f32 %v11540_v30, %v9405_v49  ;;  %v5263_v50 = vpop.f32.mrb[33].mxu0  ;;  %10600 = vmatprep.subr.bf16.mxu1 %v14476_v39  ;;  %v14482_v31 = vand.u32 4294901760, %v13243_v56 }
 0x756   :  { %v5455_v26 = vsub.f32 %v13337_v18, %v5454_v54  ;;  %v13351_v46 = vpack.c.bf16 %v5330_v35, %v5327_v32  ;;  %v13353_v45 = vsub.f32 %v5285_v21, %v5327_v32  ;;  %v5287_v23 = vmul.f32 %v11541_v25, %v5263_v50 }
 0x757   :  { %v5463_v58 = vand.u32 4294901760, %v5462_v4  ;;  %v5475_v52 = vand.u32 4294901760, %v13345_v57  ;;  %v5336_v42 = vand.u32 4294901760, %v5288_v22  ;;  %v10619_v29 = vpack.c.bf16 %v5449_v11, %v5442_v8 }
 0x758   :  { %v5456_v0 = vand.u32 4294901760, %v5455_v26  ;;  %v5468_v49 = vand.u32 4294901760, %v13353_v45  ;;  %v5333_v15 = vand.u32 4294901760, %v5287_v23  ;;  %10602 = vmatpush3.bf16.msra.mxu1 %v13351_v46  ;;  %v13364_v32 = vpack.c.bf16 %v5461_v40, %v5454_v54 }
 0x759   :  { %v5476_v35 = vsub.f32 %v13345_v57, %v5475_v52  ;;  %v13361_v21 = vsub.f32 %v5288_v22, %v5336_v42  ;;  %10603 = vmatprep.subr.bf16.mxu1 %v14476_v39  ;;  %v5375_v25 = vand.u32 4294901760, %v13278_v14  ;;  %v14480_v1 = vpack.c.bf16 %v13345_v57, %v13353_v45 }
 0x75a   :  { %v5469_v4 = vsub.f32 %v13353_v45, %v5468_v49  ;;  %v13367_v11 = vpack.c.bf16 %v5336_v42, %v5333_v15  ;;  %v13369_v8 = vsub.f32 %v5287_v23, %v5333_v15  ;;  %v10622_v30 = vpack.c.bf16 %v5463_v58, %v5456_v0  ;;  %v5935_v15 = vld [vmem:[%s14363_s2 + $0x20] sm:$0xff] }
 0x75b   :  { %v5477_v50 = vand.u32 4294901760, %v5476_v35  ;;  %v5489_v26 = vand.u32 4294901760, %v13361_v21  ;;  %v13373_v28 = vpack.c.bf16 %v5475_v52, %v5468_v49  ;;  %v5936_v35 = vld [vmem:[%s14363_s2 + $0x28] sm:$0xff]  ;;  %v5964_v33 = vand.u32 4294901760, %v5935_v15 }
 0x75c   :  { %v5470_v22 = vand.u32 4294901760, %v5469_v4  ;;  %v5482_v9 = vand.u32 4294901760, %v13369_v8  ;;  %10605 = vmatpush3.bf16.msra.mxu1 %v13367_v11  ;;  %v5937_v4 = vld [vmem:[%s14363_s2 + $0x30] sm:$0xff] }
 0x75d   :  { %v5490_v54 = vsub.f32 %v13361_v21, %v5489_v26  ;;  %10606 = vmatprep.subr.bf16.mxu1 %v14476_v39 }
 0x75e   :  { %v5483_v0 = vsub.f32 %v13369_v8, %v5482_v9  ;;  %v10625_v23 = vpack.c.bf16 %v5477_v50, %v5470_v22  ;;  %v13382_v58 = vpack.c.bf16 %v5489_v26, %v5482_v9  ;;  %v5939_v50 = vld [vmem:[%s14363_s2 + $0x40] sm:$0xff] }
 0x75f   :  { %v5491_v14 = vand.u32 4294901760, %v5490_v54  ;;  %9439 = vmatmul.mubr.f32.vlgmr.msra.gmra.mrb[30].mxu1 %v5375_v25 }
 0x760   :  { %v5484_v52 = vand.u32 4294901760, %v5483_v0  ;;  %10608 = vmatpush3.bf16.msra.mxu1 %v13286_v10  ;;  %9473 = vmatprep.mubr.msk.f32.mxu1 %vm11623_vm0, %v14445_v17  ;;  %v5931_v10 = vld [vmem:[%s14363_s2] sm:$0xff]  ;;  %v5940_v0 = vld [vmem:[%s14363_s2 + $0x48] sm:$0xff] }
 0x761   :  { %10609 = vmatprep.subr.bf16.mxu1 %v14476_v39 }
 0x762   :  { %v10628_v42 = vpack.c.bf16 %v5491_v14, %v5484_v52 }
 0x764   :  { %10611 = vmatpush3.bf16.msra.mxu1 %v13304_v53  ;;  %v5932_v53 = vld [vmem:[%s14363_s2 + $0x8] sm:$0xff] }
 0x765   :  { %10612 = vmatprep.subr.bf16.mxu1 %v14476_v39  ;;  %v5955_v9 = vand.u32 4294901760, %v5932_v53 }
 0x767   :  { %v13435_v22 = vsub.f32 %v5932_v53, %v5955_v9 }
 0x768   :  { %10614 = vmatpush3.bf16.msra.mxu1 %v13322_v12  ;;  %v5933_v12 = vld [vmem:[%s14363_s2 + $0x10] sm:$0xff] }
 0x769   :  { %10615 = vmatprep.subr.bf16.mxu1 %v14476_v39  ;;  %v5958_v49 = vand.u32 4294901760, %v5933_v12  ;;  %v6052_v51 = vand.u32 4294901760, %v13435_v22 }
 0x76b   :  { %v13437_v54 = vsub.f32 %v5933_v12, %v5958_v49  ;;  %v5970_v12 = vand.u32 4294901760, %v5937_v4 }
 0x76c   :  { %10617 = vmatpush3.bf16.msra.mxu1 %v10616_v7  ;;  %v5952_v7 = vand.u32 4294901760, %v5931_v10 }
 0x76d   :  { %10618 = vmatprep.subr.bf16.mxu1 %v14476_v39 }
 0x76e   :  { %v13431_v26 = vpack.c.bf16 %v5955_v9, %v5952_v7  ;;  %v13433_v25 = vsub.f32 %v5931_v10, %v5952_v7  ;;  %v5942_v10 = vld [vmem:[%s14363_s2 + $0x58] sm:$0xff]  ;;  %v5976_v9 = vand.u32 4294901760, %v5939_v50 }
 0x76f   :  { %v5985_v63 = vand.u32 4294901760, %v5942_v10 }
 0x770   :  { %10620 = vmatpush3.bf16.msra.mxu1 %v10619_v29  ;;  %v5934_v29 = vld [vmem:[%s14363_s2 + $0x18] sm:$0xff]  ;;  %10728 = vmatpush3.bf16.msra.mxu0 %v13431_v26  ;;  %v13466_v40 = vsub.f32 %v5939_v50, %v5976_v9 }
 0x771   :  { %10621 = vmatprep.subr.bf16.mxu1 %v14476_v39  ;;  %v5961_v20 = vand.u32 4294901760, %v5934_v29  ;;  %10729 = vmatprep.subr.bf16.mxu0 %v14476_v39  ;;  %v13478_v5 = vsub.f32 %v5942_v10, %v5985_v63 }
 0x773   :  { %v13445_v14 = vpack.c.bf16 %v5961_v20, %v5958_v49  ;;  %v13447_v52 = vsub.f32 %v5934_v29, %v5961_v20  ;;  %v5979_v29 = vand.u32 4294901760, %v5940_v0 }
 0x774   :  { %10623 = vmatpush3.bf16.msra.mxu1 %v10622_v30  ;;  %v5938_v30 = vld [vmem:[%s14363_s2 + $0x38] sm:$0xff] }
 0x775   :  { %10624 = vmatprep.subr.bf16.mxu1 %v14476_v39  ;;  %v5973_v7 = vand.u32 4294901760, %v5938_v30  ;;  %v13468_v19 = vsub.f32 %v5940_v0, %v5979_v29  ;;  %10731 = vmatpush3.bf16.msra.mxu0 %v13445_v14  ;;  %v13494_v38 = vpack.c.bf16 %v5979_v29, %v5976_v9 }
 0x776   :  { %10732 = vmatprep.subr.bf16.mxu0 %v14476_v39 }
 0x777   :  { %v13464_v20 = vsub.f32 %v5938_v30, %v5973_v7 }
 0x778   :  { %10626 = vmatpush3.bf16.msra.mxu1 %v10625_v23  ;;  %v5941_v23 = vld [vmem:[%s14363_s2 + $0x50] sm:$0xff] }
 0x779   :  { %10627 = vmatprep.subr.bf16.mxu1 %v14476_v39  ;;  %v5982_v49 = vand.u32 4294901760, %v5941_v23  ;;  %v6094_v29 = vand.u32 4294901760, %v13464_v20 }
 0x77b   :  { %v13502_v62 = vpack.c.bf16 %v5985_v63, %v5982_v49 }
 0x77c   :  { %10629 = vmatpush3.bf16.msra.mxu1 %v10628_v42  ;;  %v13449_v42 = vsub.f32 %v5935_v15, %v5964_v33  ;;  %v13462_v15 = vsub.f32 %v5937_v4, %v5970_v12  ;;  %v13486_v4 = vpack.c.bf16 %v5973_v7, %v5970_v12 }
 0x77d   :  { %10630 = vmatprep.subr.bf16.mxu1 %v14476_v39 }
 0x77e   :  { %v6073_v30 = vand.u32 4294901760, %v13449_v42  ;;  %v6087_v9 = vand.u32 4294901760, %v13462_v15 }
 0x77f   :  { %9474 = vmatmul.mubr.f32.vlgmr.msra.gmra.mrb[30].mxu1 %v13238_v47 }
 0x780   :  { %10632 = vmatpush3.bf16.msra.mxu1 %v10631_v24  ;;  %9508 = vmatprep.mubr.msk.f32.mxu1 %vm11623_vm0, %v14445_v17  ;;  %v5967_v24 = vand.u32 4294901760, %v5936_v35  ;;  %v6088_v63 = vsub.f32 %v13462_v15, %v6087_v9 }
 0x781   :  { %10633 = vmatprep.subr.bf16.mxu1 %v14476_v39 }
 0x782   :  { %v13458_v53 = vsub.f32 %v5936_v35, %v5967_v24  ;;  %v13476_v35 = vpack.c.bf16 %v5967_v24, %v5964_v33 }
 0x784   :  { %10635 = vmatpush3.bf16.msra.mxu1 %v10634_v34  ;;  %v13470_v34 = vsub.f32 %v5941_v23, %v5982_v49  ;;  %10734 = vmatpush3.bf16.msra.mxu0 %v13476_v35  ;;  %v6080_v50 = vand.u32 4294901760, %v13458_v53  ;;  %v6074_v23 = vsub.f32 %v13449_v42, %v6073_v30 }
 0x785   :  { %10636 = vmatprep.subr.bf16.mxu1 %v14476_v39  ;;  %10735 = vmatprep.subr.bf16.mxu0 %v14476_v39 }
 0x786   :  { %v6081_v10 = vsub.f32 %v13458_v53, %v6080_v50  ;;  %v6075_v12 = vand.u32 4294901760, %v6074_v23 }
 0x788   :  { %10638 = vmatpush3.bf16.msra.mxu1 %v10637_v3  ;;  %10737 = vmatpush3.bf16.msra.mxu0 %v13486_v4  ;;  %v14479_v3 = vpack.c.bf16 %v13329_v36, %v13337_v18  ;;  %v6082_v7 = vand.u32 4294901760, %v6081_v10 }
 0x789   :  { %10639 = vmatprep.subr.bf16.mxu1 %v14476_v39  ;;  %10738 = vmatprep.subr.bf16.mxu0 %v14476_v39 }
 0x78a   :  { %v10757_v49 = vpack.c.bf16 %v6082_v7, %v6075_v12 }
 0x78c   :  { %10641 = vmatpush3.bf16.msra.mxu1 %v10640_v43  ;;  %10740 = vmatpush3.bf16.msra.mxu0 %v13494_v38  ;;  %v14481_v43 = vpack.c.bf16 %v13361_v21, %v13369_v8  ;;  %v6059_v21 = vand.u32 4294901760, %v13437_v54 }
 0x78d   :  { %10642 = vmatprep.subr.bf16.mxu1 %v14476_v39  ;;  %10741 = vmatprep.subr.bf16.mxu0 %v14476_v39 }
 0x78e   :  { %v6060_v8 = vsub.f32 %v13437_v54, %v6059_v21 }
 0x790   :  { %10644 = vmatpush3.bf16.msra.mxu1 %v14478_v6  ;;  %10743 = vmatpush3.bf16.msra.mxu0 %v13502_v62  ;;  %v6061_v33 = vand.u32 4294901760, %v6060_v8  ;;  %v6095_v6 = vsub.f32 %v13464_v20, %v6094_v29 }
 0x791   :  { %10645 = vmatprep.subr.bf16.mxu1 %v14476_v39  ;;  %10744 = vmatprep.subr.bf16.mxu0 %v14476_v39 }
 0x794   :  { %10647 = vmatpush3.bf16.msra.mxu1 %v14479_v3  ;;  %v6089_v3 = vand.u32 4294901760, %v6088_v63 }
 0x795   :  { %10648 = vmatprep.subr.bf16.mxu1 %v14476_v39 }
 0x798   :  { %10650 = vmatpush3.bf16.msra.mxu1 %v14480_v1  ;;  %v6096_v1 = vand.u32 4294901760, %v6095_v6 }
 0x799   :  { %10651 = vmatprep.subr.bf16.mxu1 %v14476_v39 }
 0x79c   :  { %10653 = vmatpush3.bf16.msra.mxu1 %v14481_v43  ;;  %v6101_v43 = vand.u32 4294901760, %v13466_v40 }
 0x79d   :  { %10654 = vmatprep.subr.bf16.mxu1 %v14476_v39 }
 0x79f   :  { %9509 = vmatmul.mubr.f32.vlgmr.msra.gmra.mrb[30].mxu1 %v13243_v56  ;;  %v5943_v56 = vld [vmem:[%s14363_s2 + $0x60] sm:$0xff] }
 0x7a0   :  { %10656 = vmatpush3.bf16.msra.mxu1 %v13245_v16  ;;  %9543 = vmatprep.mubr.msk.f32.mxu1 %vm11623_vm0, %v14445_v17 }
 0x7a1   :  { %10657 = vmatprep.subr.bf16.mxu1 %v14476_v39 }
 0x7a4   :  { %10659 = vmatpush3.bf16.msra.mxu1 %v13260_v2 }
 0x7a5   :  { %10660 = vmatprep.subr.bf16.mxu1 %v14476_v39 }
 0x7a8   :  { %10662 = vmatpush3.bf16.msra.mxu1 %v13281_v60 }
 0x7a9   :  { %10663 = vmatprep.subr.bf16.mxu1 %v14476_v39 }
 0x7ac   :  { %10665 = vmatpush3.bf16.msra.mxu1 %v13299_v48 }
 0x7ad   :  { %10666 = vmatprep.subr.bf16.mxu1 %v14476_v39 }
 0x7b0   :  { %10668 = vmatpush3.bf16.msra.mxu1 %v13317_v37 }
 0x7b1   :  { %10669 = vmatprep.subr.bf16.mxu1 %v14476_v39 }
 0x7b4   :  { %10671 = vmatpush3.bf16.msra.mxu1 %v13335_v44 }
 0x7b5   :  { %10672 = vmatprep.subr.bf16.mxu1 %v14476_v39 }
 0x7b8   :  { %10674 = vmatpush3.bf16.msra.mxu1 %v13351_v46 }
 0x7b9   :  { %10675 = vmatprep.subr.bf16.mxu1 %v14476_v39 }
 0x7bc   :  { %10677 = vmatpush3.bf16.msra.mxu1 %v13367_v11 }
 0x7bd   :  { %10678 = vmatprep.subr.bf16.mxu1 %v14476_v39 }
 0x7bf   :  { %9544 = vmatmul.mubr.f32.vlgmr.msra.gmra.mrb[30].mxu1 %v14482_v31  ;;  %v6108_v31 = vand.u32 4294901760, %v13468_v19 }
 0x7c0   :  { %10680 = vmatpush3.bf16.msra.mxu1 %v13265_v13  ;;  %9578 = vmatprep.mubr.msk.f32.mxu1 %vm11623_vm0, %v14445_v17 }
 0x7c1   :  { %10681 = vmatprep.subr.bf16.mxu1 %v14476_v39 }
 0x7c4   :  { %10683 = vmatpush3.bf16.msra.mxu1 %v13296_v55  ;;  %v5945_v55 = vld [vmem:[%s14363_s2 + $0x70] sm:$0xff] }
 0x7c5   :  { %10684 = vmatprep.subr.bf16.mxu1 %v14476_v39 }
 0x7c8   :  { %10686 = vmatpush3.bf16.msra.mxu1 %v13314_v61 }
 0x7c9   :  { %10687 = vmatprep.subr.bf16.mxu1 %v14476_v39 }
 0x7cc   :  { %10689 = vmatpush3.bf16.msra.mxu1 %v13332_v41 }
 0x7cd   :  { %10690 = vmatprep.subr.bf16.mxu1 %v14476_v39 }
 0x7d0   :  { %10692 = vmatpush3.bf16.msra.mxu1 %v13348_v27 }
 0x7d1   :  { %10693 = vmatprep.subr.bf16.mxu1 %v14476_v39 }
 0x7d4   :  { %10695 = vmatpush3.bf16.msra.mxu1 %v13364_v32  ;;  %v6066_v32 = vand.u32 4294901760, %v13447_v52 }
 0x7d5   :  { %10696 = vmatprep.subr.bf16.mxu1 %v14476_v39 }
 0x7d8   :  { %10698 = vmatpush3.bf16.msra.mxu1 %v13373_v28 }
 0x7d9   :  { %10699 = vmatprep.subr.bf16.mxu1 %v14476_v39 }
 0x7dc   :  { %10701 = vmatpush3.bf16.msra.mxu1 %v13382_v58  ;;  %v6067_v58 = vsub.f32 %v13447_v52, %v6066_v32 }
 0x7dd   :  { %10702 = vmatprep.subr.bf16.mxu1 %v14476_v39 }
 0x7de   :  { %v6068_v24 = vand.u32 4294901760, %v6067_v58 }
 0x7df   :  { %9579 = vmatmul.mubr.f32.vlgmr.msra.gmra.mrb[30].mxu1 %v13238_v47 }
 0x7e0   :  { %10704 = vmatpush3.bf16.msra.mxu1 %v13245_v16  ;;  %9613 = vmatprep.mubr.msk.f32.mxu1 %vm11623_vm0, %v14445_v17  ;;  %v5944_v16 = vld [vmem:[%s14363_s2 + $0x68] sm:$0xff]  ;;  %v10754_v0 = vpack.c.bf16 %v6068_v24, %v6061_v33 }
 0x7e1   :  { %10705 = vmatprep.subr.bf16.mxu1 %v14476_v39  ;;  %v5991_v13 = vand.u32 4294901760, %v5944_v16 }
 0x7e3   :  { %v13605_v57 = vsub.f32 %v5944_v16, %v5991_v13  ;;  %v6102_v16 = vsub.f32 %v13466_v40, %v6101_v43 }
 0x7e4   :  { %10707 = vmatpush3.bf16.msra.mxu1 %v13260_v2  ;;  %v5988_v2 = vand.u32 4294901760, %v5943_v56 }
 0x7e5   :  { %10708 = vmatprep.subr.bf16.mxu1 %v14476_v39  ;;  %v14409_v58 = vand.u32 4294901760, %v13605_v57 }
 0x7e6   :  { %v13603_v18 = vsub.f32 %v5943_v56, %v5988_v2  ;;  %v10760_v56 = vpack.c.bf16 %v6096_v1, %v6089_v3 }
 0x7e7   :  { %v6137_v23 = vsub.f32 %v13605_v57, %v14409_v58 }
 0x7e8   :  { %10710 = vmatpush3.bf16.msra.mxu1 %v13281_v60  ;;  %v13583_v60 = vpack.c.bf16 %v5991_v13, %v5988_v2  ;;  %v6109_v2 = vsub.f32 %v13468_v19, %v6108_v31  ;;  %v6103_v13 = vand.u32 4294901760, %v6102_v16  ;;  %v14410_v8 = vand.u32 4294901760, %v13603_v18 }
 0x7e9   :  { %10711 = vmatprep.subr.bf16.mxu1 %v14476_v39  ;;  %v6138_v12 = vand.u32 4294901760, %v6137_v23  ;;  %v10793_v23 = vpack.c.bf16 %v13605_v57, %v13603_v18 }
 0x7ea   :  { %10746 = vmatpush3.bf16.msra.mxu0 %v13583_v60  ;;  %v6130_v24 = vsub.f32 %v13603_v18, %v14410_v8  ;;  %v13744_v8 = vld [vmem:[#allocation6 + $0x30] sm:$0xff] }
 0x7eb   :  { %10747 = vmatprep.subr.bf16.mxu0 %v14476_v39 }
 0x7ec   :  { %10713 = vmatpush3.bf16.msra.mxu1 %v13299_v48  ;;  %v5994_v48 = vand.u32 4294901760, %v5945_v55  ;;  %v6131_v10 = vand.u32 4294901760, %v6130_v24  ;;  %v10790_v24 = vpack.c.bf16 %v13478_v5, %v13470_v34 }
 0x7ed   :  { %10714 = vmatprep.subr.bf16.mxu1 %v14476_v39 }
 0x7ee   :  { %v13607_v27 = vsub.f32 %v5945_v55, %v5994_v48  ;;  %v6110_v55 = vand.u32 4294901760, %v6109_v2  ;;  %v10769_v6 = vpack.c.bf16 %v6138_v12, %v6131_v10 }
 0x7f0   :  { %10716 = vmatpush3.bf16.msra.mxu1 %v13317_v37  ;;  %v6045_v37 = vand.u32 4294901760, %v13433_v25  ;;  %v14408_v7 = vand.u32 4294901760, %v13607_v27 }
 0x7f1   :  { %10717 = vmatprep.subr.bf16.mxu1 %v14476_v39 }
 0x7f2   :  { %v6046_v41 = vsub.f32 %v13433_v25, %v6045_v37  ;;  %v6144_v3 = vsub.f32 %v13607_v27, %v14408_v7 }
 0x7f4   :  { %10719 = vmatpush3.bf16.msra.mxu1 %v13335_v44  ;;  %v6053_v44 = vsub.f32 %v13435_v22, %v6052_v51  ;;  %v6047_v45 = vand.u32 4294901760, %v6046_v41  ;;  %v6145_v16 = vand.u32 4294901760, %v6144_v3 }
 0x7f5   :  { %10720 = vmatprep.subr.bf16.mxu1 %v14476_v39 }
 0x7f6   :  { %v6054_v28 = vand.u32 4294901760, %v6053_v44 }
 0x7f8   :  { %10722 = vmatpush3.bf16.msra.mxu1 %v13351_v46 }
 0x7f9   :  { %10723 = vmatprep.subr.bf16.mxu1 %v14476_v39 }
 0x7fc   :  { %10725 = vmatpush3.bf16.msra.mxu1 %v13367_v11  ;;  %v13615_v11 = vpack.c.bf16 %v6054_v28, %v6047_v45 }
 0x7fd   :  { %10870 = vmatprep.subr.bf16.mxu1 %v14476_v39 }
 0x7ff   :  { %9614 = vmatmul.mubr.f32.vlgmr.msra.gmra.mrb[30].mxu1 %v13238_v47  ;;  %v5946_v47 = vld [vmem:[%s14363_s2 + $0x78] sm:$0xff] }
 0x800   :  { %9858 = vmatprep.mubr.msk.f32.mxu1 %vm11623_vm0, %v14445_v17  ;;  %v5997_v61 = vand.u32 4294901760, %v5946_v47 }
 0x802   :  { %v13595_v36 = vpack.c.bf16 %v5997_v61, %v5994_v48  ;;  %v13609_v46 = vsub.f32 %v5946_v47, %v5997_v61  ;;  %v6115_v47 = vand.u32 4294901760, %v13470_v34  ;;  %v14415_v48 = vand.u32 4294901760, %v13478_v5 }
 0x803   :  { %v10763_v61 = vpack.c.bf16 %v6110_v55, %v6103_v13  ;;  %v10775_v55 = vpack.c.bf16 %v13435_v22, %v13433_v25  ;;  %v10829_v25 = vpack.c.bf16 %v6080_v50, %v6073_v30  ;;  %v10832_v22 = vpack.c.bf16 %v6094_v29, %v6087_v9 }
 0x804   :  { %10749 = vmatpush3.bf16.msra.mxu0 %v13595_v36  ;;  %v6116_v41 = vsub.f32 %v13470_v34, %v6115_v47  ;;  %v6123_v44 = vsub.f32 %v13478_v5, %v14415_v48  ;;  %v14407_v63 = vand.u32 4294901760, %v13609_v46  ;;  %v10796_v10 = vpack.c.bf16 %v13609_v46, %v13607_v27  ;;  %v13761_v48 = vld [vmem:[#allocation6 + $0x48] sm:$0xff] }
 0x805   :  { %10750 = vmatprep.subr.bf16.mxu0 %v14476_v39 }
 0x806   :  { %v6117_v45 = vand.u32 4294901760, %v6116_v41  ;;  %v6124_v28 = vand.u32 4294901760, %v6123_v44  ;;  %v6151_v1 = vsub.f32 %v13609_v46, %v14407_v63  ;;  %v10778_v41 = vpack.c.bf16 %v13447_v52, %v13437_v54 }
 0x807   :  { %v10781_v44 = vpack.c.bf16 %v13458_v53, %v13449_v42  ;;  %v10835_v54 = vpack.c.bf16 %v6108_v31, %v6101_v43  ;;  %v14483_v52 = vand.u32 4294901760, %v13478_v5  ;;  %v14484_v53 = vand.u32 4294901760, %v13603_v18  ;;  %v6602_v5 = vld [vmem:[#allocation6 + $0x50] sm:$0xff]  ;;  %v6607_v18 = vld [vmem:[#allocation6 + $0x78] sm:$0xff] }
 0x808   :  { %v10766_v33 = vpack.c.bf16 %v6124_v28, %v6117_v45  ;;  %v6152_v2 = vand.u32 4294901760, %v6151_v1  ;;  %v10784_v45 = vpack.c.bf16 %v13464_v20, %v13462_v15  ;;  %v10787_v28 = vpack.c.bf16 %v13468_v19, %v13466_v40 }
 0x809   :  { %v10838_v42 = vpack.c.bf16 %v14483_v52, %v6115_v47  ;;  %v14485_v15 = vand.u32 4294901760, %v13605_v57  ;;  %v14486_v40 = vand.u32 4294901760, %v13607_v27  ;;  %v14487_v19 = vand.u32 4294901760, %v13609_v46 }
 0x80a   :  { %v10772_v13 = vpack.c.bf16 %v6152_v2, %v6145_v16  ;;  %v6654_v27 = vand.u32 4294901760, %v6607_v18 }
 0x80b   :  { %v10841_v20 = vpack.c.bf16 %v14485_v15, %v14484_v53 }
 0x8d2   :  { %v5927_v12 = vpop.f32.mrb[30].mxu1 }
 0x8d3   :  { %v13687_v3 = vand.u32 4294901760, %v5927_v12  ;;  %v9615_v1 = vpop.f32.mrb[31].mxu1 }
 0x8d5   :  { %v13690_v16 = vsub.f32 %v5927_v12, %v13687_v3 }
 0x8d7   :  { %v6034_v2 = vand.u32 4294901760, %v13690_v16 }
 0x8d9   :  { %v6035_v63 = vsub.f32 %v13690_v16, %v6034_v2 }
 0x8db   :  { %v6036_v7 = vand.u32 4294901760, %v6035_v63 }
 0x8dd   :  { %9649 = vmatmul.mubr.f32.vlgmr.msra.gmra.mrb[34].mxu0 %v6036_v7 }
 0x8de   :  { %10752 = vmatpush3.bf16.msra.mxu0 %v13615_v11  ;;  %9683 = vmatprep.mubr.msk.f32.mxu0 %vm11623_vm0, %v14445_v17  ;;  %v13708_v11 = vld [vmem:[#allocation6] sm:$0xff] }
 0x8df   :  { %10753 = vmatprep.subr.bf16.mxu0 %v14476_v39 }
 0x8e2   :  { %10755 = vmatpush3.bf16.msra.mxu0 %v10754_v0  ;;  %v13710_v0 = vld [vmem:[#allocation6 + $0x8] sm:$0xff] }
 0x8e3   :  { %10756 = vmatprep.subr.bf16.mxu0 %v14476_v39 }
 0x8e6   :  { %10758 = vmatpush3.bf16.msra.mxu0 %v10757_v49  ;;  %v13712_v49 = vld [vmem:[#allocation6 + $0x10] sm:$0xff] }
 0x8e7   :  { %10759 = vmatprep.subr.bf16.mxu0 %v14476_v39  ;;  %v14413_v7 = vand.u32 4294901760, %v13712_v49 }
 0x8ea   :  { %10761 = vmatpush3.bf16.msra.mxu0 %v10760_v56  ;;  %v14414_v56 = vand.u32 4294901760, %v13708_v11 }
 0x8eb   :  { %10762 = vmatprep.subr.bf16.mxu0 %v14476_v39 }
 0x8ee   :  { %10764 = vmatpush3.bf16.msra.mxu0 %v10763_v61  ;;  %v14411_v61 = vand.u32 4294901760, %v13710_v0 }
 0x8ef   :  { %10765 = vmatprep.subr.bf16.mxu0 %v14476_v39 }
 0x8f2   :  { %10767 = vmatpush3.bf16.msra.mxu0 %v10766_v33  ;;  %v13718_v33 = vld [vmem:[#allocation6 + $0x18] sm:$0xff] }
 0x8f3   :  { %10768 = vmatprep.subr.bf16.mxu0 %v14476_v39  ;;  %v14412_v63 = vand.u32 4294901760, %v13718_v33 }
 0x8f5   :  { %v13738_v12 = vpack.c.bf16 %v14412_v63, %v14413_v7  ;;  %v6627_v63 = vand.u32 4294901760, %v13744_v8 }
 0x8f6   :  { %10770 = vmatpush3.bf16.msra.mxu0 %v10769_v6  ;;  %v13723_v6 = vld [vmem:[#allocation6 + $0x20] sm:$0xff] }
 0x8f7   :  { %10771 = vmatprep.subr.bf16.mxu0 %v14476_v39  ;;  %v14417_v1 = vand.u32 4294901760, %v13723_v6 }
 0x8fa   :  { %10773 = vmatpush3.bf16.msra.mxu0 %v10772_v13  ;;  %v13725_v13 = vld [vmem:[#allocation6 + $0x28] sm:$0xff] }
 0x8fb   :  { %10774 = vmatprep.subr.bf16.mxu0 %v14476_v39  ;;  %v14416_v58 = vand.u32 4294901760, %v13725_v13 }
 0x8fd   :  { %9684 = vmatmul.mubr.f32.vlgmr.msra.gmra.mrb[34].mxu0 %v13687_v3 }
 0x8fe   :  { %10776 = vmatpush3.bf16.msra.mxu0 %v10775_v55  ;;  %9718 = vmatprep.mubr.msk.f32.mxu0 %vm11623_vm0, %v14445_v17  ;;  %v13731_v55 = vpack.c.bf16 %v14411_v61, %v14414_v56  ;;  %v13746_v61 = vld [vmem:[#allocation6 + $0x38] sm:$0xff]  ;;  %v13759_v56 = vld [vmem:[#allocation6 + $0x40] sm:$0xff] }
 0x8ff   :  { %10777 = vmatprep.subr.bf16.mxu0 %v14476_v39  ;;  %v6630_v7 = vand.u32 4294901760, %v13746_v61 }
 0x900   :  { %10872 = vmatpush3.bf16.msra.mxu1 %v13731_v55 }
 0x901   :  { %10873 = vmatprep.subr.bf16.mxu1 %v14476_v39 }
 0x902   :  { %10779 = vmatpush3.bf16.msra.mxu0 %v10778_v41  ;;  %v13753_v41 = vpack.c.bf16 %v14416_v58, %v14417_v1  ;;  %v6633_v58 = vand.u32 4294901760, %v13759_v56  ;;  %v6636_v1 = vand.u32 4294901760, %v13761_v48 }
 0x903   :  { %10780 = vmatprep.subr.bf16.mxu0 %v14476_v39 }
 0x904   :  { %10875 = vmatpush3.bf16.msra.mxu1 %v13738_v12 }
 0x905   :  { %10876 = vmatprep.subr.bf16.mxu1 %v14476_v39 }
 0x906   :  { %10782 = vmatpush3.bf16.msra.mxu0 %v10781_v44  ;;  %v13768_v44 = vpack.c.bf16 %v6630_v7, %v6627_v63 }
 0x907   :  { %10783 = vmatprep.subr.bf16.mxu0 %v14476_v39 }
 0x908   :  { %10878 = vmatpush3.bf16.msra.mxu1 %v13753_v41 }
 0x909   :  { %10879 = vmatprep.subr.bf16.mxu1 %v14476_v39 }
 0x90a   :  { %10785 = vmatpush3.bf16.msra.mxu0 %v10784_v45  ;;  %v13782_v45 = vpack.c.bf16 %v6636_v1, %v6633_v58 }
 0x90b   :  { %10786 = vmatprep.subr.bf16.mxu0 %v14476_v39 }
 0x90c   :  { %10881 = vmatpush3.bf16.msra.mxu1 %v13768_v44 }
 0x90d   :  { %10882 = vmatprep.subr.bf16.mxu1 %v14476_v39 }
 0x90e   :  { %10788 = vmatpush3.bf16.msra.mxu0 %v10787_v28  ;;  %v10823_v28 = vpack.c.bf16 %v6052_v51, %v6045_v37  ;;  %v10844_v37 = vpack.c.bf16 %v14487_v19, %v14486_v40 }
 0x90f   :  { %10789 = vmatprep.subr.bf16.mxu0 %v14476_v39 }
 0x910   :  { %10884 = vmatpush3.bf16.msra.mxu1 %v13782_v45 }
 0x911   :  { %10885 = vmatprep.subr.bf16.mxu1 %v14476_v39 }
 0x912   :  { %10791 = vmatpush3.bf16.msra.mxu0 %v10790_v24  ;;  %v10826_v24 = vpack.c.bf16 %v6066_v32, %v6059_v21 }
 0x913   :  { %10792 = vmatprep.subr.bf16.mxu0 %v14476_v39 }
 0x916   :  { %10794 = vmatpush3.bf16.msra.mxu0 %v10793_v23 }
 0x917   :  { %10795 = vmatprep.subr.bf16.mxu0 %v14476_v39 }
 0x91a   :  { %10797 = vmatpush3.bf16.msra.mxu0 %v10796_v10 }
 0x91b   :  { %10798 = vmatprep.subr.bf16.mxu0 %v14476_v39 }
 0x91d   :  { %9719 = vmatmul.mubr.f32.vlgmr.msra.gmra.mrb[34].mxu0 %v13690_v16 }
 0x91e   :  { %10800 = vmatpush3.bf16.msra.mxu0 %v13431_v26  ;;  %9753 = vmatprep.mubr.msk.f32.mxu0 %vm11623_vm0, %v14445_v17 }
 0x91f   :  { %10801 = vmatprep.subr.bf16.mxu0 %v14476_v39 }
 0x922   :  { %10803 = vmatpush3.bf16.msra.mxu0 %v13445_v14 }
 0x923   :  { %10804 = vmatprep.subr.bf16.mxu0 %v14476_v39 }
 0x926   :  { %10806 = vmatpush3.bf16.msra.mxu0 %v13476_v35 }
 0x927   :  { %10807 = vmatprep.subr.bf16.mxu0 %v14476_v39 }
 0x92a   :  { %10809 = vmatpush3.bf16.msra.mxu0 %v13486_v4 }
 0x92b   :  { %10810 = vmatprep.subr.bf16.mxu0 %v14476_v39 }
 0x92e   :  { %10812 = vmatpush3.bf16.msra.mxu0 %v13494_v38 }
 0x92f   :  { %10813 = vmatprep.subr.bf16.mxu0 %v14476_v39 }
 0x932   :  { %10815 = vmatpush3.bf16.msra.mxu0 %v13502_v62 }
 0x933   :  { %10816 = vmatprep.subr.bf16.mxu0 %v14476_v39 }
 0x936   :  { %10818 = vmatpush3.bf16.msra.mxu0 %v13583_v60 }
 0x937   :  { %10819 = vmatprep.subr.bf16.mxu0 %v14476_v39 }
 0x93a   :  { %10821 = vmatpush3.bf16.msra.mxu0 %v13595_v36 }
 0x93b   :  { %10822 = vmatprep.subr.bf16.mxu0 %v14476_v39 }
 0x93d   :  { %9754 = vmatmul.mubr.f32.vlgmr.msra.gmra.mrb[34].mxu0 %v6034_v2 }
 0x93e   :  { %10824 = vmatpush3.bf16.msra.mxu0 %v10823_v28  ;;  %9788 = vmatprep.mubr.msk.f32.mxu0 %vm11623_vm0, %v14445_v17 }
 0x93f   :  { %10825 = vmatprep.subr.bf16.mxu0 %v14476_v39 }
 0x942   :  { %10827 = vmatpush3.bf16.msra.mxu0 %v10826_v24 }
 0x943   :  { %10828 = vmatprep.subr.bf16.mxu0 %v14476_v39 }
 0x946   :  { %10830 = vmatpush3.bf16.msra.mxu0 %v10829_v25  ;;  %v13941_v25 = vsub.f32 %v6607_v18, %v6654_v27 }
 0x947   :  { %10831 = vmatprep.subr.bf16.mxu0 %v14476_v39 }
 0x94a   :  { %10833 = vmatpush3.bf16.msra.mxu0 %v10832_v22 }
 0x94b   :  { %10834 = vmatprep.subr.bf16.mxu0 %v14476_v39 }
 0x94e   :  { %10836 = vmatpush3.bf16.msra.mxu0 %v10835_v54 }
 0x94f   :  { %10837 = vmatprep.subr.bf16.mxu0 %v14476_v39 }
 0x952   :  { %10839 = vmatpush3.bf16.msra.mxu0 %v10838_v42  ;;  %v14418_v42 = vand.u32 4294901760, %v13941_v25 }
 0x953   :  { %10840 = vmatprep.subr.bf16.mxu0 %v14476_v39 }
 0x956   :  { %10842 = vmatpush3.bf16.msra.mxu0 %v10841_v20  ;;  %v6808_v20 = vsub.f32 %v13941_v25, %v14418_v42 }
 0x957   :  { %10843 = vmatprep.subr.bf16.mxu0 %v14476_v39 }
 0x958   :  { %v6809_v19 = vand.u32 4294901760, %v6808_v20  ;;  %v14493_v20 = vand.u32 4294901760, %v13725_v13 }
 0x95a   :  { %10845 = vmatpush3.bf16.msra.mxu0 %v10844_v37 }
 0x95b   :  { %10846 = vmatprep.subr.bf16.mxu0 %v14476_v39 }
 0x95d   :  { %9789 = vmatmul.mubr.f32.vlgmr.msra.gmra.mrb[34].mxu0 %v13687_v3 }
 0x95e   :  { %10848 = vmatpush3.bf16.msra.mxu0 %v13431_v26  ;;  %9823 = vmatprep.mubr.msk.f32.mxu0 %vm11623_vm0, %v14445_v17  ;;  %v6603_v26 = vld [vmem:[#allocation6 + $0x58] sm:$0xff] }
 0x95f   :  { %10849 = vmatprep.subr.bf16.mxu0 %v14476_v39  ;;  %v6642_v34 = vand.u32 4294901760, %v6603_v26 }
 0x961   :  { %v13915_v32 = vsub.f32 %v6603_v26, %v6642_v34 }
 0x962   :  { %10851 = vmatpush3.bf16.msra.mxu0 %v13445_v14  ;;  %v6639_v14 = vand.u32 4294901760, %v6602_v5 }
 0x963   :  { %10852 = vmatprep.subr.bf16.mxu0 %v14476_v39  ;;  %v6779_v50 = vand.u32 4294901760, %v13915_v32 }
 0x964   :  { %v13913_v21 = vsub.f32 %v6602_v5, %v6639_v14 }
 0x965   :  { %v6780_v29 = vsub.f32 %v13915_v32, %v6779_v50 }
 0x966   :  { %10854 = vmatpush3.bf16.msra.mxu0 %v13476_v35  ;;  %v13895_v35 = vpack.c.bf16 %v6642_v34, %v6639_v14  ;;  %v6772_v30 = vand.u32 4294901760, %v13913_v21  ;;  %v13957_v5 = vpack.c.bf16 %v13915_v32, %v13913_v21  ;;  %v14488_v34 = vand.u32 4294901760, %v13708_v11 }
 0x967   :  { %10855 = vmatprep.subr.bf16.mxu0 %v14476_v39  ;;  %v6781_v23 = vand.u32 4294901760, %v6780_v29  ;;  %v14496_v32 = vand.u32 4294901760, %v13941_v25 }
 0x968   :  { %10887 = vmatpush3.bf16.msra.mxu1 %v13895_v35  ;;  %v6773_v9 = vsub.f32 %v13913_v21, %v6772_v30 }
 0x969   :  { %10888 = vmatprep.subr.bf16.mxu1 %v14476_v39 }
 0x96a   :  { %10857 = vmatpush3.bf16.msra.mxu0 %v13486_v4  ;;  %v6604_v4 = vld [vmem:[#allocation6 + $0x60] sm:$0xff]  ;;  %v6774_v47 = vand.u32 4294901760, %v6773_v9 }
 0x96b   :  { %10858 = vmatprep.subr.bf16.mxu0 %v14476_v39 }
 0x96c   :  { %v13931_v16 = vpack.c.bf16 %v6781_v23, %v6774_v47 }
 0x96e   :  { %10860 = vmatpush3.bf16.msra.mxu0 %v13494_v38  ;;  %v6605_v38 = vld [vmem:[#allocation6 + $0x68] sm:$0xff] }
 0x96f   :  { %10861 = vmatprep.subr.bf16.mxu0 %v14476_v39 }
 0x972   :  { %10863 = vmatpush3.bf16.msra.mxu0 %v13502_v62  ;;  %v6645_v62 = vand.u32 4294901760, %v6604_v4 }
 0x973   :  { %10864 = vmatprep.subr.bf16.mxu0 %v14476_v39 }
 0x974   :  { %v13925_v43 = vsub.f32 %v6604_v4, %v6645_v62  ;;  %v13970_v4 = vsub.f32 %v13708_v11, %v14488_v34  ;;  %v13988_v11 = vld [vmem:[%s14368_s7] sm:$0xff] }
 0x976   :  { %10866 = vmatpush3.bf16.msra.mxu0 %v13583_v60  ;;  %v6648_v60 = vand.u32 4294901760, %v6605_v38  ;;  %v6786_v10 = vand.u32 4294901760, %v13925_v43 }
 0x977   :  { %10867 = vmatprep.subr.bf16.mxu0 %v14476_v39 }
 0x978   :  { %v13901_v51 = vpack.c.bf16 %v6648_v60, %v6645_v62  ;;  %v13927_v31 = vsub.f32 %v6605_v38, %v6648_v60  ;;  %v6787_v2 = vsub.f32 %v13925_v43, %v6786_v10  ;;  %v14489_v38 = vand.u32 4294901760, %v13710_v0 }
 0x979   :  { %v5949_v60 = vsub.s32 3, %v12250_v59 }
 0x97a   :  { %10869 = vmatpush3.bf16.msra.mxu0 %v13595_v36  ;;  %v6606_v36 = vld [vmem:[#allocation6 + $0x70] sm:$0xff]  ;;  %10890 = vmatpush3.bf16.msra.mxu1 %v13901_v51  ;;  %v6788_v22 = vand.u32 4294901760, %v6787_v2  ;;  %v13961_v26 = vpack.c.bf16 %v13927_v31, %v13925_v43  ;;  %v13975_v62 = vsub.f32 %v13710_v0, %v14489_v38  ;;  %v14491_v0 = vand.u32 4294901760, %v13718_v33 }
 0x97b   :  { %11014 = vmatprep.subr.bf16.mxu0 %v14476_v39  ;;  %v6651_v57 = vand.u32 4294901760, %v6606_v36  ;;  %10891 = vmatprep.subr.bf16.mxu1 %v14476_v39  ;;  %v5950_v9 = vrot.slane %v13988_v11, %v5949_v60 }
 0x97c   :  { %v6709_v18 = vand.u32 4294901760, %v13975_v62  ;;  %v13994_v29 = vsub.f32 %v13718_v33, %v14491_v0  ;;  %v14034_v0 = vsub.f32 %v13744_v8, %v6627_v63 }
 0x97d   :  { %9824 = vmatmul.mubr.f32.vlgmr.msra.gmra.mrb[34].mxu0 %v13687_v3  ;;  %v13907_v46 = vpack.c.bf16 %v6654_v27, %v6651_v57  ;;  %v14420_v3 = vand.u32 4294901760, %v13927_v31  ;;  %v13939_v24 = vsub.f32 %v6606_v36, %v6651_v57  ;;  %v6702_v36 = vand.u32 4294901760, %v13970_v4 }
 0x97e   :  { %11016 = vmatpush3.bf16.msra.mxu0 %v13731_v55  ;;  %10068 = vmatprep.mubr.msk.f32.mxu0 %vm11623_vm0, %v14445_v17  ;;  %v14490_v57 = vand.u32 4294901760, %v13712_v49 }
 0x97f   :  { %11017 = vmatprep.subr.bf16.mxu0 %v14476_v39  ;;  %10893 = vmatpush3.bf16.msra.mxu1 %v13907_v46  ;;  %v6794_v28 = vsub.f32 %v13927_v31, %v14420_v3  ;;  %v14419_v52 = vand.u32 4294901760, %v13939_v24  ;;  %v13965_v14 = vpack.c.bf16 %v13941_v25, %v13939_v24  ;;  %v6703_v23 = vsub.f32 %v13970_v4, %v6702_v36 }
 0x980   :  { %10894 = vmatprep.subr.bf16.mxu1 %v14476_v39  ;;  %v13983_v27 = vsub.f32 %v13712_v49, %v14490_v57  ;;  %v6710_v49 = vsub.f32 %v13975_v62, %v6709_v18  ;;  %v14495_v21 = vand.u32 4294901760, %v13939_v24 }
 0x981   :  { %v6795_v54 = vand.u32 4294901760, %v6794_v28  ;;  %v6801_v15 = vsub.f32 %v13939_v24, %v14419_v52  ;;  %v6704_v34 = vand.u32 4294901760, %v6703_v23 }
 0x982   :  { %11019 = vmatpush3.bf16.msra.mxu0 %v13738_v12  ;;  %v6716_v2 = vand.u32 4294901760, %v13983_v27  ;;  %v6711_v38 = vand.u32 4294901760, %v6710_v49 }
 0x983   :  { %11020 = vmatprep.subr.bf16.mxu0 %v14476_v39  ;;  %v13945_v53 = vpack.c.bf16 %v6795_v54, %v6788_v22  ;;  %v6802_v40 = vand.u32 4294901760, %v6801_v15  ;;  %v6723_v54 = vand.u32 4294901760, %v13994_v29  ;;  %v14492_v15 = vand.u32 4294901760, %v13723_v6 }
 0x984   :  { %v6717_v60 = vsub.f32 %v13983_v27, %v6716_v2  ;;  %v14042_v49 = vpack.c.bf16 %v6711_v38, %v6704_v34  ;;  %v14058_v34 = vsub.f32 %v13759_v56, %v6633_v58  ;;  %v14063_v38 = vsub.f32 %v13761_v48, %v6636_v1 }
 0x985   :  { %v13953_v37 = vpack.c.bf16 %v6809_v19, %v6802_v40  ;;  %v14009_v33 = vsub.f32 %v13723_v6, %v14492_v15  ;;  %v14014_v40 = vsub.f32 %v13725_v13, %v14493_v20  ;;  %v6724_v6 = vsub.f32 %v13994_v29, %v6723_v54 }
 0x986   :  { %11022 = vmatpush3.bf16.msra.mxu0 %v13753_v41  ;;  %v6758_v56 = vand.u32 4294901760, %v14058_v34  ;;  %v6765_v48 = vand.u32 4294901760, %v14063_v38 }
 0x987   :  { %11023 = vmatprep.subr.bf16.mxu0 %v14476_v39  ;;  %v6730_v13 = vand.u32 4294901760, %v14009_v33  ;;  %v6725_v20 = vand.u32 4294901760, %v6724_v6 }
 0x989   :  { %v6731_v8 = vsub.f32 %v14009_v33, %v6730_v13 }
 0x98a   :  { %11025 = vmatpush3.bf16.msra.mxu0 %v13768_v44 }
 0x98b   :  { %11026 = vmatprep.subr.bf16.mxu0 %v14476_v39  ;;  %v6732_v42 = vand.u32 4294901760, %v6731_v8  ;;  %v6766_v8 = vsub.f32 %v14063_v38, %v6765_v48 }
 0x98e   :  { %11028 = vmatpush3.bf16.msra.mxu0 %v13782_v45 }
 0x98f   :  { %11029 = vmatprep.subr.bf16.mxu0 %v14476_v39 }
 0x992   :  { %11031 = vmatpush3.bf16.msra.mxu0 %v13895_v35 }
 0x993   :  { %11032 = vmatprep.subr.bf16.mxu0 %v14476_v39 }
 0x996   :  { %11034 = vmatpush3.bf16.msra.mxu0 %v13901_v51 }
 0x997   :  { %11035 = vmatprep.subr.bf16.mxu0 %v14476_v39 }
 0x99a   :  { %11037 = vmatpush3.bf16.msra.mxu0 %v13907_v46 }
 0x99b   :  { %11038 = vmatprep.subr.bf16.mxu0 %v14476_v39 }
 0xa50   :  { %v6588_v47 = vpop.f32.mrb[34].mxu0 }
 0xa51   :  { %v14003_v28 = vadd.f32 %v6588_v47, %v5950_v9  ;;  %v9825_v22 = vpop.f32.mrb[35].mxu0  ;;  %v6737_v9 = vand.u32 4294901760, %v14014_v40  ;;  %v14039_v47 = vsub.f32 %v13746_v61, %v6630_v7  ;;  %v6744_v61 = vand.u32 4294901760, %v14034_v0 }
 0xa52   :  { %v6718_v22 = vand.u32 4294901760, %v6717_v60 }
 0xa53   :  { %v14017_v19 = vand.u32 4294901760, %v14003_v28  ;;  %v6738_v63 = vsub.f32 %v14014_v40, %v6737_v9  ;;  %v6751_v7 = vand.u32 4294901760, %v14039_v47  ;;  %v6745_v3 = vsub.f32 %v14034_v0, %v6744_v61 }
 0xa54   :  { %v14065_v6 = vpack.c.bf16 %v6725_v20, %v6718_v22  ;;  %v6759_v20 = vsub.f32 %v14058_v34, %v6758_v56 }
 0xa55   :  { %v14024_v57 = vsub.f32 %v14003_v28, %v14017_v19  ;;  %v6739_v52 = vand.u32 4294901760, %v6738_v63  ;;  %v6752_v58 = vsub.f32 %v14039_v47, %v6751_v7  ;;  %v6746_v22 = vand.u32 4294901760, %v6745_v3 }
 0xa57   :  { %v6691_v23 = vand.u32 4294901760, %v14024_v57  ;;  %v14079_v1 = vpack.c.bf16 %v6739_v52, %v6732_v42  ;;  %v6760_v52 = vand.u32 4294901760, %v6759_v20  ;;  %v6767_v42 = vand.u32 4294901760, %v6766_v8 }
 0xa58   :  { %v14133_v20 = vpack.c.bf16 %v14063_v38, %v14058_v34  ;;  %v14166_v8 = vpack.c.bf16 %v6709_v18, %v6702_v36  ;;  %v14202_v36 = vpack.c.bf16 %v6765_v48, %v6758_v56  ;;  %v14210_v18 = vpack.c.bf16 %v6779_v50, %v6772_v30 }
 0xa59   :  { %v6692_v15 = vsub.f32 %v14024_v57, %v6691_v23  ;;  %v14094_v3 = vpack.c.bf16 %v6767_v42, %v6760_v52  ;;  %v14176_v52 = vpack.c.bf16 %v6723_v54, %v6716_v2  ;;  %v14226_v30 = vpack.c.bf16 %v14496_v32, %v14495_v21 }
 0xa5b   :  { %v6693_v60 = vand.u32 4294901760, %v6692_v15  ;;  %v6753_v15 = vand.u32 4294901760, %v6752_v58  ;;  %v14113_v58 = vpack.c.bf16 %v13994_v29, %v13983_v27  ;;  %v14494_v27 = vand.u32 4294901760, %v13927_v31 }
 0xa5d   :  { %9859 = vmatmul.mubr.f32.vlgmr.msra.gmra.mrb[32].mxu1 %v6693_v60  ;;  %v14090_v63 = vpack.c.bf16 %v6753_v15, %v6746_v22  ;;  %v14106_v60 = vpack.c.bf16 %v13975_v62, %v13970_v4  ;;  %v14121_v22 = vpack.c.bf16 %v14014_v40, %v14009_v33  ;;  %v14127_v15 = vpack.c.bf16 %v14039_v47, %v14034_v0 }
 0xa5e   :  { %10896 = vmatpush3.bf16.msra.mxu1 %v14042_v49  ;;  %9893 = vmatprep.mubr.msk.f32.mxu1 %vm11623_vm0, %v14445_v17  ;;  %v14186_v4 = vpack.c.bf16 %v6737_v9, %v6730_v13  ;;  %v14194_v62 = vpack.c.bf16 %v6751_v7, %v6744_v61  ;;  %v14218_v29 = vpack.c.bf16 %v14494_v27, %v6786_v10 }
 0xa5f   :  { %10897 = vmatprep.subr.bf16.mxu1 %v14476_v39 }
 0xa62   :  { %10899 = vmatpush3.bf16.msra.mxu1 %v14065_v6 }
 0xa63   :  { %10900 = vmatprep.subr.bf16.mxu1 %v14476_v39 }
 0xa66   :  { %10902 = vmatpush3.bf16.msra.mxu1 %v14079_v1 }
 0xa67   :  { %10903 = vmatprep.subr.bf16.mxu1 %v14476_v39 }
 0xa6a   :  { %10905 = vmatpush3.bf16.msra.mxu1 %v14090_v63 }
 0xa6b   :  { %10906 = vmatprep.subr.bf16.mxu1 %v14476_v39 }
 0xa6e   :  { %10908 = vmatpush3.bf16.msra.mxu1 %v14094_v3 }
 0xa6f   :  { %10909 = vmatprep.subr.bf16.mxu1 %v14476_v39 }
 0xa72   :  { %10911 = vmatpush3.bf16.msra.mxu1 %v13931_v16 }
 0xa73   :  { %10912 = vmatprep.subr.bf16.mxu1 %v14476_v39 }
 0xa76   :  { %10914 = vmatpush3.bf16.msra.mxu1 %v13945_v53 }
 0xa77   :  { %10915 = vmatprep.subr.bf16.mxu1 %v14476_v39 }
 0xa7a   :  { %10917 = vmatpush3.bf16.msra.mxu1 %v13953_v37 }
 0xa7b   :  { %10918 = vmatprep.subr.bf16.mxu1 %v14476_v39 }
 0xa7d   :  { %9894 = vmatmul.mubr.f32.vlgmr.msra.gmra.mrb[32].mxu1 %v14017_v19 }
 0xa7e   :  { %10920 = vmatpush3.bf16.msra.mxu1 %v14106_v60  ;;  %9928 = vmatprep.mubr.msk.f32.mxu1 %vm11623_vm0, %v14445_v17 }
 0xa7f   :  { %10921 = vmatprep.subr.bf16.mxu1 %v14476_v39 }
 0xa82   :  { %10923 = vmatpush3.bf16.msra.mxu1 %v14113_v58 }
 0xa83   :  { %10924 = vmatprep.subr.bf16.mxu1 %v14476_v39 }
 0xa86   :  { %10926 = vmatpush3.bf16.msra.mxu1 %v14121_v22 }
 0xa87   :  { %10927 = vmatprep.subr.bf16.mxu1 %v14476_v39 }
 0xa8a   :  { %10929 = vmatpush3.bf16.msra.mxu1 %v14127_v15 }
 0xa8b   :  { %10930 = vmatprep.subr.bf16.mxu1 %v14476_v39 }
 0xa8e   :  { %10932 = vmatpush3.bf16.msra.mxu1 %v14133_v20 }
 0xa8f   :  { %10933 = vmatprep.subr.bf16.mxu1 %v14476_v39 }
 0xa92   :  { %10935 = vmatpush3.bf16.msra.mxu1 %v13957_v5 }
 0xa93   :  { %10936 = vmatprep.subr.bf16.mxu1 %v14476_v39 }
 0xa96   :  { %10938 = vmatpush3.bf16.msra.mxu1 %v13961_v26 }
 0xa97   :  { %10939 = vmatprep.subr.bf16.mxu1 %v14476_v39 }
 0xa9a   :  { %10941 = vmatpush3.bf16.msra.mxu1 %v13965_v14 }
 0xa9b   :  { %10942 = vmatprep.subr.bf16.mxu1 %v14476_v39 }
 0xa9d   :  { %9929 = vmatmul.mubr.f32.vlgmr.msra.gmra.mrb[32].mxu1 %v14024_v57 }
 0xa9e   :  { %10944 = vmatpush3.bf16.msra.mxu1 %v13731_v55  ;;  %9963 = vmatprep.mubr.msk.f32.mxu1 %vm11623_vm0, %v14445_v17 }
 0xa9f   :  { %10945 = vmatprep.subr.bf16.mxu1 %v14476_v39 }
 0xaa2   :  { %10947 = vmatpush3.bf16.msra.mxu1 %v13738_v12 }
 0xaa3   :  { %10948 = vmatprep.subr.bf16.mxu1 %v14476_v39 }
 0xaa6   :  { %10950 = vmatpush3.bf16.msra.mxu1 %v13753_v41 }
 0xaa7   :  { %10951 = vmatprep.subr.bf16.mxu1 %v14476_v39 }
 0xaaa   :  { %10953 = vmatpush3.bf16.msra.mxu1 %v13768_v44 }
 0xaab   :  { %10954 = vmatprep.subr.bf16.mxu1 %v14476_v39 }
 0xaae   :  { %10956 = vmatpush3.bf16.msra.mxu1 %v13782_v45 }
 0xaaf   :  { %10957 = vmatprep.subr.bf16.mxu1 %v14476_v39 }
 0xab2   :  { %10959 = vmatpush3.bf16.msra.mxu1 %v13895_v35 }
 0xab3   :  { %10960 = vmatprep.subr.bf16.mxu1 %v14476_v39 }
 0xab6   :  { %10962 = vmatpush3.bf16.msra.mxu1 %v13901_v51 }
 0xab7   :  { %10963 = vmatprep.subr.bf16.mxu1 %v14476_v39 }
 0xaba   :  { %10965 = vmatpush3.bf16.msra.mxu1 %v13907_v46 }
 0xabb   :  { %10966 = vmatprep.subr.bf16.mxu1 %v14476_v39 }
 0xabd   :  { %9964 = vmatmul.mubr.f32.vlgmr.msra.gmra.mrb[32].mxu1 %v6691_v23 }
 0xabe   :  { %10968 = vmatpush3.bf16.msra.mxu1 %v14166_v8  ;;  %9998 = vmatprep.mubr.msk.f32.mxu1 %vm11623_vm0, %v14445_v17 }
 0xabf   :  { %10969 = vmatprep.subr.bf16.mxu1 %v14476_v39 }
 0xac2   :  { %10971 = vmatpush3.bf16.msra.mxu1 %v14176_v52 }
 0xac3   :  { %10972 = vmatprep.subr.bf16.mxu1 %v14476_v39 }
 0xac6   :  { %10974 = vmatpush3.bf16.msra.mxu1 %v14186_v4 }
 0xac7   :  { %10975 = vmatprep.subr.bf16.mxu1 %v14476_v39 }
 0xaca   :  { %10977 = vmatpush3.bf16.msra.mxu1 %v14194_v62 }
 0xacb   :  { %10978 = vmatprep.subr.bf16.mxu1 %v14476_v39 }
 0xace   :  { %10980 = vmatpush3.bf16.msra.mxu1 %v14202_v36 }
 0xacf   :  { %10981 = vmatprep.subr.bf16.mxu1 %v14476_v39 }
 0xad2   :  { %10983 = vmatpush3.bf16.msra.mxu1 %v14210_v18 }
 0xad3   :  { %10984 = vmatprep.subr.bf16.mxu1 %v14476_v39 }
 0xad6   :  { %10986 = vmatpush3.bf16.msra.mxu1 %v14218_v29 }
 0xad7   :  { %10987 = vmatprep.subr.bf16.mxu1 %v14476_v39 }
 0xada   :  { %10989 = vmatpush3.bf16.msra.mxu1 %v14226_v30 }
 0xadb   :  { %10990 = vmatprep.subr.bf16.mxu1 %v14476_v39 }
 0xadd   :  { %9999 = vmatmul.mubr.f32.vlgmr.msra.gmra.mrb[32].mxu1 %v14017_v19 }
 0xade   :  { %10992 = vmatpush3.bf16.msra.mxu1 %v13731_v55  ;;  %10033 = vmatprep.mubr.msk.f32.mxu1 %vm11623_vm0, %v14445_v17 }
 0xadf   :  { %10993 = vmatprep.subr.bf16.mxu1 %v14476_v39 }
 0xae2   :  { %10995 = vmatpush3.bf16.msra.mxu1 %v13738_v12 }
 0xae3   :  { %10996 = vmatprep.subr.bf16.mxu1 %v14476_v39 }
 0xae6   :  { %10998 = vmatpush3.bf16.msra.mxu1 %v13753_v41 }
 0xae7   :  { %10999 = vmatprep.subr.bf16.mxu1 %v14476_v39 }
 0xaea   :  { %11001 = vmatpush3.bf16.msra.mxu1 %v13768_v44 }
 0xaeb   :  { %11002 = vmatprep.subr.bf16.mxu1 %v14476_v39 }
 0xaee   :  { %11004 = vmatpush3.bf16.msra.mxu1 %v13782_v45 }
 0xaef   :  { %11005 = vmatprep.subr.bf16.mxu1 %v14476_v39 }
 0xaf2   :  { %11007 = vmatpush3.bf16.msra.mxu1 %v13895_v35 }
 0xaf3   :  { %11008 = vmatprep.subr.bf16.mxu1 %v14476_v39 }
 0xaf6   :  { %11010 = vmatpush3.bf16.msra.mxu1 %v13901_v51 }
 0xaf7   :  { %11011 = vmatprep.subr.bf16.mxu1 %v14476_v39 }
 0xafa   :  { %11013 = vmatpush3.bf16.msra.mxu1 %v13907_v46 }
 0xafd   :  { %10034 = vmatmul.mubr.f32.vlgmr.msra.gmra.mrb[32].mxu1 %v14017_v19 }
 0xbd0   :  { %v7245_v50 = vpop.f32.mrb[32].mxu1 }
 0xbd1   :  { %v14251_v43 = vsub.f32 %v14003_v28, %v7245_v50  ;;  %v10035_v31 = vpop.f32.mrb[33].mxu1 }
 0xbd3   :  { %v7250_v10 = vmul.f32 %v14251_v43, %v14251_v43 }
 0xbd5   :  { %v14255_v24 = vand.u32 4294901760, %v7250_v10 }
 0xbd7   :  { %v7333_v25 = vsub.f32 %v7250_v10, %v14255_v24 }
 0xbd9   :  { %v7334_v2 = vand.u32 4294901760, %v7333_v25 }
 0xbdb   :  { %v7335_v54 = vsub.f32 %v7333_v25, %v7334_v2 }
 0xbdd   :  { %v7336_v33 = vand.u32 4294901760, %v7335_v54 }
 0xbdf   :  { %10069 = vmatmul.mubr.f32.vlgmr.msra.gmra.mrb[36].mxu0 %v7336_v33 }
 0xbe0   :  { %11040 = vmatpush3.bf16.msra.mxu0 %v14042_v49  ;;  %10103 = vmatprep.mubr.msk.f32.mxu0 %vm11623_vm0, %v14445_v17 }
 0xbe1   :  { %11041 = vmatprep.subr.bf16.mxu0 %v14476_v39 }
 0xbe4   :  { %11043 = vmatpush3.bf16.msra.mxu0 %v14065_v6 }
 0xbe5   :  { %11044 = vmatprep.subr.bf16.mxu0 %v14476_v39 }
 0xbe8   :  { %11046 = vmatpush3.bf16.msra.mxu0 %v14079_v1 }
 0xbe9   :  { %11047 = vmatprep.subr.bf16.mxu0 %v14476_v39 }
 0xbec   :  { %11049 = vmatpush3.bf16.msra.mxu0 %v14090_v63 }
 0xbed   :  { %11050 = vmatprep.subr.bf16.mxu0 %v14476_v39 }
 0xbf0   :  { %11052 = vmatpush3.bf16.msra.mxu0 %v14094_v3 }
 0xbf1   :  { %11053 = vmatprep.subr.bf16.mxu0 %v14476_v39 }
 0xbf4   :  { %11055 = vmatpush3.bf16.msra.mxu0 %v13931_v16 }
 0xbf5   :  { %11056 = vmatprep.subr.bf16.mxu0 %v14476_v39 }
 0xbf8   :  { %11058 = vmatpush3.bf16.msra.mxu0 %v13945_v53 }
 0xbf9   :  { %11059 = vmatprep.subr.bf16.mxu0 %v14476_v39 }
 0xbfc   :  { %11061 = vmatpush3.bf16.msra.mxu0 %v13953_v37 }
 0xbfd   :  { %11062 = vmatprep.subr.bf16.mxu0 %v14476_v39 }
 0xbff   :  { %10104 = vmatmul.mubr.f32.vlgmr.msra.gmra.mrb[36].mxu0 %v14255_v24 }
 0xc00   :  { %11064 = vmatpush3.bf16.msra.mxu0 %v14106_v60  ;;  %10138 = vmatprep.mubr.msk.f32.mxu0 %vm11623_vm0, %v14445_v17 }
 0xc01   :  { %11065 = vmatprep.subr.bf16.mxu0 %v14476_v39 }
 0xc04   :  { %11067 = vmatpush3.bf16.msra.mxu0 %v14113_v58 }
 0xc05   :  { %11068 = vmatprep.subr.bf16.mxu0 %v14476_v39 }
 0xc08   :  { %11070 = vmatpush3.bf16.msra.mxu0 %v14121_v22 }
 0xc09   :  { %11071 = vmatprep.subr.bf16.mxu0 %v14476_v39 }
 0xc0c   :  { %11073 = vmatpush3.bf16.msra.mxu0 %v14127_v15 }
 0xc0d   :  { %11074 = vmatprep.subr.bf16.mxu0 %v14476_v39 }
 0xc10   :  { %11076 = vmatpush3.bf16.msra.mxu0 %v14133_v20 }
 0xc11   :  { %11077 = vmatprep.subr.bf16.mxu0 %v14476_v39 }
 0xc14   :  { %11079 = vmatpush3.bf16.msra.mxu0 %v13957_v5 }
 0xc15   :  { %11080 = vmatprep.subr.bf16.mxu0 %v14476_v39 }
 0xc18   :  { %11082 = vmatpush3.bf16.msra.mxu0 %v13961_v26 }
 0xc19   :  { %11083 = vmatprep.subr.bf16.mxu0 %v14476_v39 }
 0xc1c   :  { %11085 = vmatpush3.bf16.msra.mxu0 %v13965_v14 }
 0xc1d   :  { %11086 = vmatprep.subr.bf16.mxu0 %v14476_v39 }
 0xc1f   :  { %10139 = vmatmul.mubr.f32.vlgmr.msra.gmra.mrb[36].mxu0 %v7333_v25 }
 0xc20   :  { %11088 = vmatpush3.bf16.msra.mxu0 %v13731_v55  ;;  %10173 = vmatprep.mubr.msk.f32.mxu0 %vm11623_vm0, %v14445_v17 }
 0xc21   :  { %11089 = vmatprep.subr.bf16.mxu0 %v14476_v39 }
 0xc24   :  { %11091 = vmatpush3.bf16.msra.mxu0 %v13738_v12 }
 0xc25   :  { %11092 = vmatprep.subr.bf16.mxu0 %v14476_v39 }
 0xc28   :  { %11094 = vmatpush3.bf16.msra.mxu0 %v13753_v41 }
 0xc29   :  { %11095 = vmatprep.subr.bf16.mxu0 %v14476_v39 }
 0xc2c   :  { %11097 = vmatpush3.bf16.msra.mxu0 %v13768_v44 }
 0xc2d   :  { %11098 = vmatprep.subr.bf16.mxu0 %v14476_v39 }
 0xc30   :  { %11100 = vmatpush3.bf16.msra.mxu0 %v13782_v45 }
 0xc31   :  { %11101 = vmatprep.subr.bf16.mxu0 %v14476_v39 }
 0xc34   :  { %11103 = vmatpush3.bf16.msra.mxu0 %v13895_v35 }
 0xc35   :  { %11104 = vmatprep.subr.bf16.mxu0 %v14476_v39 }
 0xc38   :  { %11106 = vmatpush3.bf16.msra.mxu0 %v13901_v51 }
 0xc39   :  { %11107 = vmatprep.subr.bf16.mxu0 %v14476_v39 }
 0xc3c   :  { %11109 = vmatpush3.bf16.msra.mxu0 %v13907_v46 }
 0xc3d   :  { %11110 = vmatprep.subr.bf16.mxu0 %v14476_v39 }
 0xc3f   :  { %10174 = vmatmul.mubr.f32.vlgmr.msra.gmra.mrb[36].mxu0 %v7334_v2 }
 0xc40   :  { %11112 = vmatpush3.bf16.msra.mxu0 %v14166_v8  ;;  %10208 = vmatprep.mubr.msk.f32.mxu0 %vm11623_vm0, %v14445_v17 }
 0xc41   :  { %11113 = vmatprep.subr.bf16.mxu0 %v14476_v39 }
 0xc44   :  { %11115 = vmatpush3.bf16.msra.mxu0 %v14176_v52 }
 0xc45   :  { %11116 = vmatprep.subr.bf16.mxu0 %v14476_v39 }
 0xc48   :  { %11118 = vmatpush3.bf16.msra.mxu0 %v14186_v4 }
 0xc49   :  { %11119 = vmatprep.subr.bf16.mxu0 %v14476_v39 }
 0xc4c   :  { %11121 = vmatpush3.bf16.msra.mxu0 %v14194_v62 }
 0xc4d   :  { %11122 = vmatprep.subr.bf16.mxu0 %v14476_v39 }
 0xc50   :  { %11124 = vmatpush3.bf16.msra.mxu0 %v14202_v36 }
 0xc51   :  { %11125 = vmatprep.subr.bf16.mxu0 %v14476_v39 }
 0xc54   :  { %11127 = vmatpush3.bf16.msra.mxu0 %v14210_v18 }
 0xc55   :  { %11128 = vmatprep.subr.bf16.mxu0 %v14476_v39 }
 0xc58   :  { %11130 = vmatpush3.bf16.msra.mxu0 %v14218_v29 }
 0xc59   :  { %11131 = vmatprep.subr.bf16.mxu0 %v14476_v39 }
 0xc5c   :  { %11133 = vmatpush3.bf16.msra.mxu0 %v14226_v30 }
 0xc5d   :  { %11134 = vmatprep.subr.bf16.mxu0 %v14476_v39 }
 0xc5f   :  { %10209 = vmatmul.mubr.f32.vlgmr.msra.gmra.mrb[36].mxu0 %v14255_v24 }
 0xc60   :  { %11136 = vmatpush3.bf16.msra.mxu0 %v13731_v55  ;;  %10243 = vmatprep.mubr.msk.f32.mxu0 %vm11623_vm0, %v14445_v17 }
 0xc61   :  { %11137 = vmatprep.subr.bf16.mxu0 %v14476_v39 }
 0xc64   :  { %11139 = vmatpush3.bf16.msra.mxu0 %v13738_v12 }
 0xc65   :  { %11140 = vmatprep.subr.bf16.mxu0 %v14476_v39 }
 0xc68   :  { %11142 = vmatpush3.bf16.msra.mxu0 %v13753_v41  ;;  %v7896_v41 = vsub.s32 4, %v12250_v59 }
 0xc69   :  { %11143 = vmatprep.subr.bf16.mxu0 %v14476_v39 }
 0xc6c   :  { %11145 = vmatpush3.bf16.msra.mxu0 %v13768_v44  ;;  %v7901_v44 = vsub.s32 5, %v12250_v59 }
 0xc6d   :  { %11146 = vmatprep.subr.bf16.mxu0 %v14476_v39 }
 0xc70   :  { %11148 = vmatpush3.bf16.msra.mxu0 %v13782_v45  ;;  %v7897_v45 = vrot.slane %v13988_v11, %v7896_v41 }
 0xc71   :  { %11149 = vmatprep.subr.bf16.mxu0 %v14476_v39 }
 0xc74   :  { %11151 = vmatpush3.bf16.msra.mxu0 %v13895_v35 }
 0xc75   :  { %11152 = vmatprep.subr.bf16.mxu0 %v14476_v39 }
 0xc78   :  { %11154 = vmatpush3.bf16.msra.mxu0 %v13901_v51  ;;  %v7902_v51 = vrot.slane %v13988_v11, %v7901_v44 }
 0xc79   :  { %11155 = vmatprep.subr.bf16.mxu0 %v14476_v39 }
 0xc7c   :  { %11157 = vmatpush3.bf16.msra.mxu0 %v13907_v46  ;;  %v11543_v46 = vld [vmem:[%s14361_s0] sm:$0xff] }
 0xc7f   :  { %10244 = vmatmul.mubr.f32.vlgmr.msra.gmra.mrb[36].mxu0 %v14255_v24 }
 0xd52   :  { %v7888_v17 = vpop.f32.mrb[36].mxu0 }
 0xd53   :  { %v11161_v55 = vadd.f32 1e-05, %v7888_v17  ;;  %v10245_v12 = vpop.f32.mrb[37].mxu0 }
 0xd55   :  { %11524 = vrsqrt.f32 %v11161_v55 }
 0xd5f   :  { %v11525_v35 = vpop.eup %11524 }
 0xd60   :  { %v7893_v16 = vmul.f32 %v11525_v35, %v14251_v43 }
 0xd62   :  { %v7898_v39 = vmul.f32 %v7897_v45, %v7893_v16 }
 0xd64   :  { %v7903_v53 = vadd.f32 %v7902_v51, %v7898_v39 }
 0xd66   :  { %v7904_v37 = vadd.f32 %v11543_v46, %v7903_v53 }
 0xd68   :  { %7905 = vst [vmem:[%s14369_s8] sm:$0xff] %v7904_v37 }
 0xd69   :  { %7910 = vsyncpa [#allocation3], 1 }
 0xd6a   :  { %7911 = vsyncpa [#allocation5], 1 }

</bundles_post_ra>
